<compile_context>
chip_gen: v5e
topology: v5e:2x2
jax: 0.10.0
libtpu: 0.0.40
codegen_flags: <defaults>
</compile_context>

<pallas_src>
import functools

import jax
import jax.numpy as jnp
import numpy as np
from jax.experimental import pallas as pl
from jax.experimental.pallas import tpu as pltpu

_REFS_PER_LEVEL = 11  # x, w1f, b1f, wh, bh, ww, bw, Ph, Pw, Bh, Bw


def _abr_kernel(*refs, num_levels):
    """Fused CoordAtt over all pyramid levels for one batch element."""
    in_refs = refs[: _REFS_PER_LEVEL * num_levels]
    out_refs = refs[_REFS_PER_LEVEL * num_levels:]

    for l in range(num_levels):
        (x_ref, w1_ref, b1_ref, wh_ref, bh_ref, ww_ref, bw_ref,
         ph_ref, pw_ref, bh_mat_ref, bw_mat_ref) = in_refs[
            _REFS_PER_LEVEL * l: _REFS_PER_LEVEL * (l + 1)]
        o_ref = out_refs[l]

        x = x_ref[...].astype(jnp.float32)                       # (C, H*W), lane-dense

        # Adaptive average pools as MXU matmuls (no relayout of x):
        #   Ph[h*W+w, h] = 1/W  -> mean over W ; Pw[h*W+w, w] = 1/H -> mean over H.
        x_h = jnp.dot(x, ph_ref[...], preferred_element_type=jnp.float32)   # (C, H)
        x_w = jnp.dot(x, pw_ref[...], preferred_element_type=jnp.float32)   # (C, W)

        # conv1 (1x1) with BatchNorm folded in (eval mode).  Applying it separately to
        # the two pooled halves is exact because BN is a per-channel affine.
        y_h = jnp.dot(w1_ref[...], x_h, preferred_element_type=jnp.float32) + b1_ref[...]
        y_w = jnp.dot(w1_ref[...], x_w, preferred_element_type=jnp.float32) + b1_ref[...]

        # h_swish: x * relu6(x + 3) / 6
        y_h = y_h * jnp.clip(y_h + 3.0, 0.0, 6.0) * (1.0 / 6.0)
        y_w = y_w * jnp.clip(y_w + 3.0, 0.0, 6.0) * (1.0 / 6.0)

        a_h = jax.nn.sigmoid(
            jnp.dot(wh_ref[...], y_h, preferred_element_type=jnp.float32) + bh_ref[...])  # (C, H)
        a_w = jax.nn.sigmoid(
            jnp.dot(ww_ref[...], y_w, preferred_element_type=jnp.float32) + bw_ref[...])  # (C, W)

        # Broadcast the gates back to lane-dense (C, H*W) with constant 0/1 matrices:
        #   Bh[h, h*W+w] = 1 ; Bw[w, h*W+w] = 1.
        g_h = jnp.dot(a_h, bh_mat_ref[...], preferred_element_type=jnp.float32)  # (C, H*W)
        g_w = jnp.dot(a_w, bw_mat_ref[...], preferred_element_type=jnp.float32)  # (C, H*W)

        o_ref[...] = (x * g_h * g_w).astype(o_ref.dtype)


def _pool_broadcast_mats(H, W):
    """Constant pooling / broadcast matrices for a given spatial size."""
    bh = np.kron(np.eye(H, dtype=np.float32), np.ones((1, W), np.float32))   # (H, H*W)
    bw = np.kron(np.ones((1, H), np.float32), np.eye(W, dtype=np.float32))   # (W, H*W)
    ph = jnp.asarray(bh.T / np.float32(W))                                   # (H*W, H)
    pw = jnp.asarray(bw.T / np.float32(H))                                   # (H*W, W)
    return ph, pw, jnp.asarray(bh), jnp.asarray(bw)


def abr_pallas(features_list, folded_params_list):
    """ABR.forward: one fused pallas_call over all pyramid levels.

    features_list[i]: (N, C_i, H_i, W_i) float32
    folded_params_list[i]: (w1f, b1f, wh, bh, ww, bw) with BatchNorm folded into conv1.
    """
    N = features_list[0].shape[0]
    inputs, in_specs, out_shapes, out_specs = [], [], [], []
    flops = trans = bytes_accessed = 0

    for x, p in zip(features_list, folded_params_list):
        n, C, H, W = x.shape
        assert n == N
        HW = H * W
        w1f, b1f, wh, bh, ww, bw = p
        mip = w1f.shape[0]
        ph, pw, bh_mat, bw_mat = _pool_broadcast_mats(H, W)

        x_flat = x.reshape(N, C, HW)                       # free: NCHW is contiguous
        level_inputs = [x_flat, w1f, b1f, wh, bh, ww, bw, ph, pw, bh_mat, bw_mat]
        inputs += level_inputs

        # x: one batch element per grid step, leading dim squeezed out of the kernel ref.
        in_specs.append(pl.BlockSpec((pl.Squeezed(), C, HW), lambda i: (i, 0, 0)))
        # weights / constant matrices: full-array resident blocks.
        for arr in level_inputs[1:]:
            in_specs.append(pl.BlockSpec(arr.shape, lambda i, _nd=arr.ndim: (0,) * _nd))

        out_shapes.append(jax.ShapeDtypeStruct((N, C, HW), x.dtype))
        out_specs.append(pl.BlockSpec((pl.Squeezed(), C, HW), lambda i: (i, 0, 0)))

        flops += N * 2 * (C * HW * (H + W)            # pooling matmuls
                          + mip * C * (H + W)         # conv1
                          + C * mip * (H + W)         # conv_h / conv_w
                          + C * HW * (H + W))         # gate broadcast matmuls
        trans += N * C * (H + W)                      # sigmoids
        bytes_accessed += 2 * N * C * HW * 4 + sum(int(a.size) * 4 for a in level_inputs[1:])

    num_levels = len(features_list)
    kernel = functools.partial(_abr_kernel, num_levels=num_levels)

    outs = pl.pallas_call(
        kernel,
        out_shape=tuple(out_shapes),
        grid_spec=pltpu.PrefetchScalarGridSpec(
            num_scalar_prefetch=0,
            grid=(N,),
            in_specs=in_specs,
            out_specs=out_specs,
        ),
        compiler_params=pltpu.CompilerParams(dimension_semantics=("parallel",)),
        cost_estimate=pl.CostEstimate(
            flops=int(flops),
            transcendentals=int(trans),
            bytes_accessed=int(bytes_accessed)),
    )(*inputs)

    return [o.reshape(x.shape) for o, x in zip(outs, features_list)]


# ----------------------------------------------------------------------------------
# Parameter construction (synthetic, deterministic) + BN folding + pure-JAX reference
# ----------------------------------------------------------------------------------

def init_coord_att_params(key, inp, reduction=32):
    """Raw CoordAtt parameters (conv1, BN stats, conv_h, conv_w). oup == inp (as in ABR)."""
    mip = max(8, inp // reduction)
    k1, k2, k3, k4, k5, k6 = jax.random.split(key, 6)
    w1 = jax.random.normal(k1, (mip, inp), jnp.float32) * 0.1
    b1 = jax.random.normal(k2, (mip, 1), jnp.float32) * 0.1
    # TODO(synk): BatchNorm uses fresh eval-mode running stats here; fold real trained
    # stats when porting a trained PyTorch checkpoint.
    gamma = jnp.ones((mip, 1), jnp.float32)
    beta = jnp.zeros((mip, 1), jnp.float32)
    r_mean = jnp.zeros((mip, 1), jnp.float32)
    r_var = jnp.ones((mip, 1), jnp.float32)
    wh = jax.random.normal(k3, (inp, mip), jnp.float32) * 0.1
    bh = jax.random.normal(k4, (inp, 1), jnp.float32) * 0.1
    ww = jax.random.normal(k5, (inp, mip), jnp.float32) * 0.1
    bw = jax.random.normal(k6, (inp, 1), jnp.float32) * 0.1
    return (w1, b1, gamma, beta, r_mean, r_var, wh, bh, ww, bw)


def fold_bn_into_conv1(raw, eps=1e-5):
    """w1' = scale*w1, b1' = scale*b1 + shift (eval-mode BatchNorm)."""
    w1, b1, gamma, beta, r_mean, r_var, wh, bh, ww, bw = raw
    scale = gamma / jnp.sqrt(r_var + eps)
    shift = beta - r_mean * scale
    return (w1 * scale, b1 * scale + shift, wh, bh, ww, bw)


def coord_att_ref(x, raw, eps=1e-5):
    """Pure-JAX reference following the PyTorch forward (eval-mode BN), for validation."""
    w1, b1, gamma, beta, r_mean, r_var, wh, bh, ww, bw = raw
    N, C, H, W = x.shape
    x_h = jnp.mean(x, axis=3)                        # (N, C, H)  pool over W
    x_w = jnp.mean(x, axis=2)                        # (N, C, W)  pool over H
    y = jnp.concatenate([x_h, x_w], axis=2)          # (N, C, H+W)
    y = jnp.einsum('oc,nct->not', w1, y) + b1[None]
    y = (y - r_mean[None]) / jnp.sqrt(r_var[None] + eps) * gamma[None] + beta[None]
    y = y * jnp.clip(y + 3.0, 0.0, 6.0) / 6.0        # h_swish
    y_h, y_w = y[:, :, :H], y[:, :, H:]
    a_h = jax.nn.sigmoid(jnp.einsum('om,nmt->not', wh, y_h) + bh[None])  # (N, C, H)
    a_w = jax.nn.sigmoid(jnp.einsum('om,nmt->not', ww, y_w) + bw[None])  # (N, C, W)
    return x * a_h[:, :, :, None] * a_w[:, :, None, :]


if __name__ == "__main__":
    key = jax.random.PRNGKey(0)

    # Small UNet-style feature pyramid (NCHW), consistent with inner_channels_list.
    inner_channels_list = [8, 16, 32, 64, 128]
    spatial_list = [(16, 16), (16, 16), (8, 8), (8, 8), (8, 8)]
    batch = 2

    feat_keys = jax.random.split(key, 5)
    param_keys = jax.random.split(jax.random.fold_in(key, 1), 5)

    features = [
        jax.random.normal(fk, (batch, c, h, w), jnp.float32)
        for fk, c, (h, w) in zip(feat_keys, inner_channels_list, spatial_list)
    ]
    raw_params = [init_coord_att_params(pk, c)
                  for pk, c in zip(param_keys, inner_channels_list)]
    folded_params = [fold_bn_into_conv1(rp) for rp in raw_params]

    outs = abr_pallas(features, folded_params)
    outs = [jax.block_until_ready(o) for o in outs]

    # Validate against a pure-JAX reference of CoordAtt (explicit BN, mean pooling).
    for x, rp, o in zip(features, raw_params, outs):
        ref = coord_att_ref(x, rp)
        np.testing.assert_allclose(np.asarray(o), np.asarray(ref), rtol=1e-4, atol=1e-4)

    print("KERNEL_OK")
</pallas_src>

<mosaic_0001>
module attributes {stable_mosaic.version = 11 : i64} {
  func.func @_abr_kernel(%arg0: i32, %arg1: memref<1x8x256xf32, #tpu.memory_space<vmem>>, %arg2: memref<8x8xf32, #tpu.memory_space<vmem>>, %arg3: memref<8x1xf32, #tpu.memory_space<vmem>>, %arg4: memref<8x8xf32, #tpu.memory_space<vmem>>, %arg5: memref<8x1xf32, #tpu.memory_space<vmem>>, %arg6: memref<8x8xf32, #tpu.memory_space<vmem>>, %arg7: memref<8x1xf32, #tpu.memory_space<vmem>>, %arg8: memref<256x16xf32, #tpu.memory_space<vmem>>, %arg9: memref<256x16xf32, #tpu.memory_space<vmem>>, %arg10: memref<16x256xf32, #tpu.memory_space<vmem>>, %arg11: memref<16x256xf32, #tpu.memory_space<vmem>>, %arg12: memref<1x16x256xf32, #tpu.memory_space<vmem>>, %arg13: memref<8x16xf32, #tpu.memory_space<vmem>>, %arg14: memref<8x1xf32, #tpu.memory_space<vmem>>, %arg15: memref<16x8xf32, #tpu.memory_space<vmem>>, %arg16: memref<16x1xf32, #tpu.memory_space<vmem>>, %arg17: memref<16x8xf32, #tpu.memory_space<vmem>>, %arg18: memref<16x1xf32, #tpu.memory_space<vmem>>, %arg19: memref<256x16xf32, #tpu.memory_space<vmem>>, %arg20: memref<256x16xf32, #tpu.memory_space<vmem>>, %arg21: memref<16x256xf32, #tpu.memory_space<vmem>>, %arg22: memref<16x256xf32, #tpu.memory_space<vmem>>, %arg23: memref<1x32x64xf32, #tpu.memory_space<vmem>>, %arg24: memref<8x32xf32, #tpu.memory_space<vmem>>, %arg25: memref<8x1xf32, #tpu.memory_space<vmem>>, %arg26: memref<32x8xf32, #tpu.memory_space<vmem>>, %arg27: memref<32x1xf32, #tpu.memory_space<vmem>>, %arg28: memref<32x8xf32, #tpu.memory_space<vmem>>, %arg29: memref<32x1xf32, #tpu.memory_space<vmem>>, %arg30: memref<64x8xf32, #tpu.memory_space<vmem>>, %arg31: memref<64x8xf32, #tpu.memory_space<vmem>>, %arg32: memref<8x64xf32, #tpu.memory_space<vmem>>, %arg33: memref<8x64xf32, #tpu.memory_space<vmem>>, %arg34: memref<1x64x64xf32, #tpu.memory_space<vmem>>, %arg35: memref<8x64xf32, #tpu.memory_space<vmem>>, %arg36: memref<8x1xf32, #tpu.memory_space<vmem>>, %arg37: memref<64x8xf32, #tpu.memory_space<vmem>>, %arg38: memref<64x1xf32, #tpu.memory_space<vmem>>, %arg39: memref<64x8xf32, #tpu.memory_space<vmem>>, %arg40: memref<64x1xf32, #tpu.memory_space<vmem>>, %arg41: memref<64x8xf32, #tpu.memory_space<vmem>>, %arg42: memref<64x8xf32, #tpu.memory_space<vmem>>, %arg43: memref<8x64xf32, #tpu.memory_space<vmem>>, %arg44: memref<8x64xf32, #tpu.memory_space<vmem>>, %arg45: memref<1x128x64xf32, #tpu.memory_space<vmem>>, %arg46: memref<8x128xf32, #tpu.memory_space<vmem>>, %arg47: memref<8x1xf32, #tpu.memory_space<vmem>>, %arg48: memref<128x8xf32, #tpu.memory_space<vmem>>, %arg49: memref<128x1xf32, #tpu.memory_space<vmem>>, %arg50: memref<128x8xf32, #tpu.memory_space<vmem>>, %arg51: memref<128x1xf32, #tpu.memory_space<vmem>>, %arg52: memref<64x8xf32, #tpu.memory_space<vmem>>, %arg53: memref<64x8xf32, #tpu.memory_space<vmem>>, %arg54: memref<8x64xf32, #tpu.memory_space<vmem>>, %arg55: memref<8x64xf32, #tpu.memory_space<vmem>>, %arg56: memref<1x8x256xf32, #tpu.memory_space<vmem>>, %arg57: memref<1x16x256xf32, #tpu.memory_space<vmem>>, %arg58: memref<1x32x64xf32, #tpu.memory_space<vmem>>, %arg59: memref<1x64x64xf32, #tpu.memory_space<vmem>>, %arg60: memref<1x128x64xf32, #tpu.memory_space<vmem>>) attributes {dimension_semantics = [#tpu.dimension_semantics<parallel>], iteration_bounds = array<i64: 2>, scalar_prefetch = 0 : i64, scratch_operands = 0 : i64, tpu.core_type = #tpu.core_type<tc>, window_params = [{transform_indices = @transform_0, window_bounds = array<i64: 1, 8, 256>}, {pipeline_mode = #tpu.pipeline_mode<synchronous>, transform_indices = @transform_1, window_bounds = array<i64: 8, 8>}, {pipeline_mode = #tpu.pipeline_mode<synchronous>, transform_indices = @transform_2, window_bounds = array<i64: 8, 1>}, {pipeline_mode = #tpu.pipeline_mode<synchronous>, transform_indices = @transform_3, window_bounds = array<i64: 8, 8>}, {pipeline_mode = #tpu.pipeline_mode<synchronous>, transform_indices = @transform_4, window_bounds = array<i64: 8, 1>}, {pipeline_mode = #tpu.pipeline_mode<synchronous>, transform_indices = @transform_5, window_bounds = array<i64: 8, 8>}, {pipeline_mode = #tpu.pipeline_mode<synchronous>, transform_indices = @transform_6, window_bounds = array<i64: 8, 1>}, {pipeline_mode = #tpu.pipeline_mode<synchronous>, transform_indices = @transform_7, window_bounds = array<i64: 256, 16>}, {pipeline_mode = #tpu.pipeline_mode<synchronous>, transform_indices = @transform_8, window_bounds = array<i64: 256, 16>}, {pipeline_mode = #tpu.pipeline_mode<synchronous>, transform_indices = @transform_9, window_bounds = array<i64: 16, 256>}, {pipeline_mode = #tpu.pipeline_mode<synchronous>, transform_indices = @transform_10, window_bounds = array<i64: 16, 256>}, {transform_indices = @transform_11, window_bounds = array<i64: 1, 16, 256>}, {pipeline_mode = #tpu.pipeline_mode<synchronous>, transform_indices = @transform_12, window_bounds = array<i64: 8, 16>}, {pipeline_mode = #tpu.pipeline_mode<synchronous>, transform_indices = @transform_13, window_bounds = array<i64: 8, 1>}, {pipeline_mode = #tpu.pipeline_mode<synchronous>, transform_indices = @transform_14, window_bounds = array<i64: 16, 8>}, {pipeline_mode = #tpu.pipeline_mode<synchronous>, transform_indices = @transform_15, window_bounds = array<i64: 16, 1>}, {pipeline_mode = #tpu.pipeline_mode<synchronous>, transform_indices = @transform_16, window_bounds = array<i64: 16, 8>}, {pipeline_mode = #tpu.pipeline_mode<synchronous>, transform_indices = @transform_17, window_bounds = array<i64: 16, 1>}, {pipeline_mode = #tpu.pipeline_mode<synchronous>, transform_indices = @transform_18, window_bounds = array<i64: 256, 16>}, {pipeline_mode = #tpu.pipeline_mode<synchronous>, transform_indices = @transform_19, window_bounds = array<i64: 256, 16>}, {pipeline_mode = #tpu.pipeline_mode<synchronous>, transform_indices = @transform_20, window_bounds = array<i64: 16, 256>}, {pipeline_mode = #tpu.pipeline_mode<synchronous>, transform_indices = @transform_21, window_bounds = array<i64: 16, 256>}, {transform_indices = @transform_22, window_bounds = array<i64: 1, 32, 64>}, {pipeline_mode = #tpu.pipeline_mode<synchronous>, transform_indices = @transform_23, window_bounds = array<i64: 8, 32>}, {pipeline_mode = #tpu.pipeline_mode<synchronous>, transform_indices = @transform_24, window_bounds = array<i64: 8, 1>}, {pipeline_mode = #tpu.pipeline_mode<synchronous>, transform_indices = @transform_25, window_bounds = array<i64: 32, 8>}, {pipeline_mode = #tpu.pipeline_mode<synchronous>, transform_indices = @transform_26, window_bounds = array<i64: 32, 1>}, {pipeline_mode = #tpu.pipeline_mode<synchronous>, transform_indices = @transform_27, window_bounds = array<i64: 32, 8>}, {pipeline_mode = #tpu.pipeline_mode<synchronous>, transform_indices = @transform_28, window_bounds = array<i64: 32, 1>}, {pipeline_mode = #tpu.pipeline_mode<synchronous>, transform_indices = @transform_29, window_bounds = array<i64: 64, 8>}, {pipeline_mode = #tpu.pipeline_mode<synchronous>, transform_indices = @transform_30, window_bounds = array<i64: 64, 8>}, {pipeline_mode = #tpu.pipeline_mode<synchronous>, transform_indices = @transform_31, window_bounds = array<i64: 8, 64>}, {pipeline_mode = #tpu.pipeline_mode<synchronous>, transform_indices = @transform_32, window_bounds = array<i64: 8, 64>}, {transform_indices = @transform_33, window_bounds = array<i64: 1, 64, 64>}, {pipeline_mode = #tpu.pipeline_mode<synchronous>, transform_indices = @transform_34, window_bounds = array<i64: 8, 64>}, {pipeline_mode = #tpu.pipeline_mode<synchronous>, transform_indices = @transform_35, window_bounds = array<i64: 8, 1>}, {pipeline_mode = #tpu.pipeline_mode<synchronous>, transform_indices = @transform_36, window_bounds = array<i64: 64, 8>}, {pipeline_mode = #tpu.pipeline_mode<synchronous>, transform_indices = @transform_37, window_bounds = array<i64: 64, 1>}, {pipeline_mode = #tpu.pipeline_mode<synchronous>, transform_indices = @transform_38, window_bounds = array<i64: 64, 8>}, {pipeline_mode = #tpu.pipeline_mode<synchronous>, transform_indices = @transform_39, window_bounds = array<i64: 64, 1>}, {pipeline_mode = #tpu.pipeline_mode<synchronous>, transform_indices = @transform_40, window_bounds = array<i64: 64, 8>}, {pipeline_mode = #tpu.pipeline_mode<synchronous>, transform_indices = @transform_41, window_bounds = array<i64: 64, 8>}, {pipeline_mode = #tpu.pipeline_mode<synchronous>, transform_indices = @transform_42, window_bounds = array<i64: 8, 64>}, {pipeline_mode = #tpu.pipeline_mode<synchronous>, transform_indices = @transform_43, window_bounds = array<i64: 8, 64>}, {transform_indices = @transform_44, window_bounds = array<i64: 1, 128, 64>}, {pipeline_mode = #tpu.pipeline_mode<synchronous>, transform_indices = @transform_45, window_bounds = array<i64: 8, 128>}, {pipeline_mode = #tpu.pipeline_mode<synchronous>, transform_indices = @transform_46, window_bounds = array<i64: 8, 1>}, {pipeline_mode = #tpu.pipeline_mode<synchronous>, transform_indices = @transform_47, window_bounds = array<i64: 128, 8>}, {pipeline_mode = #tpu.pipeline_mode<synchronous>, transform_indices = @transform_48, window_bounds = array<i64: 128, 1>}, {pipeline_mode = #tpu.pipeline_mode<synchronous>, transform_indices = @transform_49, window_bounds = array<i64: 128, 8>}, {pipeline_mode = #tpu.pipeline_mode<synchronous>, transform_indices = @transform_50, window_bounds = array<i64: 128, 1>}, {pipeline_mode = #tpu.pipeline_mode<synchronous>, transform_indices = @transform_51, window_bounds = array<i64: 64, 8>}, {pipeline_mode = #tpu.pipeline_mode<synchronous>, transform_indices = @transform_52, window_bounds = array<i64: 64, 8>}, {pipeline_mode = #tpu.pipeline_mode<synchronous>, transform_indices = @transform_53, window_bounds = array<i64: 8, 64>}, {pipeline_mode = #tpu.pipeline_mode<synchronous>, transform_indices = @transform_54, window_bounds = array<i64: 8, 64>}, {transform_indices = @transform_55, window_bounds = array<i64: 1, 8, 256>}, {transform_indices = @transform_56, window_bounds = array<i64: 1, 16, 256>}, {transform_indices = @transform_57, window_bounds = array<i64: 1, 32, 64>}, {transform_indices = @transform_58, window_bounds = array<i64: 1, 64, 64>}, {transform_indices = @transform_59, window_bounds = array<i64: 1, 128, 64>}]} {
    %c0 = arith.constant 0 : index
    %c0_0 = arith.constant 0 : index
    %c0_1 = arith.constant 0 : index
    %0 = vector.load %arg1[%c0, %c0_0, %c0_1] : memref<1x8x256xf32, #tpu.memory_space<vmem>>, vector<1x8x256xf32>
    %1 = vector.shape_cast %0 : vector<1x8x256xf32> to vector<8x256xf32>
    %c0_2 = arith.constant 0 : index
    %c0_3 = arith.constant 0 : index
    %2 = vector.load %arg8[%c0_2, %c0_3] : memref<256x16xf32, #tpu.memory_space<vmem>>, vector<256x16xf32>
    %cst = arith.constant dense<0.000000e+00> : vector<8x16xf32>
    %3 = tpu.matmul %1, %2, %cst {dimension_numbers = #tpu.dot_dimension_numbers<[1], [0], [0], [1], [0, 0, 1, 1], [], []>} : vector<8x256xf32>, vector<256x16xf32>, vector<8x16xf32> -> vector<8x16xf32>
    %c0_4 = arith.constant 0 : index
    %c0_5 = arith.constant 0 : index
    %4 = vector.load %arg9[%c0_4, %c0_5] : memref<256x16xf32, #tpu.memory_space<vmem>>, vector<256x16xf32>
    %cst_6 = arith.constant dense<0.000000e+00> : vector<8x16xf32>
    %5 = tpu.matmul %1, %4, %cst_6 {dimension_numbers = #tpu.dot_dimension_numbers<[1], [0], [0], [1], [0, 0, 1, 1], [], []>} : vector<8x256xf32>, vector<256x16xf32>, vector<8x16xf32> -> vector<8x16xf32>
    %c0_7 = arith.constant 0 : index
    %c0_8 = arith.constant 0 : index
    %6 = vector.load %arg2[%c0_7, %c0_8] : memref<8x8xf32, #tpu.memory_space<vmem>>, vector<8x8xf32>
    %cst_9 = arith.constant dense<0.000000e+00> : vector<8x16xf32>
    %7 = tpu.matmul %6, %3, %cst_9 {dimension_numbers = #tpu.dot_dimension_numbers<[1], [0], [0], [1], [0, 0, 1, 1], [], []>} : vector<8x8xf32>, vector<8x16xf32>, vector<8x16xf32> -> vector<8x16xf32>
    %c0_10 = arith.constant 0 : index
    %c0_11 = arith.constant 0 : index
    %8 = vector.load %arg3[%c0_10, %c0_11] : memref<8x1xf32, #tpu.memory_space<vmem>>, vector<8x1xf32>
    %9 = vector.broadcast %8 : vector<8x1xf32> to vector<8x16xf32>
    %10 = arith.addf %7, %9 : vector<8x16xf32>
    %c0_12 = arith.constant 0 : index
    %c0_13 = arith.constant 0 : index
    %11 = vector.load %arg2[%c0_12, %c0_13] : memref<8x8xf32, #tpu.memory_space<vmem>>, vector<8x8xf32>
    %cst_14 = arith.constant dense<0.000000e+00> : vector<8x16xf32>
    %12 = tpu.matmul %11, %5, %cst_14 {dimension_numbers = #tpu.dot_dimension_numbers<[1], [0], [0], [1], [0, 0, 1, 1], [], []>} : vector<8x8xf32>, vector<8x16xf32>, vector<8x16xf32> -> vector<8x16xf32>
    %c0_15 = arith.constant 0 : index
    %c0_16 = arith.constant 0 : index
    %13 = vector.load %arg3[%c0_15, %c0_16] : memref<8x1xf32, #tpu.memory_space<vmem>>, vector<8x1xf32>
    %14 = vector.broadcast %13 : vector<8x1xf32> to vector<8x16xf32>
    %15 = arith.addf %12, %14 : vector<8x16xf32>
    %cst_17 = arith.constant 3.000000e+00 : f32
    %16 = vector.broadcast %cst_17 : f32 to vector<8x16xf32>
    %17 = arith.addf %10, %16 : vector<8x16xf32>
    %cst_18 = arith.constant 0.000000e+00 : f32
    %cst_19 = arith.constant 6.000000e+00 : f32
    %18 = vector.broadcast %cst_18 : f32 to vector<8x16xf32>
    %19 = arith.maximumf %18, %17 : vector<8x16xf32>
    %20 = vector.broadcast %cst_19 : f32 to vector<8x16xf32>
    %21 = arith.minimumf %20, %19 : vector<8x16xf32>
    %22 = arith.mulf %10, %21 : vector<8x16xf32>
    %cst_20 = arith.constant 0.166666672 : f32
    %23 = vector.broadcast %cst_20 : f32 to vector<8x16xf32>
    %24 = arith.mulf %22, %23 : vector<8x16xf32>
    %cst_21 = arith.constant 3.000000e+00 : f32
    %25 = vector.broadcast %cst_21 : f32 to vector<8x16xf32>
    %26 = arith.addf %15, %25 : vector<8x16xf32>
    %cst_22 = arith.constant 0.000000e+00 : f32
    %cst_23 = arith.constant 6.000000e+00 : f32
    %27 = vector.broadcast %cst_22 : f32 to vector<8x16xf32>
    %28 = arith.maximumf %27, %26 : vector<8x16xf32>
    %29 = vector.broadcast %cst_23 : f32 to vector<8x16xf32>
    %30 = arith.minimumf %29, %28 : vector<8x16xf32>
    %31 = arith.mulf %15, %30 : vector<8x16xf32>
    %cst_24 = arith.constant 0.166666672 : f32
    %32 = vector.broadcast %cst_24 : f32 to vector<8x16xf32>
    %33 = arith.mulf %31, %32 : vector<8x16xf32>
    %c0_25 = arith.constant 0 : index
    %c0_26 = arith.constant 0 : index
    %34 = vector.load %arg4[%c0_25, %c0_26] : memref<8x8xf32, #tpu.memory_space<vmem>>, vector<8x8xf32>
    %cst_27 = arith.constant dense<0.000000e+00> : vector<8x16xf32>
    %35 = tpu.matmul %34, %24, %cst_27 {dimension_numbers = #tpu.dot_dimension_numbers<[1], [0], [0], [1], [0, 0, 1, 1], [], []>} : vector<8x8xf32>, vector<8x16xf32>, vector<8x16xf32> -> vector<8x16xf32>
    %c0_28 = arith.constant 0 : index
    %c0_29 = arith.constant 0 : index
    %36 = vector.load %arg5[%c0_28, %c0_29] : memref<8x1xf32, #tpu.memory_space<vmem>>, vector<8x1xf32>
    %37 = vector.broadcast %36 : vector<8x1xf32> to vector<8x16xf32>
    %38 = arith.addf %35, %37 : vector<8x16xf32>
    %39 = arith.negf %38 : vector<8x16xf32>
    %40 = math.exp %39 : vector<8x16xf32>
    %cst_30 = arith.constant 1.000000e+00 : f32
    %41 = vector.broadcast %cst_30 : f32 to vector<8x16xf32>
    %42 = arith.addf %41, %40 : vector<8x16xf32>
    %43 = arith.divf %41, %42 : vector<8x16xf32>
    %c0_31 = arith.constant 0 : index
    %c0_32 = arith.constant 0 : index
    %44 = vector.load %arg6[%c0_31, %c0_32] : memref<8x8xf32, #tpu.memory_space<vmem>>, vector<8x8xf32>
    %cst_33 = arith.constant dense<0.000000e+00> : vector<8x16xf32>
    %45 = tpu.matmul %44, %33, %cst_33 {dimension_numbers = #tpu.dot_dimension_numbers<[1], [0], [0], [1], [0, 0, 1, 1], [], []>} : vector<8x8xf32>, vector<8x16xf32>, vector<8x16xf32> -> vector<8x16xf32>
    %c0_34 = arith.constant 0 : index
    %c0_35 = arith.constant 0 : index
    %46 = vector.load %arg7[%c0_34, %c0_35] : memref<8x1xf32, #tpu.memory_space<vmem>>, vector<8x1xf32>
    %47 = vector.broadcast %46 : vector<8x1xf32> to vector<8x16xf32>
    %48 = arith.addf %45, %47 : vector<8x16xf32>
    %49 = arith.negf %48 : vector<8x16xf32>
    %50 = math.exp %49 : vector<8x16xf32>
    %cst_36 = arith.constant 1.000000e+00 : f32
    %51 = vector.broadcast %cst_36 : f32 to vector<8x16xf32>
    %52 = arith.addf %51, %50 : vector<8x16xf32>
    %53 = arith.divf %51, %52 : vector<8x16xf32>
    %c0_37 = arith.constant 0 : index
    %c0_38 = arith.constant 0 : index
    %54 = vector.load %arg10[%c0_37, %c0_38] : memref<16x256xf32, #tpu.memory_space<vmem>>, vector<16x256xf32>
    %cst_39 = arith.constant dense<0.000000e+00> : vector<8x256xf32>
    %55 = tpu.matmul %43, %54, %cst_39 {dimension_numbers = #tpu.dot_dimension_numbers<[1], [0], [0], [1], [0, 0, 1, 1], [], []>} : vector<8x16xf32>, vector<16x256xf32>, vector<8x256xf32> -> vector<8x256xf32>
    %c0_40 = arith.constant 0 : index
    %c0_41 = arith.constant 0 : index
    %56 = vector.load %arg11[%c0_40, %c0_41] : memref<16x256xf32, #tpu.memory_space<vmem>>, vector<16x256xf32>
    %cst_42 = arith.constant dense<0.000000e+00> : vector<8x256xf32>
    %57 = tpu.matmul %53, %56, %cst_42 {dimension_numbers = #tpu.dot_dimension_numbers<[1], [0], [0], [1], [0, 0, 1, 1], [], []>} : vector<8x16xf32>, vector<16x256xf32>, vector<8x256xf32> -> vector<8x256xf32>
    %58 = arith.mulf %1, %55 : vector<8x256xf32>
    %59 = arith.mulf %58, %57 : vector<8x256xf32>
    %c0_43 = arith.constant 0 : index
    %c0_44 = arith.constant 0 : index
    %c0_45 = arith.constant 0 : index
    %60 = vector.load %arg56[%c0_43, %c0_44, %c0_45] : memref<1x8x256xf32, #tpu.memory_space<vmem>>, vector<1x8x256xf32>
    %61 = vector.shape_cast %60 : vector<1x8x256xf32> to vector<8x256xf32>
    %62 = vector.shape_cast %59 : vector<8x256xf32> to vector<1x8x256xf32>
    tpu.vector_store %arg56[%c0_43, %c0_44, %c0_45], %62 {strides = array<i32>} : memref<1x8x256xf32, #tpu.memory_space<vmem>>, vector<1x8x256xf32>,
    %c0_46 = arith.constant 0 : index
    %c0_47 = arith.constant 0 : index
    %c0_48 = arith.constant 0 : index
    %63 = vector.load %arg12[%c0_46, %c0_47, %c0_48] : memref<1x16x256xf32, #tpu.memory_space<vmem>>, vector<1x16x256xf32>
    %64 = vector.shape_cast %63 : vector<1x16x256xf32> to vector<16x256xf32>
    %c0_49 = arith.constant 0 : index
    %c0_50 = arith.constant 0 : index
    %65 = vector.load %arg19[%c0_49, %c0_50] : memref<256x16xf32, #tpu.memory_space<vmem>>, vector<256x16xf32>
    %cst_51 = arith.constant dense<0.000000e+00> : vector<16x16xf32>
    %66 = tpu.matmul %64, %65, %cst_51 {dimension_numbers = #tpu.dot_dimension_numbers<[1], [0], [0], [1], [0, 0, 1, 1], [], []>} : vector<16x256xf32>, vector<256x16xf32>, vector<16x16xf32> -> vector<16x16xf32>
    %c0_52 = arith.constant 0 : index
    %c0_53 = arith.constant 0 : index
    %67 = vector.load %arg20[%c0_52, %c0_53] : memref<256x16xf32, #tpu.memory_space<vmem>>, vector<256x16xf32>
    %cst_54 = arith.constant dense<0.000000e+00> : vector<16x16xf32>
    %68 = tpu.matmul %64, %67, %cst_54 {dimension_numbers = #tpu.dot_dimension_numbers<[1], [0], [0], [1], [0, 0, 1, 1], [], []>} : vector<16x256xf32>, vector<256x16xf32>, vector<16x16xf32> -> vector<16x16xf32>
    %c0_55 = arith.constant 0 : index
    %c0_56 = arith.constant 0 : index
    %69 = vector.load %arg13[%c0_55, %c0_56] : memref<8x16xf32, #tpu.memory_space<vmem>>, vector<8x16xf32>
    %cst_57 = arith.constant dense<0.000000e+00> : vector<8x16xf32>
    %70 = tpu.matmul %69, %66, %cst_57 {dimension_numbers = #tpu.dot_dimension_numbers<[1], [0], [0], [1], [0, 0, 1, 1], [], []>} : vector<8x16xf32>, vector<16x16xf32>, vector<8x16xf32> -> vector<8x16xf32>
    %c0_58 = arith.constant 0 : index
    %c0_59 = arith.constant 0 : index
    %71 = vector.load %arg14[%c0_58, %c0_59] : memref<8x1xf32, #tpu.memory_space<vmem>>, vector<8x1xf32>
    %72 = vector.broadcast %71 : vector<8x1xf32> to vector<8x16xf32>
    %73 = arith.addf %70, %72 : vector<8x16xf32>
    %c0_60 = arith.constant 0 : index
    %c0_61 = arith.constant 0 : index
    %74 = vector.load %arg13[%c0_60, %c0_61] : memref<8x16xf32, #tpu.memory_space<vmem>>, vector<8x16xf32>
    %cst_62 = arith.constant dense<0.000000e+00> : vector<8x16xf32>
    %75 = tpu.matmul %74, %68, %cst_62 {dimension_numbers = #tpu.dot_dimension_numbers<[1], [0], [0], [1], [0, 0, 1, 1], [], []>} : vector<8x16xf32>, vector<16x16xf32>, vector<8x16xf32> -> vector<8x16xf32>
    %c0_63 = arith.constant 0 : index
    %c0_64 = arith.constant 0 : index
    %76 = vector.load %arg14[%c0_63, %c0_64] : memref<8x1xf32, #tpu.memory_space<vmem>>, vector<8x1xf32>
    %77 = vector.broadcast %76 : vector<8x1xf32> to vector<8x16xf32>
    %78 = arith.addf %75, %77 : vector<8x16xf32>
    %cst_65 = arith.constant 3.000000e+00 : f32
    %79 = vector.broadcast %cst_65 : f32 to vector<8x16xf32>
    %80 = arith.addf %73, %79 : vector<8x16xf32>
    %cst_66 = arith.constant 0.000000e+00 : f32
    %cst_67 = arith.constant 6.000000e+00 : f32
    %81 = vector.broadcast %cst_66 : f32 to vector<8x16xf32>
    %82 = arith.maximumf %81, %80 : vector<8x16xf32>
    %83 = vector.broadcast %cst_67 : f32 to vector<8x16xf32>
    %84 = arith.minimumf %83, %82 : vector<8x16xf32>
    %85 = arith.mulf %73, %84 : vector<8x16xf32>
    %cst_68 = arith.constant 0.166666672 : f32
    %86 = vector.broadcast %cst_68 : f32 to vector<8x16xf32>
    %87 = arith.mulf %85, %86 : vector<8x16xf32>
    %cst_69 = arith.constant 3.000000e+00 : f32
    %88 = vector.broadcast %cst_69 : f32 to vector<8x16xf32>
    %89 = arith.addf %78, %88 : vector<8x16xf32>
    %cst_70 = arith.constant 0.000000e+00 : f32
    %cst_71 = arith.constant 6.000000e+00 : f32
    %90 = vector.broadcast %cst_70 : f32 to vector<8x16xf32>
    %91 = arith.maximumf %90, %89 : vector<8x16xf32>
    %92 = vector.broadcast %cst_71 : f32 to vector<8x16xf32>
    %93 = arith.minimumf %92, %91 : vector<8x16xf32>
    %94 = arith.mulf %78, %93 : vector<8x16xf32>
    %cst_72 = arith.constant 0.166666672 : f32
    %95 = vector.broadcast %cst_72 : f32 to vector<8x16xf32>
    %96 = arith.mulf %94, %95 : vector<8x16xf32>
    %c0_73 = arith.constant 0 : index
    %c0_74 = arith.constant 0 : index
    %97 = vector.load %arg15[%c0_73, %c0_74] : memref<16x8xf32, #tpu.memory_space<vmem>>, vector<16x8xf32>
    %cst_75 = arith.constant dense<0.000000e+00> : vector<16x16xf32>
    %98 = tpu.matmul %97, %87, %cst_75 {dimension_numbers = #tpu.dot_dimension_numbers<[1], [0], [0], [1], [0, 0, 1, 1], [], []>} : vector<16x8xf32>, vector<8x16xf32>, vector<16x16xf32> -> vector<16x16xf32>
    %c0_76 = arith.constant 0 : index
    %c0_77 = arith.constant 0 : index
    %99 = vector.load %arg16[%c0_76, %c0_77] : memref<16x1xf32, #tpu.memory_space<vmem>>, vector<16x1xf32>
    %100 = vector.broadcast %99 : vector<16x1xf32> to vector<16x16xf32>
    %101 = arith.addf %98, %100 : vector<16x16xf32>
    %102 = arith.negf %101 : vector<16x16xf32>
    %103 = math.exp %102 : vector<16x16xf32>
    %cst_78 = arith.constant 1.000000e+00 : f32
    %104 = vector.broadcast %cst_78 : f32 to vector<16x16xf32>
    %105 = arith.addf %104, %103 : vector<16x16xf32>
    %106 = arith.divf %104, %105 : vector<16x16xf32>
    %c0_79 = arith.constant 0 : index
    %c0_80 = arith.constant 0 : index
    %107 = vector.load %arg17[%c0_79, %c0_80] : memref<16x8xf32, #tpu.memory_space<vmem>>, vector<16x8xf32>
    %cst_81 = arith.constant dense<0.000000e+00> : vector<16x16xf32>
    %108 = tpu.matmul %107, %96, %cst_81 {dimension_numbers = #tpu.dot_dimension_numbers<[1], [0], [0], [1], [0, 0, 1, 1], [], []>} : vector<16x8xf32>, vector<8x16xf32>, vector<16x16xf32> -> vector<16x16xf32>
    %c0_82 = arith.constant 0 : index
    %c0_83 = arith.constant 0 : index
    %109 = vector.load %arg18[%c0_82, %c0_83] : memref<16x1xf32, #tpu.memory_space<vmem>>, vector<16x1xf32>
    %110 = vector.broadcast %109 : vector<16x1xf32> to vector<16x16xf32>
    %111 = arith.addf %108, %110 : vector<16x16xf32>
    %112 = arith.negf %111 : vector<16x16xf32>
    %113 = math.exp %112 : vector<16x16xf32>
    %cst_84 = arith.constant 1.000000e+00 : f32
    %114 = vector.broadcast %cst_84 : f32 to vector<16x16xf32>
    %115 = arith.addf %114, %113 : vector<16x16xf32>
    %116 = arith.divf %114, %115 : vector<16x16xf32>
    %c0_85 = arith.constant 0 : index
    %c0_86 = arith.constant 0 : index
    %117 = vector.load %arg21[%c0_85, %c0_86] : memref<16x256xf32, #tpu.memory_space<vmem>>, vector<16x256xf32>
    %cst_87 = arith.constant dense<0.000000e+00> : vector<16x256xf32>
    %118 = tpu.matmul %106, %117, %cst_87 {dimension_numbers = #tpu.dot_dimension_numbers<[1], [0], [0], [1], [0, 0, 1, 1], [], []>} : vector<16x16xf32>, vector<16x256xf32>, vector<16x256xf32> -> vector<16x256xf32>
    %c0_88 = arith.constant 0 : index
    %c0_89 = arith.constant 0 : index
    %119 = vector.load %arg22[%c0_88, %c0_89] : memref<16x256xf32, #tpu.memory_space<vmem>>, vector<16x256xf32>
    %cst_90 = arith.constant dense<0.000000e+00> : vector<16x256xf32>
    %120 = tpu.matmul %116, %119, %cst_90 {dimension_numbers = #tpu.dot_dimension_numbers<[1], [0], [0], [1], [0, 0, 1, 1], [], []>} : vector<16x16xf32>, vector<16x256xf32>, vector<16x256xf32> -> vector<16x256xf32>
    %121 = arith.mulf %64, %118 : vector<16x256xf32>
    %122 = arith.mulf %121, %120 : vector<16x256xf32>
    %c0_91 = arith.constant 0 : index
    %c0_92 = arith.constant 0 : index
    %c0_93 = arith.constant 0 : index
    %123 = vector.load %arg57[%c0_91, %c0_92, %c0_93] : memref<1x16x256xf32, #tpu.memory_space<vmem>>, vector<1x16x256xf32>
    %124 = vector.shape_cast %123 : vector<1x16x256xf32> to vector<16x256xf32>
    %125 = vector.shape_cast %122 : vector<16x256xf32> to vector<1x16x256xf32>
    tpu.vector_store %arg57[%c0_91, %c0_92, %c0_93], %125 {strides = array<i32>} : memref<1x16x256xf32, #tpu.memory_space<vmem>>, vector<1x16x256xf32>,
    %c0_94 = arith.constant 0 : index
    %c0_95 = arith.constant 0 : index
    %c0_96 = arith.constant 0 : index
    %126 = vector.load %arg23[%c0_94, %c0_95, %c0_96] : memref<1x32x64xf32, #tpu.memory_space<vmem>>, vector<1x32x64xf32>
    %127 = vector.shape_cast %126 : vector<1x32x64xf32> to vector<32x64xf32>
    %c0_97 = arith.constant 0 : index
    %c0_98 = arith.constant 0 : index
    %128 = vector.load %arg30[%c0_97, %c0_98] : memref<64x8xf32, #tpu.memory_space<vmem>>, vector<64x8xf32>
    %cst_99 = arith.constant dense<0.000000e+00> : vector<32x8xf32>
    %129 = tpu.matmul %127, %128, %cst_99 {dimension_numbers = #tpu.dot_dimension_numbers<[1], [0], [0], [1], [0, 0, 1, 1], [], []>} : vector<32x64xf32>, vector<64x8xf32>, vector<32x8xf32> -> vector<32x8xf32>
    %c0_100 = arith.constant 0 : index
    %c0_101 = arith.constant 0 : index
    %130 = vector.load %arg31[%c0_100, %c0_101] : memref<64x8xf32, #tpu.memory_space<vmem>>, vector<64x8xf32>
    %cst_102 = arith.constant dense<0.000000e+00> : vector<32x8xf32>
    %131 = tpu.matmul %127, %130, %cst_102 {dimension_numbers = #tpu.dot_dimension_numbers<[1], [0], [0], [1], [0, 0, 1, 1], [], []>} : vector<32x64xf32>, vector<64x8xf32>, vector<32x8xf32> -> vector<32x8xf32>
    %c0_103 = arith.constant 0 : index
    %c0_104 = arith.constant 0 : index
    %132 = vector.load %arg24[%c0_103, %c0_104] : memref<8x32xf32, #tpu.memory_space<vmem>>, vector<8x32xf32>
    %cst_105 = arith.constant dense<0.000000e+00> : vector<8x8xf32>
    %133 = tpu.matmul %132, %129, %cst_105 {dimension_numbers = #tpu.dot_dimension_numbers<[1], [0], [0], [1], [0, 0, 1, 1], [], []>} : vector<8x32xf32>, vector<32x8xf32>, vector<8x8xf32> -> vector<8x8xf32>
    %c0_106 = arith.constant 0 : index
    %c0_107 = arith.constant 0 : index
    %134 = vector.load %arg25[%c0_106, %c0_107] : memref<8x1xf32, #tpu.memory_space<vmem>>, vector<8x1xf32>
    %135 = vector.broadcast %134 : vector<8x1xf32> to vector<8x8xf32>
    %136 = arith.addf %133, %135 : vector<8x8xf32>
    %c0_108 = arith.constant 0 : index
    %c0_109 = arith.constant 0 : index
    %137 = vector.load %arg24[%c0_108, %c0_109] : memref<8x32xf32, #tpu.memory_space<vmem>>, vector<8x32xf32>
    %cst_110 = arith.constant dense<0.000000e+00> : vector<8x8xf32>
    %138 = tpu.matmul %137, %131, %cst_110 {dimension_numbers = #tpu.dot_dimension_numbers<[1], [0], [0], [1], [0, 0, 1, 1], [], []>} : vector<8x32xf32>, vector<32x8xf32>, vector<8x8xf32> -> vector<8x8xf32>
    %c0_111 = arith.constant 0 : index
    %c0_112 = arith.constant 0 : index
    %139 = vector.load %arg25[%c0_111, %c0_112] : memref<8x1xf32, #tpu.memory_space<vmem>>, vector<8x1xf32>
    %140 = vector.broadcast %139 : vector<8x1xf32> to vector<8x8xf32>
    %141 = arith.addf %138, %140 : vector<8x8xf32>
    %cst_113 = arith.constant 3.000000e+00 : f32
    %142 = vector.broadcast %cst_113 : f32 to vector<8x8xf32>
    %143 = arith.addf %136, %142 : vector<8x8xf32>
    %cst_114 = arith.constant 0.000000e+00 : f32
    %cst_115 = arith.constant 6.000000e+00 : f32
    %144 = vector.broadcast %cst_114 : f32 to vector<8x8xf32>
    %145 = arith.maximumf %144, %143 : vector<8x8xf32>
    %146 = vector.broadcast %cst_115 : f32 to vector<8x8xf32>
    %147 = arith.minimumf %146, %145 : vector<8x8xf32>
    %148 = arith.mulf %136, %147 : vector<8x8xf32>
    %cst_116 = arith.constant 0.166666672 : f32
    %149 = vector.broadcast %cst_116 : f32 to vector<8x8xf32>
    %150 = arith.mulf %148, %149 : vector<8x8xf32>
    %cst_117 = arith.constant 3.000000e+00 : f32
    %151 = vector.broadcast %cst_117 : f32 to vector<8x8xf32>
    %152 = arith.addf %141, %151 : vector<8x8xf32>
    %cst_118 = arith.constant 0.000000e+00 : f32
    %cst_119 = arith.constant 6.000000e+00 : f32
    %153 = vector.broadcast %cst_118 : f32 to vector<8x8xf32>
    %154 = arith.maximumf %153, %152 : vector<8x8xf32>
    %155 = vector.broadcast %cst_119 : f32 to vector<8x8xf32>
    %156 = arith.minimumf %155, %154 : vector<8x8xf32>
    %157 = arith.mulf %141, %156 : vector<8x8xf32>
    %cst_120 = arith.constant 0.166666672 : f32
    %158 = vector.broadcast %cst_120 : f32 to vector<8x8xf32>
    %159 = arith.mulf %157, %158 : vector<8x8xf32>
    %c0_121 = arith.constant 0 : index
    %c0_122 = arith.constant 0 : index
    %160 = vector.load %arg26[%c0_121, %c0_122] : memref<32x8xf32, #tpu.memory_space<vmem>>, vector<32x8xf32>
    %cst_123 = arith.constant dense<0.000000e+00> : vector<32x8xf32>
    %161 = tpu.matmul %160, %150, %cst_123 {dimension_numbers = #tpu.dot_dimension_numbers<[1], [0], [0], [1], [0, 0, 1, 1], [], []>} : vector<32x8xf32>, vector<8x8xf32>, vector<32x8xf32> -> vector<32x8xf32>
    %c0_124 = arith.constant 0 : index
    %c0_125 = arith.constant 0 : index
    %162 = vector.load %arg27[%c0_124, %c0_125] : memref<32x1xf32, #tpu.memory_space<vmem>>, vector<32x1xf32>
    %163 = vector.broadcast %162 : vector<32x1xf32> to vector<32x8xf32>
    %164 = arith.addf %161, %163 : vector<32x8xf32>
    %165 = arith.negf %164 : vector<32x8xf32>
    %166 = math.exp %165 : vector<32x8xf32>
    %cst_126 = arith.constant 1.000000e+00 : f32
    %167 = vector.broadcast %cst_126 : f32 to vector<32x8xf32>
    %168 = arith.addf %167, %166 : vector<32x8xf32>
    %169 = arith.divf %167, %168 : vector<32x8xf32>
    %c0_127 = arith.constant 0 : index
    %c0_128 = arith.constant 0 : index
    %170 = vector.load %arg28[%c0_127, %c0_128] : memref<32x8xf32, #tpu.memory_space<vmem>>, vector<32x8xf32>
    %cst_129 = arith.constant dense<0.000000e+00> : vector<32x8xf32>
    %171 = tpu.matmul %170, %159, %cst_129 {dimension_numbers = #tpu.dot_dimension_numbers<[1], [0], [0], [1], [0, 0, 1, 1], [], []>} : vector<32x8xf32>, vector<8x8xf32>, vector<32x8xf32> -> vector<32x8xf32>
    %c0_130 = arith.constant 0 : index
    %c0_131 = arith.constant 0 : index
    %172 = vector.load %arg29[%c0_130, %c0_131] : memref<32x1xf32, #tpu.memory_space<vmem>>, vector<32x1xf32>
    %173 = vector.broadcast %172 : vector<32x1xf32> to vector<32x8xf32>
    %174 = arith.addf %171, %173 : vector<32x8xf32>
    %175 = arith.negf %174 : vector<32x8xf32>
    %176 = math.exp %175 : vector<32x8xf32>
    %cst_132 = arith.constant 1.000000e+00 : f32
    %177 = vector.broadcast %cst_132 : f32 to vector<32x8xf32>
    %178 = arith.addf %177, %176 : vector<32x8xf32>
    %179 = arith.divf %177, %178 : vector<32x8xf32>
    %c0_133 = arith.constant 0 : index
    %c0_134 = arith.constant 0 : index
    %180 = vector.load %arg32[%c0_133, %c0_134] : memref<8x64xf32, #tpu.memory_space<vmem>>, vector<8x64xf32>
    %cst_135 = arith.constant dense<0.000000e+00> : vector<32x64xf32>
    %181 = tpu.matmul %169, %180, %cst_135 {dimension_numbers = #tpu.dot_dimension_numbers<[1], [0], [0], [1], [0, 0, 1, 1], [], []>} : vector<32x8xf32>, vector<8x64xf32>, vector<32x64xf32> -> vector<32x64xf32>
    %c0_136 = arith.constant 0 : index
    %c0_137 = arith.constant 0 : index
    %182 = vector.load %arg33[%c0_136, %c0_137] : memref<8x64xf32, #tpu.memory_space<vmem>>, vector<8x64xf32>
    %cst_138 = arith.constant dense<0.000000e+00> : vector<32x64xf32>
    %183 = tpu.matmul %179, %182, %cst_138 {dimension_numbers = #tpu.dot_dimension_numbers<[1], [0], [0], [1], [0, 0, 1, 1], [], []>} : vector<32x8xf32>, vector<8x64xf32>, vector<32x64xf32> -> vector<32x64xf32>
    %184 = arith.mulf %127, %181 : vector<32x64xf32>
    %185 = arith.mulf %184, %183 : vector<32x64xf32>
    %c0_139 = arith.constant 0 : index
    %c0_140 = arith.constant 0 : index
    %c0_141 = arith.constant 0 : index
    %186 = vector.load %arg58[%c0_139, %c0_140, %c0_141] : memref<1x32x64xf32, #tpu.memory_space<vmem>>, vector<1x32x64xf32>
    %187 = vector.shape_cast %186 : vector<1x32x64xf32> to vector<32x64xf32>
    %188 = vector.shape_cast %185 : vector<32x64xf32> to vector<1x32x64xf32>
    tpu.vector_store %arg58[%c0_139, %c0_140, %c0_141], %188 {strides = array<i32>} : memref<1x32x64xf32, #tpu.memory_space<vmem>>, vector<1x32x64xf32>,
    %c0_142 = arith.constant 0 : index
    %c0_143 = arith.constant 0 : index
    %c0_144 = arith.constant 0 : index
    %189 = vector.load %arg34[%c0_142, %c0_143, %c0_144] : memref<1x64x64xf32, #tpu.memory_space<vmem>>, vector<1x64x64xf32>
    %190 = vector.shape_cast %189 : vector<1x64x64xf32> to vector<64x64xf32>
    %c0_145 = arith.constant 0 : index
    %c0_146 = arith.constant 0 : index
    %191 = vector.load %arg41[%c0_145, %c0_146] : memref<64x8xf32, #tpu.memory_space<vmem>>, vector<64x8xf32>
    %cst_147 = arith.constant dense<0.000000e+00> : vector<64x8xf32>
    %192 = tpu.matmul %190, %191, %cst_147 {dimension_numbers = #tpu.dot_dimension_numbers<[1], [0], [0], [1], [0, 0, 1, 1], [], []>} : vector<64x64xf32>, vector<64x8xf32>, vector<64x8xf32> -> vector<64x8xf32>
    %c0_148 = arith.constant 0 : index
    %c0_149 = arith.constant 0 : index
    %193 = vector.load %arg42[%c0_148, %c0_149] : memref<64x8xf32, #tpu.memory_space<vmem>>, vector<64x8xf32>
    %cst_150 = arith.constant dense<0.000000e+00> : vector<64x8xf32>
    %194 = tpu.matmul %190, %193, %cst_150 {dimension_numbers = #tpu.dot_dimension_numbers<[1], [0], [0], [1], [0, 0, 1, 1], [], []>} : vector<64x64xf32>, vector<64x8xf32>, vector<64x8xf32> -> vector<64x8xf32>
    %c0_151 = arith.constant 0 : index
    %c0_152 = arith.constant 0 : index
    %195 = vector.load %arg35[%c0_151, %c0_152] : memref<8x64xf32, #tpu.memory_space<vmem>>, vector<8x64xf32>
    %cst_153 = arith.constant dense<0.000000e+00> : vector<8x8xf32>
    %196 = tpu.matmul %195, %192, %cst_153 {dimension_numbers = #tpu.dot_dimension_numbers<[1], [0], [0], [1], [0, 0, 1, 1], [], []>} : vector<8x64xf32>, vector<64x8xf32>, vector<8x8xf32> -> vector<8x8xf32>
    %c0_154 = arith.constant 0 : index
    %c0_155 = arith.constant 0 : index
    %197 = vector.load %arg36[%c0_154, %c0_155] : memref<8x1xf32, #tpu.memory_space<vmem>>, vector<8x1xf32>
    %198 = vector.broadcast %197 : vector<8x1xf32> to vector<8x8xf32>
    %199 = arith.addf %196, %198 : vector<8x8xf32>
    %c0_156 = arith.constant 0 : index
    %c0_157 = arith.constant 0 : index
    %200 = vector.load %arg35[%c0_156, %c0_157] : memref<8x64xf32, #tpu.memory_space<vmem>>, vector<8x64xf32>
    %cst_158 = arith.constant dense<0.000000e+00> : vector<8x8xf32>
    %201 = tpu.matmul %200, %194, %cst_158 {dimension_numbers = #tpu.dot_dimension_numbers<[1], [0], [0], [1], [0, 0, 1, 1], [], []>} : vector<8x64xf32>, vector<64x8xf32>, vector<8x8xf32> -> vector<8x8xf32>
    %c0_159 = arith.constant 0 : index
    %c0_160 = arith.constant 0 : index
    %202 = vector.load %arg36[%c0_159, %c0_160] : memref<8x1xf32, #tpu.memory_space<vmem>>, vector<8x1xf32>
    %203 = vector.broadcast %202 : vector<8x1xf32> to vector<8x8xf32>
    %204 = arith.addf %201, %203 : vector<8x8xf32>
    %cst_161 = arith.constant 3.000000e+00 : f32
    %205 = vector.broadcast %cst_161 : f32 to vector<8x8xf32>
    %206 = arith.addf %199, %205 : vector<8x8xf32>
    %cst_162 = arith.constant 0.000000e+00 : f32
    %cst_163 = arith.constant 6.000000e+00 : f32
    %207 = vector.broadcast %cst_162 : f32 to vector<8x8xf32>
    %208 = arith.maximumf %207, %206 : vector<8x8xf32>
    %209 = vector.broadcast %cst_163 : f32 to vector<8x8xf32>
    %210 = arith.minimumf %209, %208 : vector<8x8xf32>
    %211 = arith.mulf %199, %210 : vector<8x8xf32>
    %cst_164 = arith.constant 0.166666672 : f32
    %212 = vector.broadcast %cst_164 : f32 to vector<8x8xf32>
    %213 = arith.mulf %211, %212 : vector<8x8xf32>
    %cst_165 = arith.constant 3.000000e+00 : f32
    %214 = vector.broadcast %cst_165 : f32 to vector<8x8xf32>
    %215 = arith.addf %204, %214 : vector<8x8xf32>
    %cst_166 = arith.constant 0.000000e+00 : f32
    %cst_167 = arith.constant 6.000000e+00 : f32
    %216 = vector.broadcast %cst_166 : f32 to vector<8x8xf32>
    %217 = arith.maximumf %216, %215 : vector<8x8xf32>
    %218 = vector.broadcast %cst_167 : f32 to vector<8x8xf32>
    %219 = arith.minimumf %218, %217 : vector<8x8xf32>
    %220 = arith.mulf %204, %219 : vector<8x8xf32>
    %cst_168 = arith.constant 0.166666672 : f32
    %221 = vector.broadcast %cst_168 : f32 to vector<8x8xf32>
    %222 = arith.mulf %220, %221 : vector<8x8xf32>
    %c0_169 = arith.constant 0 : index
    %c0_170 = arith.constant 0 : index
    %223 = vector.load %arg37[%c0_169, %c0_170] : memref<64x8xf32, #tpu.memory_space<vmem>>, vector<64x8xf32>
    %cst_171 = arith.constant dense<0.000000e+00> : vector<64x8xf32>
    %224 = tpu.matmul %223, %213, %cst_171 {dimension_numbers = #tpu.dot_dimension_numbers<[1], [0], [0], [1], [0, 0, 1, 1], [], []>} : vector<64x8xf32>, vector<8x8xf32>, vector<64x8xf32> -> vector<64x8xf32>
    %c0_172 = arith.constant 0 : index
    %c0_173 = arith.constant 0 : index
    %225 = vector.load %arg38[%c0_172, %c0_173] : memref<64x1xf32, #tpu.memory_space<vmem>>, vector<64x1xf32>
    %226 = vector.broadcast %225 : vector<64x1xf32> to vector<64x8xf32>
    %227 = arith.addf %224, %226 : vector<64x8xf32>
    %228 = arith.negf %227 : vector<64x8xf32>
    %229 = math.exp %228 : vector<64x8xf32>
    %cst_174 = arith.constant 1.000000e+00 : f32
    %230 = vector.broadcast %cst_174 : f32 to vector<64x8xf32>
    %231 = arith.addf %230, %229 : vector<64x8xf32>
    %232 = arith.divf %230, %231 : vector<64x8xf32>
    %c0_175 = arith.constant 0 : index
    %c0_176 = arith.constant 0 : index
    %233 = vector.load %arg39[%c0_175, %c0_176] : memref<64x8xf32, #tpu.memory_space<vmem>>, vector<64x8xf32>
    %cst_177 = arith.constant dense<0.000000e+00> : vector<64x8xf32>
    %234 = tpu.matmul %233, %222, %cst_177 {dimension_numbers = #tpu.dot_dimension_numbers<[1], [0], [0], [1], [0, 0, 1, 1], [], []>} : vector<64x8xf32>, vector<8x8xf32>, vector<64x8xf32> -> vector<64x8xf32>
    %c0_178 = arith.constant 0 : index
    %c0_179 = arith.constant 0 : index
    %235 = vector.load %arg40[%c0_178, %c0_179] : memref<64x1xf32, #tpu.memory_space<vmem>>, vector<64x1xf32>
    %236 = vector.broadcast %235 : vector<64x1xf32> to vector<64x8xf32>
    %237 = arith.addf %234, %236 : vector<64x8xf32>
    %238 = arith.negf %237 : vector<64x8xf32>
    %239 = math.exp %238 : vector<64x8xf32>
    %cst_180 = arith.constant 1.000000e+00 : f32
    %240 = vector.broadcast %cst_180 : f32 to vector<64x8xf32>
    %241 = arith.addf %240, %239 : vector<64x8xf32>
    %242 = arith.divf %240, %241 : vector<64x8xf32>
    %c0_181 = arith.constant 0 : index
    %c0_182 = arith.constant 0 : index
    %243 = vector.load %arg43[%c0_181, %c0_182] : memref<8x64xf32, #tpu.memory_space<vmem>>, vector<8x64xf32>
    %cst_183 = arith.constant dense<0.000000e+00> : vector<64x64xf32>
    %244 = tpu.matmul %232, %243, %cst_183 {dimension_numbers = #tpu.dot_dimension_numbers<[1], [0], [0], [1], [0, 0, 1, 1], [], []>} : vector<64x8xf32>, vector<8x64xf32>, vector<64x64xf32> -> vector<64x64xf32>
    %c0_184 = arith.constant 0 : index
    %c0_185 = arith.constant 0 : index
    %245 = vector.load %arg44[%c0_184, %c0_185] : memref<8x64xf32, #tpu.memory_space<vmem>>, vector<8x64xf32>
    %cst_186 = arith.constant dense<0.000000e+00> : vector<64x64xf32>
    %246 = tpu.matmul %242, %245, %cst_186 {dimension_numbers = #tpu.dot_dimension_numbers<[1], [0], [0], [1], [0, 0, 1, 1], [], []>} : vector<64x8xf32>, vector<8x64xf32>, vector<64x64xf32> -> vector<64x64xf32>
    %247 = arith.mulf %190, %244 : vector<64x64xf32>
    %248 = arith.mulf %247, %246 : vector<64x64xf32>
    %c0_187 = arith.constant 0 : index
    %c0_188 = arith.constant 0 : index
    %c0_189 = arith.constant 0 : index
    %249 = vector.load %arg59[%c0_187, %c0_188, %c0_189] : memref<1x64x64xf32, #tpu.memory_space<vmem>>, vector<1x64x64xf32>
    %250 = vector.shape_cast %249 : vector<1x64x64xf32> to vector<64x64xf32>
    %251 = vector.shape_cast %248 : vector<64x64xf32> to vector<1x64x64xf32>
    tpu.vector_store %arg59[%c0_187, %c0_188, %c0_189], %251 {strides = array<i32>} : memref<1x64x64xf32, #tpu.memory_space<vmem>>, vector<1x64x64xf32>,
    %c0_190 = arith.constant 0 : index
    %c0_191 = arith.constant 0 : index
    %c0_192 = arith.constant 0 : index
    %252 = vector.load %arg45[%c0_190, %c0_191, %c0_192] : memref<1x128x64xf32, #tpu.memory_space<vmem>>, vector<1x128x64xf32>
    %253 = vector.shape_cast %252 : vector<1x128x64xf32> to vector<128x64xf32>
    %c0_193 = arith.constant 0 : index
    %c0_194 = arith.constant 0 : index
    %254 = vector.load %arg52[%c0_193, %c0_194] : memref<64x8xf32, #tpu.memory_space<vmem>>, vector<64x8xf32>
    %cst_195 = arith.constant dense<0.000000e+00> : vector<128x8xf32>
    %255 = tpu.matmul %253, %254, %cst_195 {dimension_numbers = #tpu.dot_dimension_numbers<[1], [0], [0], [1], [0, 0, 1, 1], [], []>} : vector<128x64xf32>, vector<64x8xf32>, vector<128x8xf32> -> vector<128x8xf32>
    %c0_196 = arith.constant 0 : index
    %c0_197 = arith.constant 0 : index
    %256 = vector.load %arg53[%c0_196, %c0_197] : memref<64x8xf32, #tpu.memory_space<vmem>>, vector<64x8xf32>
    %cst_198 = arith.constant dense<0.000000e+00> : vector<128x8xf32>
    %257 = tpu.matmul %253, %256, %cst_198 {dimension_numbers = #tpu.dot_dimension_numbers<[1], [0], [0], [1], [0, 0, 1, 1], [], []>} : vector<128x64xf32>, vector<64x8xf32>, vector<128x8xf32> -> vector<128x8xf32>
    %c0_199 = arith.constant 0 : index
    %c0_200 = arith.constant 0 : index
    %258 = vector.load %arg46[%c0_199, %c0_200] : memref<8x128xf32, #tpu.memory_space<vmem>>, vector<8x128xf32>
    %cst_201 = arith.constant dense<0.000000e+00> : vector<8x8xf32>
    %259 = tpu.matmul %258, %255, %cst_201 {dimension_numbers = #tpu.dot_dimension_numbers<[1], [0], [0], [1], [0, 0, 1, 1], [], []>} : vector<8x128xf32>, vector<128x8xf32>, vector<8x8xf32> -> vector<8x8xf32>
    %c0_202 = arith.constant 0 : index
    %c0_203 = arith.constant 0 : index
    %260 = vector.load %arg47[%c0_202, %c0_203] : memref<8x1xf32, #tpu.memory_space<vmem>>, vector<8x1xf32>
    %261 = vector.broadcast %260 : vector<8x1xf32> to vector<8x8xf32>
    %262 = arith.addf %259, %261 : vector<8x8xf32>
    %c0_204 = arith.constant 0 : index
    %c0_205 = arith.constant 0 : index
    %263 = vector.load %arg46[%c0_204, %c0_205] : memref<8x128xf32, #tpu.memory_space<vmem>>, vector<8x128xf32>
    %cst_206 = arith.constant dense<0.000000e+00> : vector<8x8xf32>
    %264 = tpu.matmul %263, %257, %cst_206 {dimension_numbers = #tpu.dot_dimension_numbers<[1], [0], [0], [1], [0, 0, 1, 1], [], []>} : vector<8x128xf32>, vector<128x8xf32>, vector<8x8xf32> -> vector<8x8xf32>
    %c0_207 = arith.constant 0 : index
    %c0_208 = arith.constant 0 : index
    %265 = vector.load %arg47[%c0_207, %c0_208] : memref<8x1xf32, #tpu.memory_space<vmem>>, vector<8x1xf32>
    %266 = vector.broadcast %265 : vector<8x1xf32> to vector<8x8xf32>
    %267 = arith.addf %264, %266 : vector<8x8xf32>
    %cst_209 = arith.constant 3.000000e+00 : f32
    %268 = vector.broadcast %cst_209 : f32 to vector<8x8xf32>
    %269 = arith.addf %262, %268 : vector<8x8xf32>
    %cst_210 = arith.constant 0.000000e+00 : f32
    %cst_211 = arith.constant 6.000000e+00 : f32
    %270 = vector.broadcast %cst_210 : f32 to vector<8x8xf32>
    %271 = arith.maximumf %270, %269 : vector<8x8xf32>
    %272 = vector.broadcast %cst_211 : f32 to vector<8x8xf32>
    %273 = arith.minimumf %272, %271 : vector<8x8xf32>
    %274 = arith.mulf %262, %273 : vector<8x8xf32>
    %cst_212 = arith.constant 0.166666672 : f32
    %275 = vector.broadcast %cst_212 : f32 to vector<8x8xf32>
    %276 = arith.mulf %274, %275 : vector<8x8xf32>
    %cst_213 = arith.constant 3.000000e+00 : f32
    %277 = vector.broadcast %cst_213 : f32 to vector<8x8xf32>
    %278 = arith.addf %267, %277 : vector<8x8xf32>
    %cst_214 = arith.constant 0.000000e+00 : f32
    %cst_215 = arith.constant 6.000000e+00 : f32
    %279 = vector.broadcast %cst_214 : f32 to vector<8x8xf32>
    %280 = arith.maximumf %279, %278 : vector<8x8xf32>
    %281 = vector.broadcast %cst_215 : f32 to vector<8x8xf32>
    %282 = arith.minimumf %281, %280 : vector<8x8xf32>
    %283 = arith.mulf %267, %282 : vector<8x8xf32>
    %cst_216 = arith.constant 0.166666672 : f32
    %284 = vector.broadcast %cst_216 : f32 to vector<8x8xf32>
    %285 = arith.mulf %283, %284 : vector<8x8xf32>
    %c0_217 = arith.constant 0 : index
    %c0_218 = arith.constant 0 : index
    %286 = vector.load %arg48[%c0_217, %c0_218] : memref<128x8xf32, #tpu.memory_space<vmem>>, vector<128x8xf32>
    %cst_219 = arith.constant dense<0.000000e+00> : vector<128x8xf32>
    %287 = tpu.matmul %286, %276, %cst_219 {dimension_numbers = #tpu.dot_dimension_numbers<[1], [0], [0], [1], [0, 0, 1, 1], [], []>} : vector<128x8xf32>, vector<8x8xf32>, vector<128x8xf32> -> vector<128x8xf32>
    %c0_220 = arith.constant 0 : index
    %c0_221 = arith.constant 0 : index
    %288 = vector.load %arg49[%c0_220, %c0_221] : memref<128x1xf32, #tpu.memory_space<vmem>>, vector<128x1xf32>
    %289 = vector.broadcast %288 : vector<128x1xf32> to vector<128x8xf32>
    %290 = arith.addf %287, %289 : vector<128x8xf32>
    %291 = arith.negf %290 : vector<128x8xf32>
    %292 = math.exp %291 : vector<128x8xf32>
    %cst_222 = arith.constant 1.000000e+00 : f32
    %293 = vector.broadcast %cst_222 : f32 to vector<128x8xf32>
    %294 = arith.addf %293, %292 : vector<128x8xf32>
    %295 = arith.divf %293, %294 : vector<128x8xf32>
    %c0_223 = arith.constant 0 : index
    %c0_224 = arith.constant 0 : index
    %296 = vector.load %arg50[%c0_223, %c0_224] : memref<128x8xf32, #tpu.memory_space<vmem>>, vector<128x8xf32>
    %cst_225 = arith.constant dense<0.000000e+00> : vector<128x8xf32>
    %297 = tpu.matmul %296, %285, %cst_225 {dimension_numbers = #tpu.dot_dimension_numbers<[1], [0], [0], [1], [0, 0, 1, 1], [], []>} : vector<128x8xf32>, vector<8x8xf32>, vector<128x8xf32> -> vector<128x8xf32>
    %c0_226 = arith.constant 0 : index
    %c0_227 = arith.constant 0 : index
    %298 = vector.load %arg51[%c0_226, %c0_227] : memref<128x1xf32, #tpu.memory_space<vmem>>, vector<128x1xf32>
    %299 = vector.broadcast %298 : vector<128x1xf32> to vector<128x8xf32>
    %300 = arith.addf %297, %299 : vector<128x8xf32>
    %301 = arith.negf %300 : vector<128x8xf32>
    %302 = math.exp %301 : vector<128x8xf32>
    %cst_228 = arith.constant 1.000000e+00 : f32
    %303 = vector.broadcast %cst_228 : f32 to vector<128x8xf32>
    %304 = arith.addf %303, %302 : vector<128x8xf32>
    %305 = arith.divf %303, %304 : vector<128x8xf32>
    %c0_229 = arith.constant 0 : index
    %c0_230 = arith.constant 0 : index
    %306 = vector.load %arg54[%c0_229, %c0_230] : memref<8x64xf32, #tpu.memory_space<vmem>>, vector<8x64xf32>
    %cst_231 = arith.constant dense<0.000000e+00> : vector<128x64xf32>
    %307 = tpu.matmul %295, %306, %cst_231 {dimension_numbers = #tpu.dot_dimension_numbers<[1], [0], [0], [1], [0, 0, 1, 1], [], []>} : vector<128x8xf32>, vector<8x64xf32>, vector<128x64xf32> -> vector<128x64xf32>
    %c0_232 = arith.constant 0 : index
    %c0_233 = arith.constant 0 : index
    %308 = vector.load %arg55[%c0_232, %c0_233] : memref<8x64xf32, #tpu.memory_space<vmem>>, vector<8x64xf32>
    %cst_234 = arith.constant dense<0.000000e+00> : vector<128x64xf32>
    %309 = tpu.matmul %305, %308, %cst_234 {dimension_numbers = #tpu.dot_dimension_numbers<[1], [0], [0], [1], [0, 0, 1, 1], [], []>} : vector<128x8xf32>, vector<8x64xf32>, vector<128x64xf32> -> vector<128x64xf32>
    %310 = arith.mulf %253, %307 : vector<128x64xf32>
    %311 = arith.mulf %310, %309 : vector<128x64xf32>
    %c0_235 = arith.constant 0 : index
    %c0_236 = arith.constant 0 : index
    %c0_237 = arith.constant 0 : index
    %312 = vector.load %arg60[%c0_235, %c0_236, %c0_237] : memref<1x128x64xf32, #tpu.memory_space<vmem>>, vector<1x128x64xf32>
    %313 = vector.shape_cast %312 : vector<1x128x64xf32> to vector<128x64xf32>
    %314 = vector.shape_cast %311 : vector<128x64xf32> to vector<1x128x64xf32>
    tpu.vector_store %arg60[%c0_235, %c0_236, %c0_237], %314 {strides = array<i32>} : memref<1x128x64xf32, #tpu.memory_space<vmem>>, vector<1x128x64xf32>,
    return
  }
  func.func @transform_0(%arg0: i32) -> (i32, i32, i32) {
    %c0_i32 = arith.constant 0 : i32
    %c0_i32_0 = arith.constant 0 : i32
    %c0_i32_1 = arith.constant 0 : i32
    return %arg0, %c0_i32, %c0_i32_0 : i32, i32, i32
  }
  func.func @transform_1(%arg0: i32) -> (i32, i32) {
    %c0_i32 = arith.constant 0 : i32
    %c0_i32_0 = arith.constant 0 : i32
    %c0_i32_1 = arith.constant 0 : i32
    return %c0_i32, %c0_i32_0 : i32, i32
  }
  func.func @transform_2(%arg0: i32) -> (i32, i32) {
    %c0_i32 = arith.constant 0 : i32
    %c0_i32_0 = arith.constant 0 : i32
    %c0_i32_1 = arith.constant 0 : i32
    return %c0_i32, %c0_i32_0 : i32, i32
  }
  func.func @transform_3(%arg0: i32) -> (i32, i32) {
    %c0_i32 = arith.constant 0 : i32
    %c0_i32_0 = arith.constant 0 : i32
    %c0_i32_1 = arith.constant 0 : i32
    return %c0_i32, %c0_i32_0 : i32, i32
  }
  func.func @transform_4(%arg0: i32) -> (i32, i32) {
    %c0_i32 = arith.constant 0 : i32
    %c0_i32_0 = arith.constant 0 : i32
    %c0_i32_1 = arith.constant 0 : i32
    return %c0_i32, %c0_i32_0 : i32, i32
  }
  func.func @transform_5(%arg0: i32) -> (i32, i32) {
    %c0_i32 = arith.constant 0 : i32
    %c0_i32_0 = arith.constant 0 : i32
    %c0_i32_1 = arith.constant 0 : i32
    return %c0_i32, %c0_i32_0 : i32, i32
  }
  func.func @transform_6(%arg0: i32) -> (i32, i32) {
    %c0_i32 = arith.constant 0 : i32
    %c0_i32_0 = arith.constant 0 : i32
    %c0_i32_1 = arith.constant 0 : i32
    return %c0_i32, %c0_i32_0 : i32, i32
  }
  func.func @transform_7(%arg0: i32) -> (i32, i32) {
    %c0_i32 = arith.constant 0 : i32
    %c0_i32_0 = arith.constant 0 : i32
    %c0_i32_1 = arith.constant 0 : i32
    return %c0_i32, %c0_i32_0 : i32, i32
  }
  func.func @transform_8(%arg0: i32) -> (i32, i32) {
    %c0_i32 = arith.constant 0 : i32
    %c0_i32_0 = arith.constant 0 : i32
    %c0_i32_1 = arith.constant 0 : i32
    return %c0_i32, %c0_i32_0 : i32, i32
  }
  func.func @transform_9(%arg0: i32) -> (i32, i32) {
    %c0_i32 = arith.constant 0 : i32
    %c0_i32_0 = arith.constant 0 : i32
    %c0_i32_1 = arith.constant 0 : i32
    return %c0_i32, %c0_i32_0 : i32, i32
  }
  func.func @transform_10(%arg0: i32) -> (i32, i32) {
    %c0_i32 = arith.constant 0 : i32
    %c0_i32_0 = arith.constant 0 : i32
    %c0_i32_1 = arith.constant 0 : i32
    return %c0_i32, %c0_i32_0 : i32, i32
  }
  func.func @transform_11(%arg0: i32) -> (i32, i32, i32) {
    %c0_i32 = arith.constant 0 : i32
    %c0_i32_0 = arith.constant 0 : i32
    %c0_i32_1 = arith.constant 0 : i32
    return %arg0, %c0_i32, %c0_i32_0 : i32, i32, i32
  }
  func.func @transform_12(%arg0: i32) -> (i32, i32) {
    %c0_i32 = arith.constant 0 : i32
    %c0_i32_0 = arith.constant 0 : i32
    %c0_i32_1 = arith.constant 0 : i32
    return %c0_i32, %c0_i32_0 : i32, i32
  }
  func.func @transform_13(%arg0: i32) -> (i32, i32) {
    %c0_i32 = arith.constant 0 : i32
    %c0_i32_0 = arith.constant 0 : i32
    %c0_i32_1 = arith.constant 0 : i32
    return %c0_i32, %c0_i32_0 : i32, i32
  }
  func.func @transform_14(%arg0: i32) -> (i32, i32) {
    %c0_i32 = arith.constant 0 : i32
    %c0_i32_0 = arith.constant 0 : i32
    %c0_i32_1 = arith.constant 0 : i32
    return %c0_i32, %c0_i32_0 : i32, i32
  }
  func.func @transform_15(%arg0: i32) -> (i32, i32) {
    %c0_i32 = arith.constant 0 : i32
    %c0_i32_0 = arith.constant 0 : i32
    %c0_i32_1 = arith.constant 0 : i32
    return %c0_i32, %c0_i32_0 : i32, i32
  }
  func.func @transform_16(%arg0: i32) -> (i32, i32) {
    %c0_i32 = arith.constant 0 : i32
    %c0_i32_0 = arith.constant 0 : i32
    %c0_i32_1 = arith.constant 0 : i32
    return %c0_i32, %c0_i32_0 : i32, i32
  }
  func.func @transform_17(%arg0: i32) -> (i32, i32) {
    %c0_i32 = arith.constant 0 : i32
    %c0_i32_0 = arith.constant 0 : i32
    %c0_i32_1 = arith.constant 0 : i32
    return %c0_i32, %c0_i32_0 : i32, i32
  }
  func.func @transform_18(%arg0: i32) -> (i32, i32) {
    %c0_i32 = arith.constant 0 : i32
    %c0_i32_0 = arith.constant 0 : i32
    %c0_i32_1 = arith.constant 0 : i32
    return %c0_i32, %c0_i32_0 : i32, i32
  }
  func.func @transform_19(%arg0: i32) -> (i32, i32) {
    %c0_i32 = arith.constant 0 : i32
    %c0_i32_0 = arith.constant 0 : i32
    %c0_i32_1 = arith.constant 0 : i32
    return %c0_i32, %c0_i32_0 : i32, i32
  }
  func.func @transform_20(%arg0: i32) -> (i32, i32) {
    %c0_i32 = arith.constant 0 : i32
    %c0_i32_0 = arith.constant 0 : i32
    %c0_i32_1 = arith.constant 0 : i32
    return %c0_i32, %c0_i32_0 : i32, i32
  }
  func.func @transform_21(%arg0: i32) -> (i32, i32) {
    %c0_i32 = arith.constant 0 : i32
    %c0_i32_0 = arith.constant 0 : i32
    %c0_i32_1 = arith.constant 0 : i32
    return %c0_i32, %c0_i32_0 : i32, i32
  }
  func.func @transform_22(%arg0: i32) -> (i32, i32, i32) {
    %c0_i32 = arith.constant 0 : i32
    %c0_i32_0 = arith.constant 0 : i32
    %c0_i32_1 = arith.constant 0 : i32
    return %arg0, %c0_i32, %c0_i32_0 : i32, i32, i32
  }
  func.func @transform_23(%arg0: i32) -> (i32, i32) {
    %c0_i32 = arith.constant 0 : i32
    %c0_i32_0 = arith.constant 0 : i32
    %c0_i32_1 = arith.constant 0 : i32
    return %c0_i32, %c0_i32_0 : i32, i32
  }
  func.func @transform_24(%arg0: i32) -> (i32, i32) {
    %c0_i32 = arith.constant 0 : i32
    %c0_i32_0 = arith.constant 0 : i32
    %c0_i32_1 = arith.constant 0 : i32
    return %c0_i32, %c0_i32_0 : i32, i32
  }
  func.func @transform_25(%arg0: i32) -> (i32, i32) {
    %c0_i32 = arith.constant 0 : i32
    %c0_i32_0 = arith.constant 0 : i32
    %c0_i32_1 = arith.constant 0 : i32
    return %c0_i32, %c0_i32_0 : i32, i32
  }
  func.func @transform_26(%arg0: i32) -> (i32, i32) {
    %c0_i32 = arith.constant 0 : i32
    %c0_i32_0 = arith.constant 0 : i32
    %c0_i32_1 = arith.constant 0 : i32
    return %c0_i32, %c0_i32_0 : i32, i32
  }
  func.func @transform_27(%arg0: i32) -> (i32, i32) {
    %c0_i32 = arith.constant 0 : i32
    %c0_i32_0 = arith.constant 0 : i32
    %c0_i32_1 = arith.constant 0 : i32
    return %c0_i32, %c0_i32_0 : i32, i32
  }
  func.func @transform_28(%arg0: i32) -> (i32, i32) {
    %c0_i32 = arith.constant 0 : i32
    %c0_i32_0 = arith.constant 0 : i32
    %c0_i32_1 = arith.constant 0 : i32
    return %c0_i32, %c0_i32_0 : i32, i32
  }
  func.func @transform_29(%arg0: i32) -> (i32, i32) {
    %c0_i32 = arith.constant 0 : i32
    %c0_i32_0 = arith.constant 0 : i32
    %c0_i32_1 = arith.constant 0 : i32
    return %c0_i32, %c0_i32_0 : i32, i32
  }
  func.func @transform_30(%arg0: i32) -> (i32, i32) {
    %c0_i32 = arith.constant 0 : i32
    %c0_i32_0 = arith.constant 0 : i32
    %c0_i32_1 = arith.constant 0 : i32
    return %c0_i32, %c0_i32_0 : i32, i32
  }
  func.func @transform_31(%arg0: i32) -> (i32, i32) {
    %c0_i32 = arith.constant 0 : i32
    %c0_i32_0 = arith.constant 0 : i32
    %c0_i32_1 = arith.constant 0 : i32
    return %c0_i32, %c0_i32_0 : i32, i32
  }
  func.func @transform_32(%arg0: i32) -> (i32, i32) {
    %c0_i32 = arith.constant 0 : i32
    %c0_i32_0 = arith.constant 0 : i32
    %c0_i32_1 = arith.constant 0 : i32
    return %c0_i32, %c0_i32_0 : i32, i32
  }
  func.func @transform_33(%arg0: i32) -> (i32, i32, i32) {
    %c0_i32 = arith.constant 0 : i32
    %c0_i32_0 = arith.constant 0 : i32
    %c0_i32_1 = arith.constant 0 : i32
    return %arg0, %c0_i32, %c0_i32_0 : i32, i32, i32
  }
  func.func @transform_34(%arg0: i32) -> (i32, i32) {
    %c0_i32 = arith.constant 0 : i32
    %c0_i32_0 = arith.constant 0 : i32
    %c0_i32_1 = arith.constant 0 : i32
    return %c0_i32, %c0_i32_0 : i32, i32
  }
  func.func @transform_35(%arg0: i32) -> (i32, i32) {
    %c0_i32 = arith.constant 0 : i32
    %c0_i32_0 = arith.constant 0 : i32
    %c0_i32_1 = arith.constant 0 : i32
    return %c0_i32, %c0_i32_0 : i32, i32
  }
  func.func @transform_36(%arg0: i32) -> (i32, i32) {
    %c0_i32 = arith.constant 0 : i32
    %c0_i32_0 = arith.constant 0 : i32
    %c0_i32_1 = arith.constant 0 : i32
    return %c0_i32, %c0_i32_0 : i32, i32
  }
  func.func @transform_37(%arg0: i32) -> (i32, i32) {
    %c0_i32 = arith.constant 0 : i32
    %c0_i32_0 = arith.constant 0 : i32
    %c0_i32_1 = arith.constant 0 : i32
    return %c0_i32, %c0_i32_0 : i32, i32
  }
  func.func @transform_38(%arg0: i32) -> (i32, i32) {
    %c0_i32 = arith.constant 0 : i32
    %c0_i32_0 = arith.constant 0 : i32
    %c0_i32_1 = arith.constant 0 : i32
    return %c0_i32, %c0_i32_0 : i32, i32
  }
  func.func @transform_39(%arg0: i32) -> (i32, i32) {
    %c0_i32 = arith.constant 0 : i32
    %c0_i32_0 = arith.constant 0 : i32
    %c0_i32_1 = arith.constant 0 : i32
    return %c0_i32, %c0_i32_0 : i32, i32
  }
  func.func @transform_40(%arg0: i32) -> (i32, i32) {
    %c0_i32 = arith.constant 0 : i32
    %c0_i32_0 = arith.constant 0 : i32
    %c0_i32_1 = arith.constant 0 : i32
    return %c0_i32, %c0_i32_0 : i32, i32
  }
  func.func @transform_41(%arg0: i32) -> (i32, i32) {
    %c0_i32 = arith.constant 0 : i32
    %c0_i32_0 = arith.constant 0 : i32
    %c0_i32_1 = arith.constant 0 : i32
    return %c0_i32, %c0_i32_0 : i32, i32
  }
  func.func @transform_42(%arg0: i32) -> (i32, i32) {
    %c0_i32 = arith.constant 0 : i32
    %c0_i32_0 = arith.constant 0 : i32
    %c0_i32_1 = arith.constant 0 : i32
    return %c0_i32, %c0_i32_0 : i32, i32
  }
  func.func @transform_43(%arg0: i32) -> (i32, i32) {
    %c0_i32 = arith.constant 0 : i32
    %c0_i32_0 = arith.constant 0 : i32
    %c0_i32_1 = arith.constant 0 : i32
    return %c0_i32, %c0_i32_0 : i32, i32
  }
  func.func @transform_44(%arg0: i32) -> (i32, i32, i32) {
    %c0_i32 = arith.constant 0 : i32
    %c0_i32_0 = arith.constant 0 : i32
    %c0_i32_1 = arith.constant 0 : i32
    return %arg0, %c0_i32, %c0_i32_0 : i32, i32, i32
  }
  func.func @transform_45(%arg0: i32) -> (i32, i32) {
    %c0_i32 = arith.constant 0 : i32
    %c0_i32_0 = arith.constant 0 : i32
    %c0_i32_1 = arith.constant 0 : i32
    return %c0_i32, %c0_i32_0 : i32, i32
  }
  func.func @transform_46(%arg0: i32) -> (i32, i32) {
    %c0_i32 = arith.constant 0 : i32
    %c0_i32_0 = arith.constant 0 : i32
    %c0_i32_1 = arith.constant 0 : i32
    return %c0_i32, %c0_i32_0 : i32, i32
  }
  func.func @transform_47(%arg0: i32) -> (i32, i32) {
    %c0_i32 = arith.constant 0 : i32
    %c0_i32_0 = arith.constant 0 : i32
    %c0_i32_1 = arith.constant 0 : i32
    return %c0_i32, %c0_i32_0 : i32, i32
  }
  func.func @transform_48(%arg0: i32) -> (i32, i32) {
    %c0_i32 = arith.constant 0 : i32
    %c0_i32_0 = arith.constant 0 : i32
    %c0_i32_1 = arith.constant 0 : i32
    return %c0_i32, %c0_i32_0 : i32, i32
  }
  func.func @transform_49(%arg0: i32) -> (i32, i32) {
    %c0_i32 = arith.constant 0 : i32
    %c0_i32_0 = arith.constant 0 : i32
    %c0_i32_1 = arith.constant 0 : i32
    return %c0_i32, %c0_i32_0 : i32, i32
  }
  func.func @transform_50(%arg0: i32) -> (i32, i32) {
    %c0_i32 = arith.constant 0 : i32
    %c0_i32_0 = arith.constant 0 : i32
    %c0_i32_1 = arith.constant 0 : i32
    return %c0_i32, %c0_i32_0 : i32, i32
  }
  func.func @transform_51(%arg0: i32) -> (i32, i32) {
    %c0_i32 = arith.constant 0 : i32
    %c0_i32_0 = arith.constant 0 : i32
    %c0_i32_1 = arith.constant 0 : i32
    return %c0_i32, %c0_i32_0 : i32, i32
  }
  func.func @transform_52(%arg0: i32) -> (i32, i32) {
    %c0_i32 = arith.constant 0 : i32
    %c0_i32_0 = arith.constant 0 : i32
    %c0_i32_1 = arith.constant 0 : i32
    return %c0_i32, %c0_i32_0 : i32, i32
  }
  func.func @transform_53(%arg0: i32) -> (i32, i32) {
    %c0_i32 = arith.constant 0 : i32
    %c0_i32_0 = arith.constant 0 : i32
    %c0_i32_1 = arith.constant 0 : i32
    return %c0_i32, %c0_i32_0 : i32, i32
  }
  func.func @transform_54(%arg0: i32) -> (i32, i32) {
    %c0_i32 = arith.constant 0 : i32
    %c0_i32_0 = arith.constant 0 : i32
    %c0_i32_1 = arith.constant 0 : i32
    return %c0_i32, %c0_i32_0 : i32, i32
  }
  func.func @transform_55(%arg0: i32) -> (i32, i32, i32) {
    %c0_i32 = arith.constant 0 : i32
    %c0_i32_0 = arith.constant 0 : i32
    %c0_i32_1 = arith.constant 0 : i32
    return %arg0, %c0_i32, %c0_i32_0 : i32, i32, i32
  }
  func.func @transform_56(%arg0: i32) -> (i32, i32, i32) {
    %c0_i32 = arith.constant 0 : i32
    %c0_i32_0 = arith.constant 0 : i32
    %c0_i32_1 = arith.constant 0 : i32
    return %arg0, %c0_i32, %c0_i32_0 : i32, i32, i32
  }
  func.func @transform_57(%arg0: i32) -> (i32, i32, i32) {
    %c0_i32 = arith.constant 0 : i32
    %c0_i32_0 = arith.constant 0 : i32
    %c0_i32_1 = arith.constant 0 : i32
    return %arg0, %c0_i32, %c0_i32_0 : i32, i32, i32
  }
  func.func @transform_58(%arg0: i32) -> (i32, i32, i32) {
    %c0_i32 = arith.constant 0 : i32
    %c0_i32_0 = arith.constant 0 : i32
    %c0_i32_1 = arith.constant 0 : i32
    return %arg0, %c0_i32, %c0_i32_0 : i32, i32, i32
  }
  func.func @transform_59(%arg0: i32) -> (i32, i32, i32) {
    %c0_i32 = arith.constant 0 : i32
    %c0_i32_0 = arith.constant 0 : i32
    %c0_i32_1 = arith.constant 0 : i32
    return %arg0, %c0_i32, %c0_i32_0 : i32, i32, i32
  }
}

</mosaic_0001>

<bundles_post_ra>
// kernel: tpu_custom_call.1
= control target key start
LH: loop header
LB: loop body
LE: loop exit
PB: predicated region body
PF: predicated region fallthrough
CT: control target
= control target key end

     0   :  { %s7031_s6 = smov 1   ;;  %s7032_s10 = smov 2   ;;  %s9140_s0 = inlined_call_operand.smem [shape: u32[60], index: -1, kind: input, shape index: {}] }
   0x1   :  { %s7103_s5 = sld [smem:[%s9140_s0]]   ;;  %s7033_s14 = smov 3  }
   0x2   :  { %s7108_s9 = sld [smem:[%s9140_s0 + %s7031_s6]]   ;;  %s7034_s18 = smov 4  }
   0x3   :  { %s7113_s13 = sld [smem:[%s9140_s0 + %s7032_s10]]   ;;  %s7035_s22 = smov 5  }
   0x4   :  { %s7118_s17 = sld [smem:[%s9140_s0 + %s7033_s14]]   ;;  %s7036_s26 = smov 6  }
   0x5   :  { %s7123_s21 = sld [smem:[%s9140_s0 + %s7034_s18]]   ;;  %s7037_s30 = smov 7  }
   0x6   :  { %s7128_s25 = sld [smem:[%s9140_s0 + %s7035_s22]]   ;;  %s7038_s4 = smov 8  }
   0x7   :  { %9197 = sst [smem:[#allocation12_spill]] %s7103_s5  ;;  %s7039_s10 = smov 9  }
   0x8   :  { %9198 = sst [smem:[#allocation13_spill]] %s7108_s9  ;;  %s7040_s15 = smov 10  }
   0x9   :  { %9199 = sst [smem:[#allocation14_spill]] %s7113_s13  ;;  %s7041_s20 = smov 11  }
   0xa   :  { %9200 = sst [smem:[#allocation15_spill]] %s7118_s17  ;;  %s7043_s1 = smov 13  }
   0xb   :  { %9201 = sst [smem:[#allocation16_spill]] %s7123_s21  ;;  %s7044_s7 = smov 14  }
   0xc   :  { %9202 = sst [smem:[#allocation17_spill]] %s7128_s25  ;;  %s7046_s22 = smov 16  }
   0xd   :  { %s7133_s29 = sld [smem:[%s9140_s0 + %s7036_s26]]   ;;  %s7042_s26 = smov 12  }
   0xe   :  { %s7138_s3 = sld [smem:[%s9140_s0 + %s7037_s30]]   ;;  %s7047_s28 = smov 17  }
   0xf   :  { %s7143_s8 = sld [smem:[%s9140_s0 + %s7038_s4]]  }
  0x10   :  { %s7148_s14 = sld [smem:[%s9140_s0 + %s7039_s10]]  }
  0x11   :  { %s7153_s19 = sld [smem:[%s9140_s0 + %s7040_s15]]   ;;  %s7045_s15 = smov 15  }
  0x12   :  { %s7158_s24 = sld [smem:[%s9140_s0 + %s7041_s20]]  }
  0x13   :  { %9203 = sst [smem:[#allocation18_spill]] %s7133_s29 }
  0x14   :  { %9204 = sst [smem:[#allocation19_spill]] %s7138_s3 }
  0x15   :  { %9205 = sst [smem:[#allocation20_spill]] %s7143_s8 }
  0x16   :  { %9206 = sst [smem:[#allocation21_spill]] %s7148_s14 }
  0x17   :  { %9207 = sst [smem:[#allocation22_spill]] %s7153_s19 }
  0x18   :  { %9208 = sst [smem:[#allocation23_spill]] %s7158_s24 }
  0x19   :  { %s7163_s30 = sld [smem:[%s9140_s0 + %s7042_s26]]  }
  0x1a   :  { %s7168_s6 = sld [smem:[%s9140_s0 + %s7043_s1]]  }
  0x1b   :  { %s7173_s12 = sld [smem:[%s9140_s0 + %s7044_s7]]   ;;  %s7048_s7 = smov 18  }
  0x1c   :  { %s7178_s20 = sld [smem:[%s9140_s0 + %s7045_s15]]   ;;  %s7049_s15 = smov 19  }
  0x1d   :  { %s7183_s27 = sld [smem:[%s9140_s0 + %s7046_s22]]   ;;  %s7050_s22 = smov 20  }
  0x1e   :  { %s7188_s4 = sld [smem:[%s9140_s0 + %s7047_s28]]   ;;  %s7051_s28 = smov 21  }
  0x1f   :  { %9209 = sst [smem:[#allocation24_spill]] %s7163_s30 }
  0x20   :  { %9210 = sst [smem:[#allocation25_spill]] %s7168_s6 }
  0x21   :  { %9211 = sst [smem:[#allocation26_spill]] %s7173_s12 }
  0x22   :  { %9212 = sst [smem:[#allocation27_spill]] %s7178_s20 }
  0x23   :  { %9213 = sst [smem:[#allocation28_spill]] %s7183_s27 }
  0x24   :  { %9214 = sst [smem:[#allocation29_spill]] %s7188_s4 }
  0x25   :  { %s7193_s12 = sld [smem:[%s9140_s0 + %s7048_s7]]   ;;  %s7052_s7 = smov 22  }
  0x26   :  { %s7198_s30 = sld [smem:[%s9140_s0 + %s7049_s15]]   ;;  %s7053_s15 = smov 23  }
  0x27   :  { %s7203_s27 = sld [smem:[%s9140_s0 + %s7050_s22]]   ;;  %s7054_s22 = smov 24  }
  0x28   :  { %s7208_s20 = sld [smem:[%s9140_s0 + %s7051_s28]]   ;;  %s7055_s28 = smov 25  }
  0x29   :  { %s7213_s24 = sld [smem:[%s9140_s0 + %s7052_s7]]   ;;  %s7056_s7 = smov 26  }
  0x2b   :  { %9215 = sst [smem:[#allocation30_spill]] %s7193_s12 }
  0x2c   :  { %9216 = sst [smem:[#allocation31_spill]] %s7198_s30 }
  0x2d   :  { %9217 = sst [smem:[#allocation32_spill]] %s7203_s27 }
  0x2e   :  { %9218 = sst [smem:[#allocation33_spill]] %s7208_s20 }
  0x2f   :  { %9219 = sst [smem:[#allocation34_spill]] %s7213_s24 }
  0x30   :  { %s7218_s30 = sld [smem:[%s9140_s0 + %s7053_s15]]   ;;  %s7057_s15 = smov 27  }
  0x31   :  { %s7223_s27 = sld [smem:[%s9140_s0 + %s7054_s22]]   ;;  %s7058_s22 = smov 28  }
  0x32   :  { %s7228_s20 = sld [smem:[%s9140_s0 + %s7055_s28]]   ;;  %s7059_s28 = smov 29  }
  0x33   :  { %s7233_s24 = sld [smem:[%s9140_s0 + %s7056_s7]]   ;;  %s7060_s7 = smov 30  }
  0x34   :  { %s7253_s14 = sld [smem:[%s9140_s0 + %s7060_s7]]   ;;  %s7064_s7 = smov 34  }
  0x36   :  { %9220 = sst [smem:[#allocation35_spill]] %s7218_s30 }
  0x37   :  { %9221 = sst [smem:[#allocation36_spill]] %s7223_s27 }
  0x38   :  { %9222 = sst [smem:[#allocation37_spill]] %s7228_s20 }
  0x39   :  { %9223 = sst [smem:[#allocation38_spill]] %s7233_s24 }
  0x3a   :  { %s7238_s30 = sld [smem:[%s9140_s0 + %s7057_s15]]   ;;  %s7061_s15 = smov 31  }
  0x3b   :  { %s7243_s27 = sld [smem:[%s9140_s0 + %s7058_s22]]   ;;  %s7062_s22 = smov 32  }
  0x3c   :  { %s7248_s20 = sld [smem:[%s9140_s0 + %s7059_s28]]   ;;  %s7063_s28 = smov 33  }
  0x3d   :  { %9227 = sst [smem:[#allocation42_spill]] %s7253_s14 }
  0x3e   :  { %s7263_s12 = sld [smem:[%s9140_s0 + %s7062_s22]]   ;;  %s7066_s22 = smov 36  }
  0x3f   :  { %s7273_s14 = sld [smem:[%s9140_s0 + %s7064_s7]]   ;;  %s7068_s7 = smov 38  }
  0x40   :  { %9224 = sst [smem:[#allocation39_spill]] %s7238_s30 }
  0x41   :  { %9225 = sst [smem:[#allocation40_spill]] %s7243_s27 }
  0x42   :  { %9226 = sst [smem:[#allocation41_spill]] %s7248_s20 }
  0x43   :  { %s7258_s30 = sld [smem:[%s9140_s0 + %s7061_s15]]   ;;  %s7065_s15 = smov 35  }
  0x44   :  { %9229 = sst [smem:[#allocation44_spill]] %s7263_s12 }
  0x45   :  { %s7268_s20 = sld [smem:[%s9140_s0 + %s7063_s28]]   ;;  %s7067_s28 = smov 37  }
  0x46   :  { %9231 = sst [smem:[#allocation46_spill]] %s7273_s14 }
  0x47   :  { %s7283_s12 = sld [smem:[%s9140_s0 + %s7066_s22]]   ;;  %s7070_s22 = smov 40  }
  0x48   :  { %s7293_s14 = sld [smem:[%s9140_s0 + %s7068_s7]]   ;;  %s7072_s7 = smov 42  }
  0x49   :  { %9228 = sst [smem:[#allocation43_spill]] %s7258_s30 }
  0x4a   :  { %s7278_s30 = sld [smem:[%s9140_s0 + %s7065_s15]]   ;;  %s7069_s15 = smov 39  }
  0x4b   :  { %9230 = sst [smem:[#allocation45_spill]] %s7268_s20 }
  0x4c   :  { %s7288_s20 = sld [smem:[%s9140_s0 + %s7067_s28]]   ;;  %s7071_s28 = smov 41  }
  0x4d   :  { %9233 = sst [smem:[#allocation48_spill]] %s7283_s12 }
  0x4e   :  { %9235 = sst [smem:[#allocation50_spill]] %s7293_s14 }
  0x4f   :  { %s7303_s12 = sld [smem:[%s9140_s0 + %s7070_s22]]   ;;  %s7074_s22 = smov 44  }
  0x50   :  { %9232 = sst [smem:[#allocation47_spill]] %s7278_s30 }
  0x51   :  { %s7298_s30 = sld [smem:[%s9140_s0 + %s7069_s15]]   ;;  %s7073_s15 = smov 43  }
  0x52   :  { %9234 = sst [smem:[#allocation49_spill]] %s7288_s20 }
  0x53   :  { %s7308_s19 = sld [smem:[%s9140_s0 + %s7071_s28]]   ;;  %s7075_s28 = smov 45  }
  0x54   :  { %s7313_s14 = sld [smem:[%s9140_s0 + %s7072_s7]]   ;;  %s7076_s7 = smov 46  }
  0x55   :  { %9236 = sst [smem:[#allocation51_spill]] %s7303_s12 }
  0x56   :  { %s7318_s25 = sld [smem:[%s9140_s0 + %s7073_s15]]   ;;  %s7077_s15 = smov 47  }
  0x57   :  { %s7323_s12 = sld [smem:[%s9140_s0 + %s7074_s22]]   ;;  %s7078_s22 = smov 48  }
  0x59   :  { %9237 = sst [smem:[#allocation52_spill]] %s7308_s19 }
  0x5a   :  { %9238 = sst [smem:[#allocation53_spill]] %s7313_s14 }
  0x5b   :  { %s7328_s19 = sld [smem:[%s9140_s0 + %s7075_s28]]   ;;  %s7079_s28 = smov 49  }
  0x5c   :  { %9239 = sst [smem:[#allocation54_spill]] %s7318_s25 }
  0x5d   :  { %9240 = sst [smem:[#allocation55_spill]] %s7323_s12 }
  0x5e   :  { %s7333_s14 = sld [smem:[%s9140_s0 + %s7076_s7]]   ;;  %s7080_s7 = smov 50  }
  0x5f   :  { %s7338_s25 = sld [smem:[%s9140_s0 + %s7077_s15]]   ;;  %s7081_s15 = smov 51  }
  0x60   :  { %s7343_s12 = sld [smem:[%s9140_s0 + %s7078_s22]]   ;;  %s7082_s22 = smov 52  }
  0x61   :  { %9241 = sst [smem:[#allocation56_spill]] %s7328_s19 }
  0x62   :  { %s7348_s19 = sld [smem:[%s9140_s0 + %s7079_s28]]   ;;  %s7083_s28 = smov 53  }
  0x63   :  { %s7363_s17 = sld [smem:[%s9140_s0 + %s7082_s22]]   ;;  %s7086_s22 = smov 56  }
  0x64   :  { %9242 = sst [smem:[#allocation57_spill]] %s7333_s14 }
  0x65   :  { %9243 = sst [smem:[#allocation58_spill]] %s7338_s25 }
  0x66   :  { %9244 = sst [smem:[#allocation59_spill]] %s7343_s12 }
  0x67   :  { %s7353_s14 = sld [smem:[%s9140_s0 + %s7080_s7]]   ;;  %s7084_s7 = smov 54  }
  0x68   :  { %9245 = sst [smem:[#allocation60_spill]] %s7348_s19 }
  0x69   :  { %s7358_s25 = sld [smem:[%s9140_s0 + %s7081_s15]]   ;;  %s7085_s15 = smov 55  }
  0x6a   :  { %9248 = sst [smem:[#allocation63_spill]] %s7363_s17 }
  0x6b   :  { %s7368_s19 = sld [smem:[%s9140_s0 + %s7083_s28]]   ;;  %s7087_s28 = smov 57  }
  0x6c   :  { %s7373_s6 = sld [smem:[%s9140_s0 + %s7084_s7]]   ;;  %s7088_s7 = smov 58  }
  0x6d   :  { %9246 = sst [smem:[#allocation61_spill]] %s7353_s14 }
  0x6e   :  { %s7383_s17 = sld [smem:[%s9140_s0 + %s7086_s22]]  }
  0x6f   :  { %9247 = sst [smem:[#allocation62_spill]] %s7358_s25 }
  0x70   :  { %s7378_s25 = sld [smem:[%s9140_s0 + %s7085_s15]]   ;;  %s7089_s15 = smov 59  }
  0x71   :  { %9249 = sst [smem:[#allocation64_spill]] %s7368_s19 }
  0x72   :  { %9250 = sst [smem:[#allocation65_spill]] %s7373_s6 }
  0x73   :  { %s7388_s19 = sld [smem:[%s9140_s0 + %s7087_s28]]  }
  0x74   :  { %9252 = sst [smem:[#allocation67_spill]] %s7383_s17 }
  0x75   :  { %s7393_s6 = sld [smem:[%s9140_s0 + %s7088_s7]]  }
  0x76   :  { %9251 = sst [smem:[#allocation66_spill]] %s7378_s25 }
  0x77   :  { %s7398_s25 = sld [smem:[%s9140_s0 + %s7089_s15]]  }
  0x7d   :  { %9253 = sst [smem:[#allocation68_spill]] %s7398_s25 }
  0x7e   :  { %125 = vsyncpa [#allocation3], 0 }
  0x7f   :  { %127 = vsyncpa [#allocation3 + $0x1], 0 }
  0x80   :  { %128 = vsyncpa [#allocation5], 0 }
  0x81   :  { %130 = vsyncpa [#allocation5 + $0x1], 0 }
  0x82   :  { %131 = vsyncpa [#allocation8], 0 }
  0x83   :  { %133 = vsyncpa [#allocation8 + $0x1], 0  ;;  %s7400_s22 = smov 0   ;;  %s7402_s23 = smov 0  }
  0x84   :  { %s7404_s26 = smov 0   ;;  %s7406_s28 = smov 0  }
  0x85 LB: > { %s9254_s27 = sld [smem:[#allocation40_spill]]  ;;  %s7421_s0 = sadd.s32 4294967295, %s7029_s28   ;;  %s7017_s22 = sphi %s7400_s22, %s9370_s22   ;;  %s7029_s28 = sphi %s7406_s28, %s9373_s28   ;;  %s7025_s26 = sphi %s7404_s26, %s9372_s26   ;;  %s7021_s23 = sphi %s7402_s23, %s9371_s23  }
  0x86   : > { %s9255_s17 = sld [smem:[#allocation67_spill]]  ;;  %s9163_s1 = sadd.s32 4294967294, %s7029_s28  }
  0x87   : > { %s9256_s24 = sld [smem:[#allocation38_spill]]  ;;  %s7425_s2 = sadd.s32 1, %s7029_s28  }
  0x88   : > { %s9257_s20 = sld [smem:[#allocation49_spill]]  ;;  %s1326_s7 = sadd.s32 1, %s7025_s26 }
  0x89   : > { %s9258_s14 = sld [smem:[#allocation61_spill]]  ;;  %s1323_s10 = ssub.s32 %s7029_s28, %s7425_s2 }
  0x8a   : > { %s9259_s12 = sld [smem:[#allocation59_spill]]  ;;  %p1336_p0 = scmp.ne.s32.totalorder %s7025_s26, %s7021_s23 }
  0x8b   : > { %s9260_s8 = sld [smem:[#allocation20_spill]]  ;;  %p1324_p1 = scmp.eq.s32.totalorder %s1323_s10, 0 }
  0x8c   : > { %s9261_s4 = sld [smem:[#allocation29_spill]]  ;;  %p1337_p2 = scmp.eq.s32.totalorder %s7421_s0, 1 }
  0x8d   : > { %s9262_s3 = sld [smem:[#allocation19_spill]]  ;;  %p1342_p3 = scmp.ne.s32.totalorder %s7021_s23, %s7017_s22 }
  0x8e   : > { %p1343_p4 = scmp.eq.s32.totalorder %s9163_s1, 1  ;;  %p7440_p5 = por %p1337_p2, %p1336_p0 }
  0x8f   : > { %s7438_s11 = scalar_select %p1324_p1, %s7025_s26, %s1326_s7  }
  0x90   : > { %p7444_p6 = por %p1343_p4, %p1342_p3  ;;  %p6185_p7 = scmp.ge.s32.totalorder %s7029_s28, 1 }
  0x91   : > { %p1655_p8 = scmp.lt.s32.totalorder %s7029_s28, 3 }
  0x93   : > { %p1656_p9 = pnand %p6185_p7, %p1655_p8 }
  0x94   : > { %s9265_s13 = sld [smem:[#allocation14_spill]] (!%p1656_p9)  ;;  %p1831_p10 = scmp.lt.s32.totalorder (!%p1656_p9), %s7421_s0, 1 }
  0x95   : > { %1659 = sbr.rel (%p1656_p9) target bundleno = 2706 (0xa92), region = 240  ;;  %s9266_s29 = sld [smem:[#allocation18_spill]] (!%p1656_p9) }
  0x96   : > { %s9267_s5 = sld [smem:[#allocation12_spill]] (!%p1656_p9) }
  0x97   : > { %s9268_s9 = sld [smem:[#allocation13_spill]] (!%p1656_p9) }
  0x98   : > { %s9269_s21 = sld [smem:[#allocation16_spill]] (!%p1656_p9) }
  0x99   : > { %s9272_s1 = sld [smem:[#allocation17_spill]] (!%p1656_p9) }
  0x9a   : > { %v1878_v0 = vld [vmem:[%s9262_s3 + $0x78] sm:$0xff]  ;;  %v7090_v3 = vmov 0   ;;  %v2008_v5 = vld [vmem:[%s9265_s13] sm:$0xff]  ;;  %v1877_v6 = vld [vmem:[%s9262_s3 + $0x70] sm:$0xff]  ;;  %s7504_s18 = scalar_select %p1831_p10, %s7421_s0, 1  ;;  %vm2014_vm0 = vcmask 64512  }
  0x9b   : > { %v1894_v1 = vld [vmem:[%s9262_s3 + $0xf8] sm:$0xff]  ;;  %6600 = vset.pattern.permute.xlu0 %v7090_v3  ;;  %1895 = vmatpush.msra.mxu0 %v1878_v0  ;;  %v1893_v7 = vld [vmem:[%s9262_s3 + $0xf0] sm:$0xff]  ;;  %v1876_v10 = vld [vmem:[%s9262_s3 + $0x68] sm:$0xff]  ;;  %vm2170_vm5 = vcmask 130048   ;;  %s9365_s25 = sld [smem:[#allocation68_spill]] }
  0x9c   : > { %v1950_v2 = vld [vmem:[%s9260_s8 + $0x78] sm:$0xff]  ;;  %1915 = vmatpush.msra.mxu1 %v1894_v1  ;;  %v1949_v8 = vld [vmem:[%s9260_s8 + $0x70] sm:$0xff]  ;;  %2011 = vperm.xlu0 %6600, %v2008_v5   ;;  %v1892_v11 = vld [vmem:[%s9262_s3 + $0xe8] sm:$0xff]  ;;  %s6472_s7 = sshll.u32 %s7504_s18, 4 }
  0x9d   : > { %v1966_v4 = vld [vmem:[%s9260_s8 + $0xf8] sm:$0xff]  ;;  %1967 = vmatpush.msra.mxu2 %v1950_v2  ;;  %v1965_v9 = vld [vmem:[%s9260_s8 + $0xf0] sm:$0xff]  ;;  %1896 = vmatpush.msra.mxu0 %v1877_v6  ;;  %v1948_v12 = vld [vmem:[%s9260_s8 + $0x68] sm:$0xff]  ;;  %s1835_s10 = scalar_lea.vmem %s9267_s5, %s6472_s7  ;;  %s9270_s7 = sld [smem:[#allocation25_spill]] }
  0x9e   : > { %1987 = vmatpush.msra.mxu3 %v1966_v4  ;;  %1916 = vmatpush.msra.mxu1 %v1893_v7  ;;  %v1964_v13 = vld [vmem:[%s9260_s8 + $0xe8] sm:$0xff]  ;;  %v1875_v14 = vld [vmem:[%s9262_s3 + $0x60] sm:$0xff]  ;;  %v1874_v18 = vld [vmem:[%s9262_s3 + $0x58] sm:$0xff] }
  0x9f   : > { %1968 = vmatpush.msra.mxu2 %v1949_v8  ;;  %v1891_v15 = vld [vmem:[%s9262_s3 + $0xe0] sm:$0xff]  ;;  %1897 = vmatpush.msra.mxu0 %v1876_v10  ;;  %v1890_v19 = vld [vmem:[%s9262_s3 + $0xd8] sm:$0xff]  ;;  %v1873_v23 = vld [vmem:[%s9262_s3 + $0x50] sm:$0xff] }
  0xa0   : > { %1988 = vmatpush.msra.mxu3 %v1965_v9  ;;  %1917 = vmatpush.msra.mxu1 %v1892_v11  ;;  %v1947_v16 = vld [vmem:[%s9260_s8 + $0x60] sm:$0xff]  ;;  %v1946_v20 = vld [vmem:[%s9260_s8 + $0x58] sm:$0xff]  ;;  %v1889_v24 = vld [vmem:[%s9262_s3 + $0xd0] sm:$0xff] }
  0xa1   : > { %v1963_v17 = vld [vmem:[%s9260_s8 + $0xe0] sm:$0xff]  ;;  %1969 = vmatpush.msra.mxu2 %v1948_v12  ;;  %1898 = vmatpush.msra.mxu0 %v1875_v14  ;;  %v1962_v21 = vld [vmem:[%s9260_s8 + $0xd8] sm:$0xff]  ;;  %v1945_v25 = vld [vmem:[%s9260_s8 + $0x50] sm:$0xff] }
  0xa2   : > { %1989 = vmatpush.msra.mxu3 %v1964_v13  ;;  %1918 = vmatpush.msra.mxu1 %v1891_v15  ;;  %v2118_v22 = vld [vmem:[%s9266_s29] sm:$0xff]  ;;  %v1961_v26 = vld [vmem:[%s9260_s8 + $0xd0] sm:$0xff]  ;;  %v1872_v27 = vld [vmem:[%s9262_s3 + $0x48] sm:$0xff] }
  0xa3   : > { %1970 = vmatpush.msra.mxu2 %v1947_v16  ;;  %1899 = vmatpush.msra.mxu0 %v1874_v18  ;;  %v1888_v28 = vld [vmem:[%s9262_s3 + $0xc8] sm:$0xff]  ;;  %v1871_v31 = vld [vmem:[%s9262_s3 + $0x40] sm:$0xff]  ;;  %v1870_v35 = vld [vmem:[%s9262_s3 + $0x38] sm:$0xff] }
  0xa4   : > { %1990 = vmatpush.msra.mxu3 %v1963_v17  ;;  %1919 = vmatpush.msra.mxu1 %v1890_v19  ;;  %v1944_v29 = vld [vmem:[%s9260_s8 + $0x48] sm:$0xff]  ;;  %v1887_v32 = vld [vmem:[%s9262_s3 + $0xc0] sm:$0xff]  ;;  %v1886_v36 = vld [vmem:[%s9262_s3 + $0xb8] sm:$0xff] }
  0xa5   : > { %1971 = vmatpush.msra.mxu2 %v1946_v20  ;;  %2121 = vperm.xlu0 %6600, %v2118_v22   ;;  %v1960_v30 = vld [vmem:[%s9260_s8 + $0xc8] sm:$0xff]  ;;  %v1943_v33 = vld [vmem:[%s9260_s8 + $0x40] sm:$0xff]  ;;  %v1942_v37 = vld [vmem:[%s9260_s8 + $0x38] sm:$0xff] }
  0xa6   : > { %1991 = vmatpush.msra.mxu3 %v1962_v21  ;;  %1900 = vmatpush.msra.mxu0 %v1873_v23  ;;  %v1959_v34 = vld [vmem:[%s9260_s8 + $0xc0] sm:$0xff]  ;;  %v1958_v38 = vld [vmem:[%s9260_s8 + $0xb8] sm:$0xff]  ;;  %v1869_v40 = vld [vmem:[%s9262_s3 + $0x30] sm:$0xff] }
  0xa7   : > { %1920 = vmatpush.msra.mxu1 %v1889_v24  ;;  %1972 = vmatpush.msra.mxu2 %v1945_v25  ;;  %v2570_v39 = vld [vmem:[%s9261_s4] sm:$0xff]  ;;  %v1885_v41 = vld [vmem:[%s9262_s3 + $0xb0] sm:$0xff]  ;;  %v1868_v44 = vld [vmem:[%s9262_s3 + $0x28] sm:$0xff] }
  0xa8   : > { %1992 = vmatpush.msra.mxu3 %v1961_v26  ;;  %1901 = vmatpush.msra.mxu0 %v1872_v27  ;;  %v1941_v42 = vld [vmem:[%s9260_s8 + $0x30] sm:$0xff]  ;;  %v1884_v45 = vld [vmem:[%s9262_s3 + $0xa8] sm:$0xff]  ;;  %v1867_v48 = vld [vmem:[%s9262_s3 + $0x20] sm:$0xff] }
  0xa9   : > { %1921 = vmatpush.msra.mxu1 %v1888_v28  ;;  %1973 = vmatpush.msra.mxu2 %v1944_v29  ;;  %v1957_v43 = vld [vmem:[%s9260_s8 + $0xb0] sm:$0xff]  ;;  %v1940_v46 = vld [vmem:[%s9260_s8 + $0x28] sm:$0xff]  ;;  %v1883_v49 = vld [vmem:[%s9262_s3 + $0xa0] sm:$0xff] }
  0xaa   : > { %1993 = vmatpush.msra.mxu3 %v1960_v30  ;;  %1902 = vmatpush.msra.mxu0 %v1871_v31  ;;  %v1956_v47 = vld [vmem:[%s9260_s8 + $0xa8] sm:$0xff]  ;;  %v1939_v50 = vld [vmem:[%s9260_s8 + $0x20] sm:$0xff]  ;;  %v1866_v52 = vld [vmem:[%s9262_s3 + $0x18] sm:$0xff] }
  0xab   : > { %1922 = vmatpush.msra.mxu1 %v1887_v32  ;;  %1974 = vmatpush.msra.mxu2 %v1943_v33  ;;  %v1955_v51 = vld [vmem:[%s9260_s8 + $0xa0] sm:$0xff]  ;;  %v1882_v53 = vld [vmem:[%s9262_s3 + $0x98] sm:$0xff]  ;;  %v1865_v57 = vld [vmem:[%s9262_s3 + $0x10] sm:$0xff] }
  0xac   : > { %1994 = vmatpush.msra.mxu3 %v1959_v34  ;;  %1903 = vmatpush.msra.mxu0 %v1870_v35  ;;  %v1938_v54 = vld [vmem:[%s9260_s8 + $0x18] sm:$0xff]  ;;  %v2929_v56 = vld [vmem:[%s9256_s24] sm:$0xff]  ;;  %v1881_v58 = vld [vmem:[%s9262_s3 + $0x90] sm:$0xff] }
  0xad   : > { %1923 = vmatpush.msra.mxu1 %v1886_v36  ;;  %1975 = vmatpush.msra.mxu2 %v1942_v37  ;;  %v1954_v55 = vld [vmem:[%s9260_s8 + $0x98] sm:$0xff]  ;;  %v1937_v59 = vld [vmem:[%s9260_s8 + $0x10] sm:$0xff]  ;;  %v1864_v61 = vld [vmem:[%s9262_s3 + $0x8] sm:$0xff] }
  0xae   : > { %1995 = vmatpush.msra.mxu3 %v1958_v38  ;;  %2574 = vperm.xlu0 %6600, %v2570_v39   ;;  %v1953_v60 = vld [vmem:[%s9260_s8 + $0x90] sm:$0xff]  ;;  %v1880_v62 = vld [vmem:[%s9262_s3 + $0x88] sm:$0xff]  ;;  %v1863_v1 = vld [vmem:[%s9262_s3] sm:$0xff] }
  0xaf   : > { %1904 = vmatpush.msra.mxu0 %v1869_v40  ;;  %1924 = vmatpush.msra.mxu1 %v1885_v41  ;;  %v1936_v63 = vld [vmem:[%s9260_s8 + $0x8] sm:$0xff]  ;;  %v1879_v2 = vld [vmem:[%s9262_s3 + $0x80] sm:$0xff]  ;;  %v2932_v9 = vld [vmem:[%s9256_s24 + $0x18] sm:$0xff]  ;;  %s9278_s3 = sld [smem:[#allocation23_spill]] }
  0xb0   : > { %1976 = vmatpush.msra.mxu2 %v1941_v42  ;;  %1996 = vmatpush.msra.mxu3 %v1957_v43  ;;  %v1952_v0 = vld [vmem:[%s9260_s8 + $0x88] sm:$0xff]  ;;  %v1935_v4 = vld [vmem:[%s9260_s8] sm:$0xff]  ;;  %v3512_v12 = vld [vmem:[%s9257_s20 + $0x18] sm:$0xff] }
  0xb1   : > { %1905 = vmatpush.msra.mxu0 %v1868_v44  ;;  %1925 = vmatpush.msra.mxu1 %v1884_v45  ;;  %v1951_v5 = vld [vmem:[%s9260_s8 + $0x80] sm:$0xff]  ;;  %v7529_v7 = vld [vmem:[%s1835_s10 + $0x8] sm:$0xff]  ;;  %v3515_v14 = vld [vmem:[%s9257_s20 + $0x30] sm:$0xff] }
  0xb2   : > { %1977 = vmatpush.msra.mxu2 %v1940_v46  ;;  %1997 = vmatpush.msra.mxu3 %v1956_v47  ;;  %v7527_v6 = vld [vmem:[%s1835_s10] sm:$0xff]  ;;  %v3075_v8 = vld [vmem:[%s9254_s27 + $0x8] sm:$0xff]  ;;  %v3789_v15 = vld [vmem:[%s7298_s30 + $0x38] sm:$0xff]  ;;  %s9271_s10 = sld [smem:[#allocation15_spill]] }
  0xb3   : > { %1906 = vmatpush.msra.mxu0 %v1867_v48  ;;  %1926 = vmatpush.msra.mxu1 %v1883_v49  ;;  %v3509_v10 = vld [vmem:[%s9257_s20] sm:$0xff]  ;;  %v3783_v11 = vld [vmem:[%s7298_s30 + $0x8] sm:$0xff]  ;;  %v4488_v16 = vld [vmem:[%s9259_s12 + $0x10] sm:$0xff] }
  0xb4   : > { %1978 = vmatpush.msra.mxu2 %v1939_v50  ;;  %1998 = vmatpush.msra.mxu3 %v1955_v51  ;;  %v3786_v13 = vld [vmem:[%s7298_s30 + $0x20] sm:$0xff]  ;;  %v5018_v17 = vld [vmem:[%s9258_s14 + $0x18] sm:$0xff]  ;;  %v4491_v18 = vld [vmem:[%s9259_s12 + $0x28] sm:$0xff] }
  0xb5   : > { %1907 = vmatpush.msra.mxu0 %v1866_v52  ;;  %1927 = vmatpush.msra.mxu1 %v1882_v53  ;;  %v5021_v19 = vld [vmem:[%s9258_s14 + $0x30] sm:$0xff]  ;;  %v4494_v20 = vld [vmem:[%s9259_s12 + $0x40] sm:$0xff]  ;;  %v5024_v21 = vld [vmem:[%s9258_s14 + $0x48] sm:$0xff] }
  0xb6   : > { %1979 = vmatpush.msra.mxu2 %v1938_v54  ;;  %1999 = vmatpush.msra.mxu3 %v1954_v55  ;;  %v4497_v22 = vld [vmem:[%s9259_s12 + $0x58] sm:$0xff]  ;;  %v2007_v26 = vld [vmem:[%s9268_s9] sm:$0xff]  ;;  %v4500_v31 = vld [vmem:[%s9259_s12 + $0x70] sm:$0xff]  ;;  %s9282_s9 = sld [smem:[#allocation47_spill]] }
  0xb7   : > { %2935 = vperm.xlu0 %6600, %v2929_v56   ;;  %1908 = vmatpush.msra.mxu0 %v1865_v57  ;;  %v5027_v27 = vld [vmem:[%s9258_s14 + $0x60] sm:$0xff]  ;;  %v5030_v32 = vld [vmem:[%s9258_s14 + $0x78] sm:$0xff]  ;;  %v2571_v35 = vld [vmem:[%s9261_s4 + $0x8] sm:$0xff]  ;;  %s9167_s4 = sshll.u32 %s7504_s18, 5 }
  0xb8   : > { %1928 = vmatpush.msra.mxu1 %v1881_v58  ;;  %1980 = vmatpush.msra.mxu2 %v1937_v59  ;;  %v2069_v33 = vld [vmem:[%s9269_s21] sm:$0xff]  ;;  %v2931_v49 = vld [vmem:[%s9256_s24 + $0x10] sm:$0xff]  ;;  %v3077_v55 = vld [vmem:[%s9254_s27 + $0x18] sm:$0xff]  ;;  %s1840_s5 = scalar_lea.vmem %s9278_s3, %s9167_s4  ;;  %s7682_s3 = sand.u32 1, %s7021_s23  }
  0xb9   : > { %2000 = vmatpush.msra.mxu3 %v1953_v60  ;;  %1909 = vmatpush.msra.mxu0 %v1864_v61  ;;  %v2428_v34 = vld [vmem:[%s9270_s7] sm:$0xff]  ;;  %s9273_s7 = sld [smem:[#allocation57_spill]]  ;;  %v3511_v57 = vld [vmem:[%s9257_s20 + $0x10] sm:$0xff]  ;;  %v3785_v58 = vld [vmem:[%s7298_s30 + $0x18] sm:$0xff] }
  0xba   : > { %1929 = vmatpush.msra.mxu1 %v1880_v62  ;;  %1981 = vmatpush.msra.mxu2 %v1936_v63  ;;  %v3074_v40 = vld [vmem:[%s9254_s27] sm:$0xff]  ;;  %v3514_v59 = vld [vmem:[%s9257_s20 + $0x28] sm:$0xff]  ;;  %v3788_v60 = vld [vmem:[%s7298_s30 + $0x30] sm:$0xff]  ;;  %s9280_s4 = sld [smem:[#allocation36_spill]] }
  0xbb   : > { %2001 = vmatpush.msra.mxu3 %v1952_v0  ;;  %1910 = vmatpush.msra.mxu0 %v1863_v1  ;;  %v2068_v48 = vld [vmem:[%s9271_s10] sm:$0xff]  ;;  %s9274_s10 = sld [smem:[#allocation22_spill]]  ;;  %v4487_v62 = vld [vmem:[%s9259_s12 + $0x8] sm:$0xff]  ;;  %v5017_v1 = vld [vmem:[%s9258_s14 + $0x10] sm:$0xff] }
  0xbc   : > { %1930 = vmatpush.msra.mxu1 %v1879_v2  ;;  %1982 = vmatpush.msra.mxu2 %v1935_v4  ;;  %v2117_v54 = vld [vmem:[%s9272_s1] sm:$0xff]  ;;  %s9275_s1 = sld [smem:[#allocation30_spill]] }
  0xbd   : > { %2002 = vmatpush.msra.mxu3 %v1951_v5  ;;  %1911 = vmatmul.f32.vlgmr.msra.gmra.mxu0 %v7527_v6  ;;  %v3782_v56 = vld [vmem:[%s7298_s30] sm:$0xff] }
  0xbe   : > { %1931 = vmatmul.f32.vlgmr.msra.gmra.mxu1 %v7529_v7  ;;  %1983 = vmatmul.f32.vlgmr.msra.gmra.mxu2 %v7527_v6  ;;  %v4490_v5 = vld [vmem:[%s9259_s12 + $0x20] sm:$0xff] }
  0xbf   : > { %2003 = vmatmul.f32.vlgmr.msra.gmra.mxu3 %v7529_v7  ;;  %3085 = vperm.xlu0 %6600, %v3075_v8   ;;  %v4414_v61 = vld [vmem:[%s9273_s7] sm:$0xff]  ;;  %v5020_v8 = vld [vmem:[%s9258_s14 + $0x28] sm:$0xff]  ;;  %s9276_s7 = sld [smem:[#allocation21_spill]] }
  0xc0   : > { %6601 = vset.pattern.permute.xlu1 %v7090_v3  ;;  %6602 = vset.pattern.permute.xlu2 %v7090_v3  ;;  %v5015_v3 = vld [vmem:[%s9258_s14] sm:$0xff] }
  0xc1   : > { %2072 = vperm.xlu1 %6601, %v2069_v33   ;;  %v2216_v63 = vld [vmem:[%s9274_s10 + $0x10] sm:$0xff]  ;;  %v2217_v0 = vld [vmem:[%s9274_s10 + $0x18] sm:$0xff]  ;;  %v2214_v2 = vld [vmem:[%s9274_s10] sm:$0xff] }
  0xc2   : > { %v2215_v4 = vld [vmem:[%s9274_s10 + $0x8] sm:$0xff]  ;;  %s9295_s10 = sld [smem:[#allocation52_spill]] }
  0xc3   : > { %v2292_v33 = vld [vmem:[%s9275_s1 + $0xa8] sm:$0xff] }
  0xc7   : > { %2950 = vperm.xlu0 %6600, %v2932_v9   ;;  %v4493_v9 = vld [vmem:[%s9259_s12 + $0x38] sm:$0xff] }
  0xc9   : > { %2431 = vperm.xlu1 %6601, %v2428_v34   ;;  %v2275_v34 = vld [vmem:[%s9275_s1 + $0x20] sm:$0xff] }
  0xcf   : > { %3519 = vperm.xlu0 %6600, %v3509_v10   ;;  %v5023_v10 = vld [vmem:[%s9258_s14 + $0x40] sm:$0xff] }
  0xd1   : > { %2579 = vperm.xlu1 %6601, %v2571_v35   ;;  %v2291_v35 = vld [vmem:[%s9275_s1 + $0xa0] sm:$0xff] }
  0xd7   : > { %3797 = vperm.xlu0 %6600, %v3783_v11   ;;  %v2286_v11 = vld [vmem:[%s9275_s1 + $0x78] sm:$0xff] }
  0xd9   : > { %3080 = vperm.xlu1 %6601, %v3074_v40   ;;  %v2289_v40 = vld [vmem:[%s9275_s1 + $0x90] sm:$0xff] }
  0xdf   : > { %3534 = vperm.xlu0 %6600, %v3512_v12   ;;  %v2302_v12 = vld [vmem:[%s9275_s1 + $0xf8] sm:$0xff] }
  0xe1   : > { %2945 = vperm.xlu1 %6601, %v2931_v49   ;;  %v5029_v49 = vld [vmem:[%s9258_s14 + $0x70] sm:$0xff] }
  0xe7   : > { %3812 = vperm.xlu0 %6600, %v3786_v13   ;;  %v2285_v13 = vld [vmem:[%s9275_s1 + $0x70] sm:$0xff] }
  0xe9   : > { %3095 = vperm.xlu1 %6601, %v3077_v55   ;;  %v2166_v55 = vld [vmem:[%s9276_s7] sm:$0xff] }
  0xef   : > { %3549 = vperm.xlu0 %6600, %v3515_v14   ;;  %v2301_v14 = vld [vmem:[%s9275_s1 + $0xf0] sm:$0xff] }
  0xf1   : > { %3792 = vperm.xlu1 %6601, %v3782_v56   ;;  %v2167_v56 = vld [vmem:[%s9276_s7 + $0x8] sm:$0xff] }
  0xf7   : > { %3827 = vperm.xlu0 %6600, %v3789_v15   ;;  %v2284_v15 = vld [vmem:[%s9275_s1 + $0x68] sm:$0xff] }
  0xf9   : > { %3529 = vperm.xlu1 %6601, %v3511_v57  }
  0xff   : > { %5033 = vperm.xlu0 %6600, %v5015_v3   ;;  %v2300_v3 = vld [vmem:[%s9275_s1 + $0xe8] sm:$0xff] }
 0x101   : > { %3807 = vperm.xlu1 %6601, %v3785_v58  }
 0x107   : > { %4514 = vperm.xlu0 %6600, %v4488_v16   ;;  %v2283_v16 = vld [vmem:[%s9275_s1 + $0x60] sm:$0xff] }
 0x109   : > { %3544 = vperm.xlu1 %6601, %v3514_v59  }
 0x10e   : > { %v2012_v36 = vpop.permute.xlu0 %2011 }
 0x10f   : > { %5048 = vperm.xlu0 %6600, %v5018_v17   ;;  %v2299_v17 = vld [vmem:[%s9275_s1 + $0xe0] sm:$0xff] }
 0x111   : > { %3822 = vperm.xlu1 %6601, %v3788_v60  }
 0x117   : > { %4529 = vperm.xlu0 %6600, %v4491_v18   ;;  %v4496_v18 = vld [vmem:[%s9259_s12 + $0x50] sm:$0xff] }
 0x119   : > { %4417 = vperm.xlu1 %6601, %v4414_v61  }
 0x11f   : > { %5063 = vperm.xlu0 %6600, %v5021_v19   ;;  %v2282_v19 = vld [vmem:[%s9275_s1 + $0x58] sm:$0xff] }
 0x121   : > { %4509 = vperm.xlu1 %6601, %v4487_v62  }
 0x127   : > { %4544 = vperm.xlu0 %6600, %v4494_v20   ;;  %v2298_v20 = vld [vmem:[%s9275_s1 + $0xd8] sm:$0xff] }
 0x129   : > { %5043 = vperm.xlu1 %6601, %v5017_v1  }
 0x12f   : > { %5078 = vperm.xlu0 %6600, %v5024_v21   ;;  %v2281_v21 = vld [vmem:[%s9275_s1 + $0x50] sm:$0xff] }
 0x131   : > { %4524 = vperm.xlu1 %6601, %v4490_v5  }
 0x137   : > { %4559 = vperm.xlu0 %6600, %v4497_v22   ;;  %v2297_v22 = vld [vmem:[%s9275_s1 + $0xd0] sm:$0xff] }
 0x139   : > { %5058 = vperm.xlu1 %6601, %v5020_v8  }
 0x13a   : > { %v1912_v23 = vpop.f32.mrf.mxu0 }
 0x13b   : > { %v1932_v24 = vpop.f32.mrf.mxu1 }
 0x13c   : > { %v1933_v25 = vadd.f32 %v1932_v24, %v1912_v23  ;;  %v2280_v23 = vld [vmem:[%s9275_s1 + $0x48] sm:$0xff] }
 0x13d   : > { %v2296_v24 = vld [vmem:[%s9275_s1 + $0xc8] sm:$0xff] }
 0x13e   : > { %2033 = vmatpush.msrb.mxu0 %v1933_v25  ;;  %v2279_v25 = vld [vmem:[%s9275_s1 + $0x40] sm:$0xff] }
 0x13f   : > { %6202 = vmatmul.msk.f32.vlgmr.msrb.gmra.mxu0 %vm2014_vm0, %v2007_v26  ;;  %5093 = vperm.xlu0 %6600, %v5027_v27   ;;  %v5026_v27 = vld [vmem:[%s9258_s14 + $0x58] sm:$0xff] }
 0x141   : > { %v1984_v28 = vpop.f32.mrf.mxu2  ;;  %4539 = vperm.xlu1 %6601, %v4493_v9  }
 0x142   : > { %v2004_v29 = vpop.f32.mrf.mxu3 }
 0x143   : > { %v2005_v30 = vadd.f32 %v2004_v29, %v1984_v28  ;;  %v2278_v28 = vld [vmem:[%s9275_s1 + $0x38] sm:$0xff] }
 0x144   : > { %v2294_v29 = vld [vmem:[%s9275_s1 + $0xb8] sm:$0xff] }
 0x145   : > { %2053 = vmatpush.msrb.mxu1 %v2005_v30  ;;  %v2277_v30 = vld [vmem:[%s9275_s1 + $0x30] sm:$0xff] }
 0x146   : > { %6203 = vmatmul.msk.f32.vlgmr.msrb.gmra.mxu1 %vm2014_vm0, %v2007_v26  ;;  %v2295_v26 = vld [vmem:[%s9275_s1 + $0xc0] sm:$0xff] }
 0x147   : > { %4574 = vperm.xlu0 %6600, %v4500_v31   ;;  %v2293_v31 = vld [vmem:[%s9275_s1 + $0xb0] sm:$0xff] }
 0x149   : > { %5073 = vperm.xlu1 %6601, %v5023_v10  }
 0x14f   : > { %5108 = vperm.xlu0 %6600, %v5030_v32   ;;  %v2276_v32 = vld [vmem:[%s9275_s1 + $0x28] sm:$0xff] }
 0x151   : > { %4554 = vperm.xlu1 %6601, %v4496_v18  }
 0x159   : > { %5088 = vperm.xlu1 %6601, %v5026_v27  }
 0x1bc   : > { %v2035_v37 = vpop.f32.mrf.mxu0 }
 0x1bd   : > { %v2036_v38 = vadd.f32 %v2035_v37, %v2012_v36  ;;  %v2274_v37 = vld [vmem:[%s9275_s1 + $0x18] sm:$0xff] }
 0x1bf   : > { %v2058_v39 = vadd.f32 3.0, %v2036_v38 }
 0x1c1   : > { %v2059_v41 = vmax.f32 %v2058_v39, 0.0  ;;  %v2273_v39 = vld [vmem:[%s9275_s1 + $0x10] sm:$0xff] }
 0x1c3   : > { %v2055_v42 = vpop.f32.mrf.mxu1  ;;  %v2060_v43 = vmin.f32 %v2059_v41, 6.0  ;;  %v2073_v41 = vpop.permute.xlu1 %2072 }
 0x1c4   : > { %v2056_v44 = vadd.f32 %v2055_v42, %v2012_v36  ;;  %v4499_v36 = vld [vmem:[%s9259_s12 + $0x68] sm:$0xff] }
 0x1c5   : > { %v2061_v45 = vmul.f32 %v2060_v43, %v2036_v38  ;;  %v2290_v38 = vld [vmem:[%s9275_s1 + $0x98] sm:$0xff]  ;;  %4569 = vperm.xlu1 %6601, %v4499_v36   ;;  %v2272_v43 = vld [vmem:[%s9275_s1 + $0x8] sm:$0xff] }
 0x1c6   : > { %v2063_v46 = vadd.f32 3.0, %v2056_v44 }
 0x1c7   : > { %v2062_v47 = vmul.f32 0.16666667, %v2061_v45 }
 0x1c8   : > { %v2064_v50 = vmax.f32 %v2063_v46, 0.0  ;;  %v2271_v46 = vld [vmem:[%s9275_s1] sm:$0xff] }
 0x1c9   : > { %2093 = vmatpush.msrb.mxu2 %v2062_v47  ;;  %v2287_v47 = vld [vmem:[%s9275_s1 + $0x80] sm:$0xff] }
 0x1ca   : > { %v2065_v51 = vmin.f32 %v2064_v50, 6.0  ;;  %6204 = vmatmul.msk.f32.vlgmr.msrb.gmra.mxu2 %vm2014_vm0, %v2068_v48  ;;  %v2122_v50 = vpop.permute.xlu0 %2121 }
 0x1cb   : > { %2235 = vmatpush.msra.mxu2 %v2216_v63 }
 0x1cc   : > { %v2066_v52 = vmul.f32 %v2065_v51, %v2056_v44  ;;  %v2288_v44 = vld [vmem:[%s9275_s1 + $0x88] sm:$0xff]  ;;  %s9277_s1 = sld [smem:[#allocation31_spill]] }
 0x1cd   : > { %2236 = vmatpush.msra.mxu2 %v2214_v2  ;;  %5103 = vperm.xlu1 %6601, %v5029_v49  }
 0x1ce   : > { %v2067_v53 = vmul.f32 0.16666667, %v2066_v52  ;;  %v2168_v52 = vld [vmem:[%s9276_s7 + $0x10] sm:$0xff] }
 0x1cf   : > { %2303 = vmatpush.msrb.mxu2 %v2286_v11  ;;  %2188 = vmatpush.msra.mxu0 %v2168_v52 }
 0x1d0   : > { %2142 = vmatpush.msrb.mxu3 %v2067_v53  ;;  %v2169_v53 = vld [vmem:[%s9276_s7 + $0x18] sm:$0xff]  ;;  %s9281_s7 = sld [smem:[#allocation24_spill]] }
 0x1d1   : > { %6206 = vmatmul.msk.f32.vlgmr.msrb.gmra.mxu3 %vm2014_vm0, %v2117_v54  ;;  %2304 = vmatpush.msrb.mxu2 %v2285_v13 }
 0x1d2   : > { %2255 = vmatpush.msra.mxu3 %v2217_v0  ;;  %2208 = vmatpush.msra.mxu1 %v2169_v53  ;;  %v2377_v27 = vld [vmem:[%s9277_s1 + $0xe0] sm:$0xff]  ;;  %v2368_v49 = vld [vmem:[%s9277_s1 + $0x98] sm:$0xff]  ;;  %v2350_v52 = vld [vmem:[%s9277_s1 + $0x8] sm:$0xff] }
 0x1d3   : > { %2305 = vmatpush.msrb.mxu2 %v2284_v15  ;;  %2189 = vmatpush.msra.mxu0 %v2166_v55  ;;  %v2357_v36 = vld [vmem:[%s9277_s1 + $0x40] sm:$0xff]  ;;  %v2366_v53 = vld [vmem:[%s9277_s1 + $0x88] sm:$0xff] }
 0x1d4   : > { %2256 = vmatpush.msra.mxu3 %v2215_v4  ;;  %2209 = vmatpush.msra.mxu1 %v2167_v56  ;;  %v2365_v55 = vld [vmem:[%s9277_s1 + $0x80] sm:$0xff] }
 0x1d5   : > { %2306 = vmatpush.msrb.mxu2 %v2283_v16 }
 0x1d6   : > { %2326 = vmatpush.msrb.mxu3 %v2302_v12 }
 0x1d7   : > { %2307 = vmatpush.msrb.mxu2 %v2282_v19  ;;  %v2364_v19 = vld [vmem:[%s9277_s1 + $0x78] sm:$0xff] }
 0x1d8   : > { %2327 = vmatpush.msrb.mxu3 %v2301_v14 }
 0x1d9   : > { %2308 = vmatpush.msrb.mxu2 %v2281_v21 }
 0x1da   : > { %2328 = vmatpush.msrb.mxu3 %v2300_v3 }
 0x1db   : > { %2309 = vmatpush.msrb.mxu2 %v2280_v23  ;;  %v2379_v23 = vld [vmem:[%s9277_s1 + $0xf0] sm:$0xff] }
 0x1dc   : > { %2329 = vmatpush.msrb.mxu3 %v2299_v17 }
 0x1dd   : > { %2310 = vmatpush.msrb.mxu2 %v2279_v25  ;;  %v2378_v25 = vld [vmem:[%s9277_s1 + $0xe8] sm:$0xff] }
 0x1de   : > { %2330 = vmatpush.msrb.mxu3 %v2298_v20  ;;  %v2380_v20 = vld [vmem:[%s9277_s1 + $0xf8] sm:$0xff] }
 0x1df   : > { %2311 = vmatpush.msrb.mxu2 %v2278_v28  ;;  %v7641_v28 = vld [vmem:[%s1840_s5] sm:$0xff] }
 0x1e0   : > { %2331 = vmatpush.msrb.mxu3 %v2297_v22  ;;  %v2363_v22 = vld [vmem:[%s9277_s1 + $0x70] sm:$0xff] }
 0x1e1   : > { %2312 = vmatpush.msrb.mxu2 %v2277_v30  ;;  %v2360_v30 = vld [vmem:[%s9277_s1 + $0x58] sm:$0xff] }
 0x1e2   : > { %2332 = vmatpush.msrb.mxu3 %v2296_v24  ;;  %v2362_v24 = vld [vmem:[%s9277_s1 + $0x68] sm:$0xff] }
 0x1e3   : > { %2313 = vmatpush.msrb.mxu2 %v2276_v32  ;;  %v2359_v32 = vld [vmem:[%s9277_s1 + $0x50] sm:$0xff] }
 0x1e4   : > { %2333 = vmatpush.msrb.mxu3 %v2295_v26  ;;  %v2361_v26 = vld [vmem:[%s9277_s1 + $0x60] sm:$0xff] }
 0x1e5   : > { %2314 = vmatpush.msrb.mxu2 %v2275_v34  ;;  %v2358_v34 = vld [vmem:[%s9277_s1 + $0x48] sm:$0xff] }
 0x1e6   : > { %2334 = vmatpush.msrb.mxu3 %v2294_v29  ;;  %v7643_v29 = vld [vmem:[%s1840_s5 + $0x8] sm:$0xff] }
 0x1e7   : > { %2315 = vmatpush.msrb.mxu2 %v2274_v37  ;;  %v2373_v37 = vld [vmem:[%s9277_s1 + $0xc0] sm:$0xff] }
 0x1e8   : > { %2335 = vmatpush.msrb.mxu3 %v2293_v31  ;;  %v2376_v31 = vld [vmem:[%s9277_s1 + $0xd8] sm:$0xff] }
 0x1e9   : > { %2316 = vmatpush.msrb.mxu2 %v2273_v39  ;;  %v7657_v39 = vld [vmem:[%s1840_s5 + $0x18] sm:$0xff] }
 0x1ea   : > { %2336 = vmatpush.msrb.mxu3 %v2292_v33  ;;  %v2375_v33 = vld [vmem:[%s9277_s1 + $0xd0] sm:$0xff] }
 0x1eb   : > { %2317 = vmatpush.msrb.mxu2 %v2272_v43  ;;  %v2371_v43 = vld [vmem:[%s9277_s1 + $0xb0] sm:$0xff] }
 0x1ec   : > { %2337 = vmatpush.msrb.mxu3 %v2291_v35  ;;  %v2374_v35 = vld [vmem:[%s9277_s1 + $0xc8] sm:$0xff] }
 0x1ed   : > { %2318 = vmatpush.msrb.mxu2 %v2271_v46  ;;  %v2353_v46 = vld [vmem:[%s9277_s1 + $0x20] sm:$0xff] }
 0x1ee   : > { %2338 = vmatpush.msrb.mxu3 %v2290_v38  ;;  %v7655_v38 = vld [vmem:[%s1840_s5 + $0x10] sm:$0xff]  ;;  %s9279_s5 = sld [smem:[#allocation27_spill]] }
 0x1f0   : > { %2339 = vmatpush.msrb.mxu3 %v2289_v40  ;;  %v2356_v40 = vld [vmem:[%s9277_s1 + $0x38] sm:$0xff] }
 0x1f2   : > { %2340 = vmatpush.msrb.mxu3 %v2288_v44  ;;  %v2354_v44 = vld [vmem:[%s9277_s1 + $0x28] sm:$0xff] }
 0x1f4   : > { %2341 = vmatpush.msrb.mxu3 %v2287_v47  ;;  %v2369_v47 = vld [vmem:[%s9277_s1 + $0xa0] sm:$0xff] }
 0x24d   : > { %v2095_v42 = vpop.f32.mrf.mxu2 }
 0x24e   : > { %v2096_v45 = vadd.f32 %v2095_v42, %v2073_v41  ;;  %v2372_v41 = vld [vmem:[%s9277_s1 + $0xb8] sm:$0xff]  ;;  %v2355_v42 = vld [vmem:[%s9277_s1 + $0x30] sm:$0xff] }
 0x250   : > { %v6205_v48 = vmul.f32 -1.442695, %v2096_v45  ;;  %v2370_v45 = vld [vmem:[%s9277_s1 + $0xa8] sm:$0xff] }
 0x252   : > { %6603 = vpow2.f32 %v6205_v48  ;;  %v2352_v48 = vld [vmem:[%s9277_s1 + $0x18] sm:$0xff] }
 0x254   : > { %v2144_v51 = vpop.f32.mrf.mxu3 }
 0x255   : > { %v2145_v54 = vadd.f32 %v2144_v51, %v2122_v50  ;;  %v2351_v50 = vld [vmem:[%s9277_s1 + $0x10] sm:$0xff] }
 0x256   : > { %v2367_v51 = vld [vmem:[%s9277_s1 + $0x90] sm:$0xff] }
 0x257   : > { %v6207_v57 = vmul.f32 -1.442695, %v2145_v54  ;;  %v2349_v54 = vld [vmem:[%s9277_s1] sm:$0xff]  ;;  %s6186_s1 = sshll.u32 %s7682_s3, 4 }
 0x258   : > { %v6604_v58 = vpop.eup %6603  ;;  %s7688_s8 = scalar_lea.vmem [#allocation2], %s6186_s1  ;;  %s9285_s1 = sld [smem:[#allocation32_spill]] }
 0x259   : > { %6605 = vpow2.f32 %v6207_v57  ;;  %v2101_v59 = vadd.f32 1.0, %v6604_v58 }
 0x25b   : > { %6607 = vrcp.f32 %v2101_v59  ;;  %v2113_v0 = vand.u32 2147483648, %v2101_v59  ;;  %vm2107_vm1 = vweird.f32 %v2101_v59  ;;  %v2111_v2 = vand.u32 2147483647, %v2101_v59 }
 0x25d   : > { %v2114_v8 = vor.u32 1.1754944e-38, %v2113_v0  ;;  %vm2112_vm4 = vcmp.eq.f32.partialorder %v2111_v2, 8.507059e+37  ;;  %v2489_v0 = vld [vmem:[%s9279_s5] sm:$0xff]  ;;  %v2490_v2 = vld [vmem:[%s9279_s5 + $0x8] sm:$0xff]  ;;  %s9287_s5 = sld [smem:[#allocation42_spill]] }
 0x25e   : > { %2493 = vperm.xlu2 %6602, %v2489_v0  }
 0x25f   : > { %v6606_v60 = vpop.eup %6605 }
 0x260   : > { %v2150_v61 = vadd.f32 1.0, %v6606_v60 }
 0x261   : > { %v6608_v62 = vpop.eup %6607 }
 0x262   : > { %6609 = vrcp.f32 %v2150_v61  ;;  %v2103_v63 = vmul.f32 %v6608_v62, %v2101_v59  ;;  %vm2108_vm2 = vweird.f32 %v6608_v62  ;;  %v2162_v13 = vand.u32 2147483648, %v2150_v61 }
 0x263   : > { %vm2109_vm3 = vmor %vm2107_vm1, %vm2108_vm2  ;;  %v2160_v3 = vand.u32 2147483647, %v2150_v61  ;;  %vm2156_vm7 = vweird.f32 %v2150_v61 }
 0x264   : > { %v2104_v1 = vsub.f32 1.0, %v2103_v63  ;;  %v2163_v17 = vor.u32 1.1754944e-38, %v2162_v13 }
 0x265   : > { %vm2161_vm9 = vcmp.eq.f32.partialorder %v2160_v3, 8.507059e+37 }
 0x266   : > { %v2105_v4 = vmul.f32 %v6608_v62, %v2104_v1  ;;  %2498 = vperm.xlu2 %6602, %v2490_v2  }
 0x268   : > { %v6610_v5 = vpop.eup %6609  ;;  %v2106_v10 = vadd.f32 %v6608_v62, %v2105_v4 }
 0x269   : > { %v2152_v9 = vmul.f32 %v6610_v5, %v2150_v61  ;;  %vm2157_vm6 = vweird.f32 %v6610_v5 }
 0x26a   : > { %v2110_v12 = vsel %vm2109_vm3, %v6608_v62, %v2106_v10  ;;  %vm2158_vm8 = vmor %vm2156_vm7, %vm2157_vm6  ;;  %v2427_v10 = vld [vmem:[%s9281_s7] sm:$0xff]  ;;  %s9286_s7 = sld [smem:[#allocation41_spill]]  ;;  %vm2785_vm3 = vcmask 523264  }
 0x26b   : > { %v2153_v11 = vsub.f32 1.0, %v2152_v9  ;;  %v2115_v14 = vsel %vm2112_vm4, %v2114_v8, %v2110_v12  ;;  %v3076_v12 = vld [vmem:[%s9254_s27 + $0x10] sm:$0xff] }
 0x26c   : > { %6208 = vmatmul.msk.f32.vlgmr.msra.gmra.mxu0 %vm2170_vm5, %v2115_v14  ;;  %6209 = vmatmul.msk.f32.vlgmr.msra.gmra.mxu1 %vm2170_vm5, %v2115_v14 }
 0x26d   : > { %v2154_v15 = vmul.f32 %v6610_v5, %v2153_v11  ;;  %v2930_v11 = vld [vmem:[%s9256_s24 + $0x8] sm:$0xff]  ;;  %s6895_s24 = scalar_lea.hbm %s9255_s17, 64 }
 0x26f   : > { %v2155_v16 = vadd.f32 %v6610_v5, %v2154_v15  ;;  %v3442_v15 = vld [vmem:[%s9282_s9] sm:$0xff]  ;;  %s9283_s9 = sld [smem:[#allocation26_spill]] }
 0x270   : > { %v2784_v0 = vld [vmem:[%s9286_s7 + $0x38] sm:$0xff]  ;;  %v2783_v2 = vld [vmem:[%s9286_s7 + $0x30] sm:$0xff] }
 0x271   : > { %v2159_v18 = vsel %vm2158_vm8, %v6610_v5, %v2155_v16 }
 0x272   : > { %v2164_v21 = vsel %vm2161_vm9, %v2163_v17, %v2159_v18 }
 0x273   : > { %6210 = vmatmul.msk.f32.vlgmr.msra.gmra.mxu2 %vm2170_vm5, %v2164_v21  ;;  %6211 = vmatmul.msk.f32.vlgmr.msra.gmra.mxu3 %vm2170_vm5, %v2164_v21  ;;  %v3513_v21 = vld [vmem:[%s9257_s20 + $0x20] sm:$0xff] }
 0x274   : > { %2381 = vmatpush.msra.mxu2 %v2364_v19  ;;  %2404 = vmatpush.msra.mxu3 %v2380_v20  ;;  %v3510_v19 = vld [vmem:[%s9257_s20 + $0x8] sm:$0xff]  ;;  %v3784_v20 = vld [vmem:[%s7298_s30 + $0x10] sm:$0xff] }
 0x276   : > { %2382 = vmatpush.msra.mxu2 %v2363_v22  ;;  %2405 = vmatpush.msra.mxu3 %v2379_v23  ;;  %v3787_v22 = vld [vmem:[%s7298_s30 + $0x28] sm:$0xff]  ;;  %v3516_v23 = vld [vmem:[%s9257_s20 + $0x38] sm:$0xff] }
 0x278   : > { %2383 = vmatpush.msra.mxu2 %v2362_v24  ;;  %2406 = vmatpush.msra.mxu3 %v2378_v25  ;;  %v4486_v24 = vld [vmem:[%s9259_s12] sm:$0xff]  ;;  %v5016_v25 = vld [vmem:[%s9258_s14 + $0x8] sm:$0xff] }
 0x27a   : > { %2384 = vmatpush.msra.mxu2 %v2361_v26  ;;  %2407 = vmatpush.msra.mxu3 %v2377_v27  ;;  %v4489_v26 = vld [vmem:[%s9259_s12 + $0x18] sm:$0xff]  ;;  %v5019_v27 = vld [vmem:[%s9258_s14 + $0x20] sm:$0xff] }
 0x27b   : > { %2319 = vmatmul.f32.vlgmr.msrb.gmra.mxu2 %v7641_v28  ;;  %2342 = vmatmul.f32.vlgmr.msrb.gmra.mxu3 %v7643_v29 }
 0x27c   : > { %2385 = vmatpush.msra.mxu2 %v2360_v30  ;;  %2408 = vmatpush.msra.mxu3 %v2376_v31  ;;  %v4492_v30 = vld [vmem:[%s9259_s12 + $0x30] sm:$0xff]  ;;  %v5022_v31 = vld [vmem:[%s9258_s14 + $0x38] sm:$0xff] }
 0x27e   : > { %2386 = vmatpush.msra.mxu2 %v2359_v32  ;;  %2409 = vmatpush.msra.mxu3 %v2375_v33  ;;  %v4495_v32 = vld [vmem:[%s9259_s12 + $0x48] sm:$0xff]  ;;  %v5025_v33 = vld [vmem:[%s9258_s14 + $0x50] sm:$0xff] }
 0x280   : > { %2387 = vmatpush.msra.mxu2 %v2358_v34  ;;  %2410 = vmatpush.msra.mxu3 %v2374_v35  ;;  %v2432_v34 = vpop.permute.xlu1 %2431 }
 0x282   : > { %2388 = vmatpush.msra.mxu2 %v2357_v36  ;;  %2411 = vmatpush.msra.mxu3 %v2373_v37 }
 0x283   : > { %2322 = vmatmul.f32.gmra.mxu2 %v7655_v38  ;;  %2345 = vmatmul.f32.gmra.mxu3 %v7657_v39 }
 0x284   : > { %2389 = vmatpush.msra.mxu2 %v2356_v40  ;;  %2412 = vmatpush.msra.mxu3 %v2372_v41  ;;  %v4498_v41 = vld [vmem:[%s9259_s12 + $0x60] sm:$0xff] }
 0x286   : > { %2390 = vmatpush.msra.mxu2 %v2355_v42  ;;  %2413 = vmatpush.msra.mxu3 %v2371_v43 }
 0x288   : > { %2391 = vmatpush.msra.mxu2 %v2354_v44  ;;  %2414 = vmatpush.msra.mxu3 %v2370_v45  ;;  %v2487_v45 = vld [vmem:[%s9283_s9] sm:$0xff] }
 0x28a   : > { %2392 = vmatpush.msra.mxu2 %v2353_v46  ;;  %2415 = vmatpush.msra.mxu3 %v2369_v47  ;;  %v5028_v46 = vld [vmem:[%s9258_s14 + $0x68] sm:$0xff] }
 0x28b   : > { %v2488_v47 = vld [vmem:[%s9283_s9 + $0x8] sm:$0xff]  ;;  %s9294_s9 = sld [smem:[#allocation51_spill]] }
 0x28c   : > { %2393 = vmatpush.msra.mxu2 %v2352_v48  ;;  %2416 = vmatpush.msra.mxu3 %v2368_v49  ;;  %v4501_v48 = vld [vmem:[%s9259_s12 + $0x78] sm:$0xff]  ;;  %s6475_s12 = sshll.u32 %s7504_s18, 6 }
 0x28e   : > { %2394 = vmatpush.msra.mxu2 %v2351_v50  ;;  %2417 = vmatpush.msra.mxu3 %v2367_v51 }
 0x290   : > { %2395 = vmatpush.msra.mxu2 %v2350_v52  ;;  %2418 = vmatpush.msra.mxu3 %v2366_v53 }
 0x292   : > { %2396 = vmatpush.msra.mxu2 %v2349_v54  ;;  %2419 = vmatpush.msra.mxu3 %v2365_v55 }
 0x293   : > { %2397 = vmatmul.f32.vlgmr.msra.gmra.mxu2 %v7641_v28  ;;  %2420 = vmatmul.f32.vlgmr.msra.gmra.mxu3 %v7643_v29 }
 0x29b   : > { %2400 = vmatmul.f32.gmra.mxu2 %v7655_v38  ;;  %2423 = vmatmul.f32.gmra.mxu3 %v7657_v39 }
 0x2e9   : > { %v2191_v56 = vpop.f32.mrf.mxu0  ;;  %v2211_v57 = vpop.f32.mrf.mxu1 }
 0x2ea   : > { %v2261_v58 = vmul.f32 %v2191_v56, %v7527_v6  ;;  %v2262_v59 = vmul.f32 %v2211_v57, %v7529_v7  ;;  %v2865_v7 = vld [vmem:[%s9280_s4] sm:$0xff]  ;;  %s9284_s4 = sld [smem:[#allocation28_spill]] }
 0x2eb   : > { %2868 = vperm.xlu2 %6602, %v2865_v7   ;;  %v2833_v7 = vld [vmem:[%s9287_s5 + $0x30] sm:$0xff] }
 0x2f0   : > { %v2568_v56 = vld [vmem:[%s9284_s4] sm:$0xff]  ;;  %v2569_v57 = vld [vmem:[%s9284_s4 + $0x8] sm:$0xff]  ;;  %s9290_s4 = sshll.u32 %s7504_s18, 5 }
 0x2f3   : > { %2940 = vperm.xlu2 %6602, %v2930_v11  }
 0x2f6   : > { %v2238_v60 = vpop.f32.mrf.mxu2  ;;  %v2258_v61 = vpop.f32.mrf.mxu3 }
 0x2f7   : > { %v2263_v62 = vmul.f32 %v2261_v58, %v2238_v60  ;;  %v2264_v63 = vmul.f32 %v2262_v59, %v2258_v61  ;;  %v2651_v58 = vld [vmem:[%s9285_s1 + $0x10] sm:$0xff]  ;;  %v2652_v59 = vld [vmem:[%s9285_s1 + $0x18] sm:$0xff]  ;;  %v2494_v60 = vpop.permute.xlu2 %2493  ;;  %v2649_v61 = vld [vmem:[%s9285_s1] sm:$0xff] }
 0x2f9   : > { %2265 = vst [vmem:[%s7688_s8] sm:$0xff] %v2263_v62  ;;  %v2650_v62 = vld [vmem:[%s9285_s1 + $0x8] sm:$0xff]  ;;  %s9288_s1 = sld [smem:[#allocation33_spill]] }
 0x2fa   : > { %2266 = vst [vmem:[%s7688_s8 + $0x8] sm:$0xff] %v2264_v63 }
 0x2fb   : > { %3090 = vperm.xlu2 %6602, %v3076_v12  }
 0x2fe   : > { %v2320_v1 = vpop.f32.mrf.mxu2  ;;  %v2343_v6 = vpop.f32.mrf.mxu3 }
 0x2ff   : > { %v2344_v9 = vadd.f32 %v2343_v6, %v2320_v1  ;;  %v2834_v1 = vld [vmem:[%s9287_s5 + $0x38] sm:$0xff]  ;;  %v2499_v11 = vpop.permute.xlu2 %2498 }
 0x303   : > { %3445 = vperm.xlu2 %6602, %v3442_v15  }
 0x306   : > { %v2323_v4 = vpop.f32.mrf.mxu2  ;;  %v2346_v5 = vpop.f32.mrf.mxu3 }
 0x307   : > { %v2347_v8 = vadd.f32 %v2346_v5, %v2323_v4  ;;  %v2782_v5 = vld [vmem:[%s9286_s7 + $0x28] sm:$0xff] }
 0x309   : > { %2451 = vmatpush.msrb.mxu0 %v2347_v8  ;;  %v2832_v8 = vld [vmem:[%s9287_s5 + $0x28] sm:$0xff] }
 0x30b   : > { %2452 = vmatpush.msrb.mxu0 %v2344_v9  ;;  %3524 = vperm.xlu2 %6602, %v3510_v19   ;;  %v2781_v9 = vld [vmem:[%s9286_s7 + $0x20] sm:$0xff] }
 0x30c   : > { %6212 = vmatmul.msk.f32.vlgmr.msrb.gmra.mxu0 %vm2170_vm5, %v2427_v10 }
 0x30d   : > { %2673 = vmatpush.msra.mxu0 %v2651_v58 }
 0x30f   : > { %2674 = vmatpush.msra.mxu0 %v2649_v61 }
 0x311   : > { %2806 = vmatpush.msrb.mxu0 %v2784_v0 }
 0x313   : > { %3802 = vperm.xlu2 %6602, %v3784_v20   ;;  %2807 = vmatpush.msrb.mxu0 %v2783_v2  ;;  %v2778_v20 = vld [vmem:[%s9286_s7 + $0x8] sm:$0xff] }
 0x315   : > { %2808 = vmatpush.msrb.mxu0 %v2782_v5 }
 0x316   : > { %v2398_v13 = vpop.f32.mrf.mxu2  ;;  %v2421_v14 = vpop.f32.mrf.mxu3 }
 0x317   : > { %v2422_v17 = vadd.f32 %v2421_v14, %v2398_v13  ;;  %2809 = vmatpush.msrb.mxu0 %v2781_v9  ;;  %v2780_v13 = vld [vmem:[%s9286_s7 + $0x18] sm:$0xff] }
 0x318   : > { %v2830_v14 = vld [vmem:[%s9287_s5 + $0x18] sm:$0xff] }
 0x319   : > { %2810 = vmatpush.msrb.mxu0 %v2780_v13 }
 0x31b   : > { %3539 = vperm.xlu2 %6602, %v3513_v21   ;;  %v2828_v21 = vld [vmem:[%s9287_s5 + $0x8] sm:$0xff] }
 0x31e   : > { %v2401_v3 = vpop.f32.mrf.mxu2  ;;  %v2424_v16 = vpop.f32.mrf.mxu3 }
 0x31f   : > { %v2425_v18 = vadd.f32 %v2424_v16, %v2401_v3  ;;  %v2779_v3 = vld [vmem:[%s9286_s7 + $0x10] sm:$0xff] }
 0x320   : > { %v2829_v16 = vld [vmem:[%s9287_s5 + $0x10] sm:$0xff]  ;;  %2811 = vmatpush.msrb.mxu0 %v2779_v3 }
 0x321   : > { %2471 = vmatpush.msrb.mxu1 %v2425_v18 }
 0x322   : > { %2812 = vmatpush.msrb.mxu0 %v2778_v20 }
 0x323   : > { %2472 = vmatpush.msrb.mxu1 %v2422_v17  ;;  %3817 = vperm.xlu2 %6602, %v3787_v22   ;;  %v2777_v22 = vld [vmem:[%s9286_s7] sm:$0xff]  ;;  %s9293_s7 = sld [smem:[#allocation39_spill]] }
 0x324   : > { %6213 = vmatmul.msk.f32.vlgmr.msrb.gmra.mxu1 %vm2170_vm5, %v2427_v10  ;;  %v2831_v10 = vld [vmem:[%s9287_s5 + $0x20] sm:$0xff]  ;;  %2813 = vmatpush.msrb.mxu0 %v2777_v22 }
 0x325   : > { %2696 = vmatpush.msra.mxu1 %v2652_v59 }
 0x327   : > { %2697 = vmatpush.msra.mxu1 %v2650_v62 }
 0x329   : > { %2843 = vmatpush.msrb.mxu1 %v2834_v1 }
 0x32b   : > { %3554 = vperm.xlu2 %6602, %v3516_v23   ;;  %2844 = vmatpush.msrb.mxu1 %v2833_v7  ;;  %v2827_v23 = vld [vmem:[%s9287_s5] sm:$0xff] }
 0x32d   : > { %2845 = vmatpush.msrb.mxu1 %v2832_v8 }
 0x32f   : > { %2846 = vmatpush.msrb.mxu1 %v2831_v10 }
 0x331   : > { %2847 = vmatpush.msrb.mxu1 %v2830_v14 }
 0x333   : > { %4504 = vperm.xlu2 %6602, %v4486_v24   ;;  %2848 = vmatpush.msrb.mxu1 %v2829_v16  ;;  %v2707_v24 = vld [vmem:[%s9288_s1 + $0x10] sm:$0xff] }
 0x335   : > { %2849 = vmatpush.msrb.mxu1 %v2828_v21 }
 0x337   : > { %2850 = vmatpush.msrb.mxu1 %v2827_v23 }
 0x33b   : > { %5038 = vperm.xlu2 %6602, %v5016_v25   ;;  %v2708_v25 = vld [vmem:[%s9288_s1 + $0x18] sm:$0xff] }
 0x343   : > { %4519 = vperm.xlu2 %6602, %v4489_v26   ;;  %v2705_v26 = vld [vmem:[%s9288_s1] sm:$0xff] }
 0x34b   : > { %5053 = vperm.xlu2 %6602, %v5019_v27   ;;  %v2706_v27 = vld [vmem:[%s9288_s1 + $0x8] sm:$0xff]  ;;  %s9289_s1 = sld [smem:[#allocation34_spill]] }
 0x351   : > { %s7755_s5 = scalar_lea.vmem %s9289_s1, %s9290_s4  ;;  %s9176_s4 = sshll.u32 %s7682_s3, 5 }
 0x352   : > { %v7758_v2 = vld [vmem:[%s7755_s5] sm:$0xff]  ;;  %v7765_v14 = vld [vmem:[%s7755_s5 + $0x8] sm:$0xff]  ;;  %v7774_v23 = vld [vmem:[%s7755_s5 + $0x10] sm:$0xff]  ;;  %s9291_s1 = sld [smem:[#allocation35_spill]] }
 0x353   : > { %4534 = vperm.xlu2 %6602, %v4492_v30  }
 0x35b   : > { %5068 = vperm.xlu2 %6602, %v5022_v31  }
 0x363   : > { %4549 = vperm.xlu2 %6602, %v4495_v32  }
 0x36b   : > { %5083 = vperm.xlu2 %6602, %v5025_v33  }
 0x373   : > { %4564 = vperm.xlu2 %6602, %v4498_v41  }
 0x37b   : > { %5098 = vperm.xlu2 %6602, %v5028_v46  }
 0x383   : > { %4579 = vperm.xlu2 %6602, %v4501_v48  }
 0x389   : > { %v2454_v35 = vpop.f32.mrf.mxu0 }
 0x38a   : > { %v2455_v36 = vadd.f32 %v2454_v35, %v2432_v34  ;;  %v2575_v35 = vpop.permute.xlu0 %2574 }
 0x38c   : > { %v2477_v37 = vadd.f32 3.0, %v2455_v36 }
 0x38e   : > { %v2478_v40 = vmax.f32 %v2477_v37, 0.0 }
 0x390   : > { %v2479_v42 = vmin.f32 %v2478_v40, 6.0 }
 0x392   : > { %v2480_v43 = vmul.f32 %v2479_v42, %v2455_v36 }
 0x394   : > { %v2481_v44 = vmul.f32 0.16666667, %v2480_v43 }
 0x396   : > { %2522 = vmatpush.msrb.mxu2 %v2481_v44 }
 0x397   : > { %6214 = vmatmul.msk.f32.vlgmr.msrb.gmra.mxu2 %vm2014_vm0, %v2487_v45 }
 0x398   : > { %2729 = vmatpush.msra.mxu2 %v2707_v24 }
 0x39a   : > { %2730 = vmatpush.msra.mxu2 %v2705_v26 }
 0x39f   : > { %6215 = vmatmul.msk.f32.gmra.mxu2 %vm2014_vm0, %v2488_v47 }
 0x3a1   : > { %v2474_v49 = vpop.f32.mrf.mxu1 }
 0x3a2   : > { %v2475_v50 = vadd.f32 %v2474_v49, %v2432_v34 }
 0x3a4   : > { %v2482_v51 = vadd.f32 3.0, %v2475_v50 }
 0x3a6   : > { %v2483_v52 = vmax.f32 %v2482_v51, 0.0  ;;  %v2580_v51 = vpop.permute.xlu1 %2579 }
 0x3a8   : > { %v2484_v53 = vmin.f32 %v2483_v52, 6.0 }
 0x3aa   : > { %v2485_v54 = vmul.f32 %v2484_v53, %v2475_v50 }
 0x3ac   : > { %v2486_v55 = vmul.f32 0.16666667, %v2485_v54 }
 0x3ae   : > { %2603 = vmatpush.msrb.mxu3 %v2486_v55 }
 0x3af   : > { %6218 = vmatmul.msk.f32.vlgmr.msrb.gmra.mxu3 %vm2014_vm0, %v2568_v56 }
 0x3b0   : > { %2752 = vmatpush.msra.mxu3 %v2708_v25  ;;  %v7783_v25 = vld [vmem:[%s7755_s5 + $0x18] sm:$0xff]  ;;  %s7794_s5 = scalar_lea.vmem [#allocation4], %s9176_s4  ;;  %s9292_s4 = sld [smem:[#allocation37_spill]] }
 0x3b2   : > { %2753 = vmatpush.msra.mxu3 %v2706_v27 }
 0x3b7   : > { %6219 = vmatmul.msk.f32.gmra.mxu3 %vm2014_vm0, %v2569_v57 }
 0x41a   : > { %v2524_v63 = vpop.f32.mrf.mxu2 }
 0x41b   : > { %v2525_v6 = vadd.f32 %v2524_v63, %v2494_v60 }
 0x41d   : > { %v6216_v4 = vmul.f32 -1.442695, %v2525_v6 }
 0x41f   : > { %6611 = vpow2.f32 %v6216_v4 }
 0x422   : > { %v2527_v12 = vpop.f32.mrf.mxu2 }
 0x423   : > { %v2528_v15 = vadd.f32 %v2527_v12, %v2499_v11 }
 0x425   : > { %v6612_v17 = vpop.eup %6611  ;;  %v6217_v18 = vmul.f32 -1.442695, %v2528_v15 }
 0x426   : > { %v2536_v19 = vadd.f32 1.0, %v6612_v17 }
 0x427   : > { %6613 = vpow2.f32 %v6217_v18 }
 0x428   : > { %6615 = vrcp.f32 %v2536_v19  ;;  %v2549_v37 = vand.u32 2147483648, %v2536_v19  ;;  %v2547_v42 = vand.u32 2147483647, %v2536_v19  ;;  %vm2543_vm11 = vweird.f32 %v2536_v19 }
 0x42a   : > { %v2550_v46 = vor.u32 1.1754944e-38, %v2549_v37  ;;  %vm2548_vm13 = vcmp.eq.f32.partialorder %v2547_v42, 8.507059e+37 }
 0x42d   : > { %v6614_v30 = vpop.eup %6613 }
 0x42e   : > { %v6616_v31 = vpop.eup %6615  ;;  %v2537_v32 = vadd.f32 1.0, %v6614_v30 }
 0x42f   : > { %v2539_v33 = vmul.f32 %v6616_v31, %v2536_v19  ;;  %vm2544_vm10 = vweird.f32 %v6616_v31 }
 0x430   : > { %6617 = vrcp.f32 %v2537_v32  ;;  %vm2545_vm12 = vmor %vm2543_vm11, %vm2544_vm10  ;;  %v2564_v53 = vand.u32 2147483648, %v2537_v32  ;;  %v2562_v56 = vand.u32 2147483647, %v2537_v32  ;;  %vm2558_vm15 = vweird.f32 %v2537_v32 }
 0x431   : > { %v2540_v34 = vsub.f32 1.0, %v2539_v33 }
 0x432   : > { %v2605_v36 = vpop.f32.mrf.mxu3  ;;  %v2565_v61 = vor.u32 1.1754944e-38, %v2564_v53  ;;  %vm2563_vm2 = vcmp.eq.f32.partialorder %v2562_v56, 8.507059e+37 }
 0x433   : > { %v2606_v40 = vadd.f32 %v2605_v36, %v2575_v35  ;;  %v2541_v41 = vmul.f32 %v6616_v31, %v2540_v34 }
 0x435   : > { %v6220_v43 = vmul.f32 -1.442695, %v2606_v40  ;;  %v2542_v44 = vadd.f32 %v6616_v31, %v2541_v41 }
 0x436   : > { %v6618_v45 = vpop.eup %6617 }
 0x437   : > { %6619 = vpow2.f32 %v6220_v43  ;;  %v2546_v47 = vsel %vm2545_vm12, %v6616_v31, %v2542_v44  ;;  %v2554_v48 = vmul.f32 %v6618_v45, %v2537_v32  ;;  %vm2559_vm14 = vweird.f32 %v6618_v45 }
 0x438   : > { %v2551_v49 = vsel %vm2548_vm13, %v2550_v46, %v2546_v47  ;;  %vm2560_vm1 = vmor %vm2558_vm15, %vm2559_vm14 }
 0x439   : > { %6222 = vmatmul.msk.f32.vlgmr.msra.gmra.mxu0 %vm2170_vm5, %v2551_v49  ;;  %6224 = vmatmul.msk.f32.vlgmr.msra.gmra.mxu1 %vm2170_vm5, %v2551_v49  ;;  %v2555_v50 = vsub.f32 1.0, %v2554_v48 }
 0x43a   : > { %v2608_v52 = vpop.f32.mrf.mxu3 }
 0x43b   : > { %v2609_v54 = vadd.f32 %v2608_v52, %v2580_v51  ;;  %v2556_v55 = vmul.f32 %v6618_v45, %v2555_v50  ;;  %v2864_v52 = vld [vmem:[%s9291_s1] sm:$0xff]  ;;  %s9296_s1 = sld [smem:[#allocation45_spill]] }
 0x43d   : > { %v6620_v57 = vpop.eup %6619  ;;  %v6221_v58 = vmul.f32 -1.442695, %v2609_v54  ;;  %v2557_v59 = vadd.f32 %v6618_v45, %v2556_v55 }
 0x43e   : > { %v2617_v60 = vadd.f32 1.0, %v6620_v57 }
 0x43f   : > { %6621 = vpow2.f32 %v6221_v58  ;;  %v2561_v62 = vsel %vm2560_vm1, %v6618_v45, %v2557_v59 }
 0x440   : > { %6623 = vrcp.f32 %v2617_v60  ;;  %v2566_v63 = vsel %vm2563_vm2, %v2565_v61, %v2561_v62  ;;  %v2630_v5 = vand.u32 2147483648, %v2617_v60  ;;  %v2628_v9 = vand.u32 2147483647, %v2617_v60 }
 0x441   : > { %6223 = vmatmul.msk.f32.gmra.mxu0 %vm2170_vm5, %v2566_v63  ;;  %6225 = vmatmul.msk.f32.gmra.mxu1 %vm2170_vm5, %v2566_v63  ;;  %vm2624_vm6 = vweird.f32 %v2617_v60  ;;  %s7837_s13 = scalar_lea.vmem %s9296_s1, %s6475_s12  ;;  %s9297_s12 = sld [smem:[#allocation43_spill]] }
 0x442   : > { %v2631_v12 = vor.u32 1.1754944e-38, %v2630_v5  ;;  %vm2629_vm8 = vcmp.eq.f32.partialorder %v2628_v9, 8.507059e+37  ;;  %v3399_v5 = vld [vmem:[%s9295_s10 + $0x38] sm:$0xff]  ;;  %v3398_v9 = vld [vmem:[%s9295_s10 + $0x30] sm:$0xff]  ;;  %s9298_s1 = sld [smem:[#allocation44_spill]] }
 0x445   : > { %v6622_v0 = vpop.eup %6621 }
 0x446   : > { %v6624_v1 = vpop.eup %6623  ;;  %v2618_v6 = vadd.f32 1.0, %v6622_v0 }
 0x447   : > { %v2620_v7 = vmul.f32 %v6624_v1, %v2617_v60  ;;  %vm2625_vm4 = vweird.f32 %v6624_v1 }
 0x448   : > { %6625 = vrcp.f32 %v2618_v6  ;;  %vm2626_vm7 = vmor %vm2624_vm6, %vm2625_vm4  ;;  %v2645_v17 = vand.u32 2147483648, %v2618_v6  ;;  %v2643_v19 = vand.u32 2147483647, %v2618_v6  ;;  %vm2639_vm10 = vweird.f32 %v2618_v6 }
 0x449   : > { %6230 = vmatmul.msk.f32.vlgmr.msrb.gmra.mxu0 %vm2785_vm3, %v7758_v2  ;;  %6234 = vmatmul.msk.f32.vlgmr.msrb.gmra.mxu1 %vm2785_vm3, %v7758_v2  ;;  %v2621_v4 = vsub.f32 1.0, %v2620_v7  ;;  %v3070_v7 = vld [vmem:[%s9293_s7] sm:$0xff] }
 0x44a   : > { %v2646_v21 = vor.u32 1.1754944e-38, %v2645_v17  ;;  %vm2644_vm12 = vcmp.eq.f32.partialorder %v2643_v19, 8.507059e+37  ;;  %v3395_v17 = vld [vmem:[%s9295_s10 + $0x18] sm:$0xff]  ;;  %v3394_v19 = vld [vmem:[%s9295_s10 + $0x10] sm:$0xff] }
 0x44b   : > { %v2622_v8 = vmul.f32 %v6624_v1, %v2621_v4  ;;  %v3326_v4 = vld [vmem:[%s9294_s9 + $0x38] sm:$0xff] }
 0x44d   : > { %v2623_v10 = vadd.f32 %v6624_v1, %v2622_v8  ;;  %v3325_v8 = vld [vmem:[%s9294_s9 + $0x30] sm:$0xff] }
 0x44e   : > { %v6626_v11 = vpop.eup %6625 }
 0x44f   : > { %v2627_v13 = vsel %vm2626_vm7, %v6624_v1, %v2623_v10  ;;  %v2635_v15 = vmul.f32 %v6626_v11, %v2618_v6  ;;  %vm2640_vm9 = vweird.f32 %v6626_v11  ;;  %v2925_v6 = vld [vmem:[%s9292_s4] sm:$0xff]  ;;  %v3324_v10 = vld [vmem:[%s9294_s9 + $0x28] sm:$0xff] }
 0x450   : > { %v2632_v3 = vsel %vm2629_vm8, %v2631_v12, %v2627_v13  ;;  %vm2641_vm11 = vmor %vm2639_vm10, %vm2640_vm9  ;;  %v3323_v12 = vld [vmem:[%s9294_s9 + $0x20] sm:$0xff] }
 0x451   : > { %6226 = vmatmul.msk.f32.vlgmr.msra.gmra.mxu2 %vm2170_vm5, %v2632_v3  ;;  %6228 = vmatmul.msk.f32.vlgmr.msra.gmra.mxu3 %vm2170_vm5, %v2632_v3  ;;  %v2636_v16 = vsub.f32 1.0, %v2635_v15  ;;  %v3396_v13 = vld [vmem:[%s9295_s10 + $0x20] sm:$0xff]  ;;  %v2926_v15 = vld [vmem:[%s9292_s4 + $0x8] sm:$0xff] }
 0x452   : > { %6231 = vmatmul.msk.f32.gmra.mxu0 %vm2785_vm3, %v7765_v14  ;;  %6235 = vmatmul.msk.f32.gmra.mxu1 %vm2785_vm3, %v7765_v14  ;;  %v3071_v3 = vld [vmem:[%s9293_s7 + $0x8] sm:$0xff] }
 0x453   : > { %v2637_v18 = vmul.f32 %v6626_v11, %v2636_v16  ;;  %v3322_v16 = vld [vmem:[%s9294_s9 + $0x18] sm:$0xff] }
 0x455   : > { %v2638_v20 = vadd.f32 %v6626_v11, %v2637_v18  ;;  %v3321_v18 = vld [vmem:[%s9294_s9 + $0x10] sm:$0xff] }
 0x457   : > { %v2642_v22 = vsel %vm2641_vm11, %v6626_v11, %v2638_v20  ;;  %v3397_v11 = vld [vmem:[%s9295_s10 + $0x28] sm:$0xff] }
 0x458   : > { %v2647_v24 = vsel %vm2644_vm12, %v2646_v21, %v2642_v22  ;;  %v3320_v20 = vld [vmem:[%s9294_s9 + $0x8] sm:$0xff]  ;;  %v3319_v22 = vld [vmem:[%s9294_s9] sm:$0xff]  ;;  %s9304_s9 = sld [smem:[#allocation63_spill]] }
 0x459   : > { %6227 = vmatmul.msk.f32.gmra.mxu2 %vm2170_vm5, %v2647_v24  ;;  %6229 = vmatmul.msk.f32.gmra.mxu3 %vm2170_vm5, %v2647_v24  ;;  %vm2871_vm5 = vcmask 261120   ;;  %v3393_v21 = vld [vmem:[%s9295_s10 + $0x8] sm:$0xff]  ;;  %v3392_v24 = vld [vmem:[%s9295_s10] sm:$0xff]  ;;  %s9305_s10 = sld [smem:[#allocation55_spill]] }
 0x45a   : > { %6232 = vmatmul.msk.f32.gmra.mxu0 %vm2785_vm3, %v7774_v23  ;;  %6236 = vmatmul.msk.f32.gmra.mxu1 %vm2785_vm3, %v7774_v23 }
 0x462   : > { %6233 = vmatmul.msk.f32.gmra.mxu0 %vm2785_vm3, %v7783_v25  ;;  %6237 = vmatmul.msk.f32.gmra.mxu1 %vm2785_vm3, %v7783_v25 }
 0x4b6   : > { %v2676_v26 = vpop.f32.mrf.mxu0  ;;  %v2699_v27 = vpop.f32.mrf.mxu1 }
 0x4b7   : > { %v2761_v36 = vmul.f32 %v2676_v26, %v7641_v28  ;;  %v2762_v37 = vmul.f32 %v2699_v27, %v7643_v29  ;;  %v2927_v26 = vld [vmem:[%s9292_s4 + $0x10] sm:$0xff] }
 0x4b8   : > { %v3072_v27 = vld [vmem:[%s9293_s7 + $0x10] sm:$0xff] }
 0x4be   : > { %v2679_v30 = vpop.f32.mrf.mxu0  ;;  %v2702_v31 = vpop.f32.mrf.mxu1 }
 0x4bf   : > { %v2763_v46 = vmul.f32 %v2679_v30, %v7655_v38  ;;  %v2764_v28 = vmul.f32 %v2702_v31, %v7657_v39  ;;  %v2869_v38 = vpop.permute.xlu2 %2868  ;;  %v2928_v30 = vld [vmem:[%s9292_s4 + $0x18] sm:$0xff] }
 0x4c0   : > { %v3073_v31 = vld [vmem:[%s9293_s7 + $0x18] sm:$0xff]  ;;  %s9303_s7 = sld [smem:[#allocation62_spill]] }
 0x4c6   : > { %v2815_v32 = vpop.f32.mrf.mxu0  ;;  %v2852_v33 = vpop.f32.mrf.mxu1 }
 0x4cf   : > { %v2818_v34 = vpop.f32.mrf.mxu0  ;;  %v2855_v35 = vpop.f32.mrf.mxu1 }
 0x4d4   : > { %v2732_v40 = vpop.f32.mrf.mxu2  ;;  %v2755_v41 = vpop.f32.mrf.mxu3 }
 0x4d5   : > { %v2765_v42 = vmul.f32 %v2761_v36, %v2732_v40  ;;  %v2766_v43 = vmul.f32 %v2762_v37, %v2755_v41  ;;  %v3315_v36 = vld [vmem:[%s7837_s13 + $0x20] sm:$0xff]  ;;  %v3316_v37 = vld [vmem:[%s7837_s13 + $0x28] sm:$0xff]  ;;  %v3317_v40 = vld [vmem:[%s7837_s13 + $0x30] sm:$0xff] }
 0x4d6   : > { %v3318_v41 = vld [vmem:[%s7837_s13 + $0x38] sm:$0xff] }
 0x4d7   : > { %2769 = vst [vmem:[%s7794_s5] sm:$0xff] %v2765_v42  ;;  %v2821_v44 = vpop.f32.mrf.mxu0  ;;  %v2858_v45 = vpop.f32.mrf.mxu1 }
 0x4d8   : > { %2770 = vst [vmem:[%s7794_s5 + $0x8] sm:$0xff] %v2766_v43  ;;  %v2936_v42 = vpop.permute.xlu0 %2935  ;;  %v3081_v43 = vpop.permute.xlu1 %3080 }
 0x4dc   : > { %v2735_v29 = vpop.f32.mrf.mxu2  ;;  %v2758_v47 = vpop.f32.mrf.mxu3 }
 0x4dd   : > { %v2767_v48 = vmul.f32 %v2763_v46, %v2735_v29  ;;  %v2768_v49 = vmul.f32 %v2764_v28, %v2758_v47  ;;  %v3215_v46 = vld [vmem:[%s9297_s12] sm:$0xff]  ;;  %s9299_s12 = sld [smem:[#allocation46_spill]] }
 0x4de   : > { %v3257_v28 = vld [vmem:[%s9298_s1] sm:$0xff]  ;;  %3243 = vmatpush.msra.mxu0 %v3215_v46  ;;  %s9300_s1 = sshll.u32 %s7682_s3, 5 }
 0x4df   : > { %2771 = vst [vmem:[%s7794_s5 + $0x10] sm:$0xff] %v2767_v48  ;;  %v2824_v50 = vpop.f32.mrf.mxu0  ;;  %v2861_v51 = vpop.f32.mrf.mxu1  ;;  %3285 = vmatpush.msra.mxu1 %v3257_v28  ;;  %s7936_s4 = scalar_lea.vmem [#allocation6], %s9300_s1  ;;  %s9302_s1 = sld [smem:[#allocation50_spill]] }
 0x4e0   : > { %2772 = vst [vmem:[%s7794_s5 + $0x18] sm:$0xff] %v2768_v49  ;;  %2887 = vmatpush.msrb.mxu2 %v2824_v50  ;;  %2907 = vmatpush.msrb.mxu3 %v2861_v51  ;;  %v2941_v50 = vpop.permute.xlu2 %2940  ;;  %v3086_v51 = vpop.permute.xlu0 %3085 }
 0x4e2   : > { %2888 = vmatpush.msrb.mxu2 %v2821_v44  ;;  %2908 = vmatpush.msrb.mxu3 %v2858_v45 }
 0x4e4   : > { %2889 = vmatpush.msrb.mxu2 %v2818_v34  ;;  %2909 = vmatpush.msrb.mxu3 %v2855_v35  ;;  %v3313_v34 = vld [vmem:[%s7837_s13 + $0x10] sm:$0xff]  ;;  %v3314_v35 = vld [vmem:[%s7837_s13 + $0x18] sm:$0xff] }
 0x4e6   : > { %2890 = vmatpush.msrb.mxu2 %v2815_v32  ;;  %2910 = vmatpush.msrb.mxu3 %v2852_v33  ;;  %v3311_v32 = vld [vmem:[%s7837_s13] sm:$0xff]  ;;  %v3312_v33 = vld [vmem:[%s7837_s13 + $0x8] sm:$0xff] }
 0x4e7   : > { %6238 = vmatmul.msk.f32.vlgmr.msrb.gmra.mxu2 %vm2871_vm5, %v2864_v52  ;;  %6239 = vmatmul.msk.f32.vlgmr.msrb.gmra.mxu3 %vm2871_vm5, %v2864_v52 }
 0x56a   : > { %v2892_v39 = vpop.f32.mrf.mxu2  ;;  %v2912_v53 = vpop.f32.mrf.mxu3 }
 0x56b   : > { %v2893_v54 = vadd.f32 %v2892_v39, %v2869_v38  ;;  %v2913_v55 = vadd.f32 %v2912_v53, %v2869_v38 }
 0x56d   : > { %v2915_v56 = vadd.f32 3.0, %v2893_v54  ;;  %v2920_v57 = vadd.f32 3.0, %v2913_v55 }
 0x56f   : > { %v2916_v58 = vmax.f32 %v2915_v56, 0.0  ;;  %v2921_v59 = vmax.f32 %v2920_v57, 0.0 }
 0x571   : > { %v2917_v60 = vmin.f32 %v2916_v58, 6.0  ;;  %v2922_v61 = vmin.f32 %v2921_v59, 6.0  ;;  %v2946_v59 = vpop.permute.xlu1 %2945 }
 0x573   : > { %v2918_v62 = vmul.f32 %v2917_v60, %v2893_v54  ;;  %v2923_v63 = vmul.f32 %v2922_v61, %v2913_v55  ;;  %v3091_v61 = vpop.permute.xlu2 %3090 }
 0x575   : > { %v2919_v0 = vmul.f32 0.16666667, %v2918_v62  ;;  %v2924_v1 = vmul.f32 0.16666667, %v2923_v63 }
 0x577   : > { %2980 = vmatpush.msra.mxu2 %v2919_v0  ;;  %3125 = vmatpush.msra.mxu3 %v2924_v1 }
 0x578   : > { %6240 = vmatmul.msk.f32.vlgmr.msra.gmra.mxu2 %vm2014_vm0, %v2925_v6  ;;  %6248 = vmatmul.msk.f32.vlgmr.msra.gmra.mxu3 %vm2014_vm0, %v3070_v7 }
 0x579   : > { %3359 = vmatpush.msrb.mxu2 %v3326_v4  ;;  %3408 = vmatpush.msrb.mxu3 %v3399_v5 }
 0x57b   : > { %3360 = vmatpush.msrb.mxu2 %v3325_v8  ;;  %3409 = vmatpush.msrb.mxu3 %v3398_v9 }
 0x57d   : > { %3361 = vmatpush.msrb.mxu2 %v3324_v10  ;;  %3410 = vmatpush.msrb.mxu3 %v3397_v11 }
 0x57f   : > { %3362 = vmatpush.msrb.mxu2 %v3323_v12  ;;  %3411 = vmatpush.msrb.mxu3 %v3396_v13 }
 0x580   : > { %6241 = vmatmul.msk.f32.gmra.mxu2 %vm2014_vm0, %v2926_v15  ;;  %6249 = vmatmul.msk.f32.gmra.mxu3 %vm2014_vm0, %v3071_v3  ;;  %v2951_v15 = vpop.permute.xlu0 %2950  ;;  %v3096_v3 = vpop.permute.xlu1 %3095 }
 0x581   : > { %3363 = vmatpush.msrb.mxu2 %v3322_v16  ;;  %3412 = vmatpush.msrb.mxu3 %v3395_v17 }
 0x583   : > { %3364 = vmatpush.msrb.mxu2 %v3321_v18  ;;  %3413 = vmatpush.msrb.mxu3 %v3394_v19 }
 0x585   : > { %3365 = vmatpush.msrb.mxu2 %v3320_v20  ;;  %3414 = vmatpush.msrb.mxu3 %v3393_v21 }
 0x587   : > { %3366 = vmatpush.msrb.mxu2 %v3319_v22  ;;  %3415 = vmatpush.msrb.mxu3 %v3392_v24 }
 0x588   : > { %6242 = vmatmul.msk.f32.gmra.mxu2 %vm2014_vm0, %v2927_v26  ;;  %6250 = vmatmul.msk.f32.gmra.mxu3 %vm2014_vm0, %v3072_v27 }
 0x590   : > { %6243 = vmatmul.msk.f32.gmra.mxu2 %vm2014_vm0, %v2928_v30  ;;  %6251 = vmatmul.msk.f32.gmra.mxu3 %vm2014_vm0, %v3073_v31 }
 0x598   : > { %6264 = vmatmul.msk.f32.vlgmr.msrb.gmra.mxu2 %vm2785_vm3, %v3311_v32  ;;  %6272 = vmatmul.msk.f32.vlgmr.msrb.gmra.mxu3 %vm2785_vm3, %v3311_v32 }
 0x5a0   : > { %6265 = vmatmul.msk.f32.gmra.mxu2 %vm2785_vm3, %v3312_v33  ;;  %6273 = vmatmul.msk.f32.gmra.mxu3 %vm2785_vm3, %v3312_v33 }
 0x5a8   : > { %6266 = vmatmul.msk.f32.gmra.mxu2 %vm2785_vm3, %v3313_v34  ;;  %6274 = vmatmul.msk.f32.gmra.mxu3 %vm2785_vm3, %v3313_v34 }
 0x5b0   : > { %6267 = vmatmul.msk.f32.gmra.mxu2 %vm2785_vm3, %v3314_v35  ;;  %6275 = vmatmul.msk.f32.gmra.mxu3 %vm2785_vm3, %v3314_v35 }
 0x5b8   : > { %6268 = vmatmul.msk.f32.gmra.mxu2 %vm2785_vm3, %v3315_v36  ;;  %6276 = vmatmul.msk.f32.gmra.mxu3 %vm2785_vm3, %v3315_v36 }
 0x5c0   : > { %6269 = vmatmul.msk.f32.gmra.mxu2 %vm2785_vm3, %v3316_v37  ;;  %6277 = vmatmul.msk.f32.gmra.mxu3 %vm2785_vm3, %v3316_v37 }
 0x5c8   : > { %6270 = vmatmul.msk.f32.gmra.mxu2 %vm2785_vm3, %v3317_v40  ;;  %6278 = vmatmul.msk.f32.gmra.mxu3 %vm2785_vm3, %v3317_v40 }
 0x5d0   : > { %6271 = vmatmul.msk.f32.gmra.mxu2 %vm2785_vm3, %v3318_v41  ;;  %6279 = vmatmul.msk.f32.gmra.mxu3 %vm2785_vm3, %v3318_v41 }
 0x5fb   : > { %v2982_v44 = vpop.f32.mrf.mxu2  ;;  %v3127_v45 = vpop.f32.mrf.mxu3 }
 0x5fc   : > { %v2983_v29 = vadd.f32 %v2982_v44, %v2936_v42  ;;  %v3128_v47 = vadd.f32 %v3127_v45, %v3081_v43 }
 0x5fe   : > { %v6244_v48 = vmul.f32 -1.442695, %v2983_v29  ;;  %v6252_v49 = vmul.f32 -1.442695, %v3128_v47 }
 0x600   : > { %6627 = vpow2.f32 %v6244_v48 }
 0x601   : > { %6629 = vpow2.f32 %v6252_v49 }
 0x603   : > { %v2985_v52 = vpop.f32.mrf.mxu2  ;;  %v3130_v38 = vpop.f32.mrf.mxu3 }
 0x604   : > { %v2986_v39 = vadd.f32 %v2985_v52, %v2941_v50  ;;  %v3131_v53 = vadd.f32 %v3130_v38, %v3086_v51 }
 0x606   : > { %v6628_v54 = vpop.eup %6627  ;;  %v6245_v55 = vmul.f32 -1.442695, %v2986_v39  ;;  %v6253_v58 = vmul.f32 -1.442695, %v3131_v53 }
 0x607   : > { %v6630_v56 = vpop.eup %6629  ;;  %v3006_v57 = vadd.f32 1.0, %v6628_v54 }
 0x608   : > { %v3151_v60 = vadd.f32 1.0, %v6630_v56  ;;  %6631 = vpow2.f32 %v6245_v55 }
 0x609   : > { %6633 = vrcp.f32 %v3006_v57  ;;  %v3019_v12 = vand.u32 2147483647, %v3006_v57  ;;  %v3021_v18 = vand.u32 2147483648, %v3006_v57  ;;  %vm3015_vm14 = vweird.f32 %v3006_v57 }
 0x60a   : > { %6635 = vrcp.f32 %v3151_v60  ;;  %v3164_v22 = vand.u32 2147483647, %v3151_v60  ;;  %v3166_v24 = vand.u32 2147483648, %v3151_v60  ;;  %vm3160_vm15 = vweird.f32 %v3151_v60 }
 0x60b   : > { %6637 = vpow2.f32 %v6253_v58  ;;  %v2988_v62 = vpop.f32.mrf.mxu2  ;;  %v3133_v63 = vpop.f32.mrf.mxu3  ;;  %vm3020_vm2 = vcmp.eq.f32.partialorder %v3019_v12, 8.507059e+37  ;;  %v3022_v40 = vor.u32 1.1754944e-38, %v3021_v18 }
 0x60c   : > { %v2989_v0 = vadd.f32 %v2988_v62, %v2946_v59  ;;  %v3134_v1 = vadd.f32 %v3133_v63, %v3091_v61  ;;  %vm3165_vm6 = vcmp.eq.f32.partialorder %v3164_v22, 8.507059e+37  ;;  %v3167_v44 = vor.u32 1.1754944e-38, %v3166_v24 }
 0x60e   : > { %v6632_v6 = vpop.eup %6631  ;;  %v6246_v7 = vmul.f32 -1.442695, %v2989_v0  ;;  %v6254_v4 = vmul.f32 -1.442695, %v3134_v1 }
 0x60f   : > { %v6634_v5 = vpop.eup %6633  ;;  %v7865_v8 = vadd.f32 1.0, %v6632_v6 }
 0x610   : > { %v6636_v9 = vpop.eup %6635  ;;  %6639 = vpow2.f32 %v6246_v7  ;;  %v3011_v10 = vmul.f32 %v6634_v5, %v3006_v57  ;;  %vm3016_vm13 = vweird.f32 %v6634_v5 }
 0x611   : > { %v6638_v11 = vpop.eup %6637  ;;  %6641 = vrcp.f32 %v7865_v8  ;;  %v3156_v13 = vmul.f32 %v6636_v9, %v3151_v60  ;;  %vm3161_vm1 = vweird.f32 %v6636_v9  ;;  %vm3017_vm4 = vmor %vm3015_vm14, %vm3016_vm13  ;;  %v3036_v52 = vand.u32 2147483648, %v7865_v8 }
 0x612   : > { %v7868_v16 = vadd.f32 1.0, %v6638_v11  ;;  %6643 = vpow2.f32 %v6254_v4  ;;  %v3012_v17 = vsub.f32 1.0, %v3011_v10  ;;  %vm3162_vm7 = vmor %vm3160_vm15, %vm3161_vm1  ;;  %v3034_v53 = vand.u32 2147483647, %v7865_v8 }
 0x613   : > { %v2991_v19 = vpop.f32.mrf.mxu2  ;;  %v3136_v20 = vpop.f32.mrf.mxu3  ;;  %v3157_v21 = vsub.f32 1.0, %v3156_v13  ;;  %vm3030_vm9 = vweird.f32 %v7865_v8  ;;  %v3037_v61 = vor.u32 1.1754944e-38, %v3036_v52 }
 0x614   : > { %6645 = vrcp.f32 %v7868_v16  ;;  %v2992_v26 = vadd.f32 %v2991_v19, %v2951_v15  ;;  %v3137_v27 = vadd.f32 %v3136_v20, %v3096_v3  ;;  %v3013_v30 = vmul.f32 %v6634_v5, %v3012_v17 }
 0x615   : > { %v3158_v31 = vmul.f32 %v6636_v9, %v3157_v21  ;;  %v3179_v57 = vand.u32 2147483647, %v7868_v16  ;;  %v3181_v58 = vand.u32 2147483648, %v7868_v16  ;;  %vm3035_vm12 = vcmp.eq.f32.partialorder %v3034_v53, 8.507059e+37 }
 0x616   : > { %v6640_v32 = vpop.eup %6639  ;;  %v6247_v33 = vmul.f32 -1.442695, %v2992_v26  ;;  %v6255_v34 = vmul.f32 -1.442695, %v3137_v27  ;;  %v3014_v35 = vadd.f32 %v6634_v5, %v3013_v30  ;;  %vm3175_vm5 = vweird.f32 %v7868_v16 }
 0x617   : > { %v6642_v36 = vpop.eup %6641  ;;  %v7871_v37 = vadd.f32 1.0, %v6640_v32  ;;  %v3159_v41 = vadd.f32 %v6636_v9, %v3158_v31  ;;  %vm3180_vm14 = vcmp.eq.f32.partialorder %v3179_v57, 8.507059e+37 }
 0x618   : > { %v6644_v42 = vpop.eup %6643  ;;  %6647 = vpow2.f32 %v6247_v33  ;;  %v3018_v43 = vsel %vm3017_vm4, %v6634_v5, %v3014_v35  ;;  %v3026_v45 = vmul.f32 %v6642_v36, %v7865_v8  ;;  %vm3031_vm8 = vweird.f32 %v6642_v36 }
 0x619   : > { %6649 = vrcp.f32 %v7871_v37  ;;  %v7878_v46 = vadd.f32 1.0, %v6644_v42  ;;  %v3023_v28 = vsel %vm3020_vm2, %v3022_v40, %v3018_v43  ;;  %v3163_v29 = vsel %vm3162_vm7, %v6636_v9, %v3159_v41  ;;  %vm3032_vm10 = vmor %vm3030_vm9, %vm3031_vm8 }
 0x61a   : > { %v6646_v47 = vpop.eup %6645  ;;  %6651 = vpow2.f32 %v6255_v34  ;;  %6256 = vmatmul.msk.f32.vlgmr.msra.gmra.mxu0 %vm2014_vm0, %v3023_v28  ;;  %v3168_v48 = vsel %vm3165_vm6, %v3167_v44, %v3163_v29  ;;  %v3027_v49 = vsub.f32 1.0, %v3026_v45  ;;  %v3182_v8 = vor.u32 1.1754944e-38, %v3181_v58 }
 0x61b   : > { %6653 = vrcp.f32 %v7878_v46  ;;  %6260 = vmatmul.msk.f32.vlgmr.msra.gmra.mxu1 %vm2014_vm0, %v3168_v48  ;;  %v7883_v50 = vpop.f32.mrf.mxu2  ;;  %v7885_v51 = vpop.f32.mrf.mxu3  ;;  %v3171_v38 = vmul.f32 %v6646_v47, %v7868_v16  ;;  %vm3176_vm11 = vweird.f32 %v6646_v47  ;;  %v3049_v15 = vand.u32 2147483647, %v7871_v37 }
 0x61c   : > { %v3028_v39 = vmul.f32 %v6642_v36, %v3027_v49  ;;  %vm3177_vm13 = vmor %vm3175_vm5, %vm3176_vm11  ;;  %v3051_v3 = vand.u32 2147483648, %v7871_v37  ;;  %vm3045_vm1 = vweird.f32 %v7871_v37  ;;  %v3196_v19 = vand.u32 2147483648, %v7878_v46 }
 0x61d   : > { %v3172_v54 = vsub.f32 1.0, %v3171_v38  ;;  %v3194_v22 = vand.u32 2147483647, %v7878_v46  ;;  %vm3190_vm6 = vweird.f32 %v7878_v46  ;;  %vm3050_vm7 = vcmp.eq.f32.partialorder %v3049_v15, 8.507059e+37 }
 0x61e   : > { %v6648_v55 = vpop.eup %6647  ;;  %v3029_v56 = vadd.f32 %v6642_v36, %v3028_v39  ;;  %v3052_v26 = vor.u32 1.1754944e-38, %v3051_v3  ;;  %v3197_v34 = vor.u32 1.1754944e-38, %v3196_v19 }
 0x61f   : > { %v6650_v59 = vpop.eup %6649  ;;  %v7893_v60 = vadd.f32 1.0, %v6648_v55  ;;  %v3173_v62 = vmul.f32 %v6646_v47, %v3172_v54  ;;  %vm3195_vm9 = vcmp.eq.f32.partialorder %v3194_v22, 8.507059e+37 }
 0x620   : > { %v6652_v63 = vpop.eup %6651  ;;  %v3033_v0 = vsel %vm3032_vm10, %v6642_v36, %v3029_v56  ;;  %v3041_v1 = vmul.f32 %v6650_v59, %v7871_v37  ;;  %vm3046_vm15 = vweird.f32 %v6650_v59 }
 0x621   : > { %v6654_v6 = vpop.eup %6653  ;;  %6655 = vrcp.f32 %v7893_v60  ;;  %v7898_v7 = vadd.f32 1.0, %v6652_v63  ;;  %v3038_v4 = vsel %vm3035_vm12, %v3037_v61, %v3033_v0  ;;  %v3174_v5 = vadd.f32 %v6646_v47, %v3173_v62  ;;  %vm3047_vm4 = vmor %vm3045_vm1, %vm3046_vm15 }
 0x622   : > { %6257 = vmatmul.msk.f32.gmra.mxu0 %vm2014_vm0, %v3038_v4  ;;  %v3042_v9 = vsub.f32 1.0, %v3041_v1  ;;  %v3186_v10 = vmul.f32 %v6654_v6, %v7878_v46  ;;  %vm3191_vm2 = vweird.f32 %v6654_v6  ;;  %v3066_v43 = vand.u32 2147483648, %v7893_v60 }
 0x623   : > { %6657 = vrcp.f32 %v7898_v7  ;;  %v3178_v11 = vsel %vm3177_vm13, %v6646_v47, %v3174_v5  ;;  %v7903_v12 = vpop.f32.mrf.mxu2  ;;  %v7905_v13 = vpop.f32.mrf.mxu3  ;;  %vm3192_vm8 = vmor %vm3190_vm6, %vm3191_vm2  ;;  %v3064_v45 = vand.u32 2147483647, %v7893_v60  ;;  %vm3060_vm11 = vweird.f32 %v7893_v60 }
 0x624   : > { %v3183_v16 = vsel %vm3180_vm14, %v3182_v8, %v3178_v11  ;;  %v3043_v17 = vmul.f32 %v6650_v59, %v3042_v9  ;;  %v3187_v18 = vsub.f32 1.0, %v3186_v10  ;;  %v3211_v28 = vand.u32 2147483648, %v7898_v7 }
 0x625   : > { %6261 = vmatmul.msk.f32.gmra.mxu1 %vm2014_vm0, %v3183_v16  ;;  %v3209_v48 = vand.u32 2147483647, %v7898_v7  ;;  %v3067_v49 = vor.u32 1.1754944e-38, %v3066_v43  ;;  %vm3065_vm13 = vcmp.eq.f32.partialorder %v3064_v45, 8.507059e+37  ;;  %vm3205_vm14 = vweird.f32 %v7898_v7  ;;  %v4346_v43 = vld [vmem:[%s9304_s9 + $0x30] sm:$0xff] }
 0x626   : > { %v3044_v20 = vadd.f32 %v6650_v59, %v3043_v17  ;;  %v3188_v21 = vmul.f32 %v6654_v6, %v3187_v18  ;;  %v3212_v53 = vor.u32 1.1754944e-38, %v3211_v28  ;;  %v3776_v45 = vld [vmem:[%s9302_s1 + $0x10] sm:$0xff]  ;;  %v4345_v28 = vld [vmem:[%s9304_s9 + $0x28] sm:$0xff] }
 0x627   : > { %v6656_v24 = vpop.eup %6655  ;;  %vm3210_vm1 = vcmp.eq.f32.partialorder %v3209_v48, 8.507059e+37 }
 0x628   : > { %v3048_v27 = vsel %vm3047_vm4, %v6650_v59, %v3044_v20  ;;  %v3189_v30 = vadd.f32 %v6654_v6, %v3188_v21  ;;  %v3056_v31 = vmul.f32 %v6656_v24, %v7893_v60  ;;  %vm3061_vm10 = vweird.f32 %v6656_v24 }
 0x629   : > { %v6658_v32 = vpop.eup %6657  ;;  %v3053_v33 = vsel %vm3050_vm7, %v3052_v26, %v3048_v27  ;;  %vm3062_vm5 = vmor %vm3060_vm11, %vm3061_vm10 }
 0x62a   : > { %6258 = vmatmul.msk.f32.gmra.mxu0 %vm2014_vm0, %v3053_v33  ;;  %v3193_v35 = vsel %vm3192_vm8, %v6654_v6, %v3189_v30  ;;  %v3057_v36 = vsub.f32 1.0, %v3056_v31  ;;  %v3201_v37 = vmul.f32 %v6658_v32, %v7898_v7  ;;  %vm3206_vm12 = vweird.f32 %v6658_v32  ;;  %v3441_v6 = vld [vmem:[%s9299_s12] sm:$0xff]  ;;  %s9301_s12 = sld [smem:[#allocation48_spill]] }
 0x62b   : > { %v3198_v40 = vsel %vm3195_vm9, %v3197_v34, %v3193_v35  ;;  %v3374_v41 = vpop.f32.mrf.mxu2  ;;  %v3423_v42 = vpop.f32.mrf.mxu3  ;;  %vm3207_vm15 = vmor %vm3205_vm14, %vm3206_vm12  ;;  %v3774_v35 = vld [vmem:[%s9302_s1] sm:$0xff] }
 0x62c   : > { %v3058_v44 = vmul.f32 %v6656_v24, %v3057_v36  ;;  %v3202_v46 = vsub.f32 1.0, %v3201_v37  ;;  %v4226_v36 = vld [vmem:[%s9303_s7 + $0x38] sm:$0xff] }
 0x62d   : > { %6262 = vmatmul.msk.f32.gmra.mxu1 %vm2014_vm0, %v3198_v40  ;;  %v4347_v37 = vld [vmem:[%s9304_s9 + $0x38] sm:$0xff] }
 0x62e   : > { %v3059_v29 = vadd.f32 %v6656_v24, %v3058_v44  ;;  %v3203_v47 = vmul.f32 %v6658_v32, %v3202_v46  ;;  %v4224_v46 = vld [vmem:[%s9303_s7 + $0x28] sm:$0xff] }
 0x630   : > { %v3063_v52 = vsel %vm3062_vm5, %v6656_v24, %v3059_v29  ;;  %v3204_v38 = vadd.f32 %v6658_v32, %v3203_v47  ;;  %v3501_v34 = vld [vmem:[%s9301_s12] sm:$0xff]  ;;  %v3502_v40 = vld [vmem:[%s9301_s12 + $0x8] sm:$0xff]  ;;  %v3503_v44 = vld [vmem:[%s9301_s12 + $0x10] sm:$0xff] }
 0x631   : > { %v3068_v39 = vsel %vm3065_vm13, %v3067_v49, %v3063_v52  ;;  %v4223_v29 = vld [vmem:[%s9303_s7 + $0x20] sm:$0xff]  ;;  %v3504_v48 = vld [vmem:[%s9301_s12 + $0x18] sm:$0xff] }
 0x632   : > { %6259 = vmatmul.msk.f32.gmra.mxu0 %vm2014_vm0, %v3068_v39  ;;  %v3208_v54 = vsel %vm3207_vm15, %v6658_v32, %v3204_v38  ;;  %v4344_v47 = vld [vmem:[%s9304_s9 + $0x20] sm:$0xff]  ;;  %v3777_v49 = vld [vmem:[%s9302_s1 + $0x18] sm:$0xff]  ;;  %v4221_v39 = vld [vmem:[%s9303_s7 + $0x10] sm:$0xff] }
 0x633   : > { %v3213_v55 = vsel %vm3210_vm1, %v3212_v53, %v3208_v54  ;;  %v3377_v56 = vpop.f32.mrf.mxu2  ;;  %v3426_v57 = vpop.f32.mrf.mxu3  ;;  %v4222_v52 = vld [vmem:[%s9303_s7 + $0x18] sm:$0xff]  ;;  %v4342_v53 = vld [vmem:[%s9304_s9 + $0x10] sm:$0xff]  ;;  %v4220_v54 = vld [vmem:[%s9303_s7 + $0x8] sm:$0xff] }
 0x634   : > { %v4343_v38 = vld [vmem:[%s9304_s9 + $0x18] sm:$0xff] }
 0x635   : > { %6263 = vmatmul.msk.f32.gmra.mxu1 %vm2014_vm0, %v3213_v55  ;;  %v4341_v55 = vld [vmem:[%s9304_s9 + $0x8] sm:$0xff] }
 0x63b   : > { %v3380_v58 = vpop.f32.mrf.mxu2  ;;  %v3429_v59 = vpop.f32.mrf.mxu3 }
 0x643   : > { %v3383_v60 = vpop.f32.mrf.mxu2  ;;  %v3432_v61 = vpop.f32.mrf.mxu3 }
 0x64b   : > { %v3386_v62 = vpop.f32.mrf.mxu2  ;;  %v3435_v63 = vpop.f32.mrf.mxu3 }
 0x653   : > { %v3389_v0 = vpop.f32.mrf.mxu2  ;;  %v3438_v1 = vpop.f32.mrf.mxu3 }
 0x654   : > { %3459 = vmatpush.msrb.mxu0 %v3389_v0  ;;  %3479 = vmatpush.msrb.mxu1 %v3438_v1  ;;  %v3508_v0 = vld [vmem:[%s9301_s12 + $0x38] sm:$0xff] }
 0x655   : > { %v3781_v1 = vld [vmem:[%s9302_s1 + $0x38] sm:$0xff] }
 0x656   : > { %3460 = vmatpush.msrb.mxu0 %v3386_v62  ;;  %3480 = vmatpush.msrb.mxu1 %v3435_v63  ;;  %v3507_v62 = vld [vmem:[%s9301_s12 + $0x30] sm:$0xff] }
 0x657   : > { %v3780_v63 = vld [vmem:[%s9302_s1 + $0x30] sm:$0xff] }
 0x658   : > { %3461 = vmatpush.msrb.mxu0 %v3383_v60  ;;  %3481 = vmatpush.msrb.mxu1 %v3432_v61  ;;  %v3506_v60 = vld [vmem:[%s9301_s12 + $0x28] sm:$0xff] }
 0x659   : > { %v3779_v61 = vld [vmem:[%s9302_s1 + $0x28] sm:$0xff] }
 0x65a   : > { %3462 = vmatpush.msrb.mxu0 %v3380_v58  ;;  %3482 = vmatpush.msrb.mxu1 %v3429_v59  ;;  %v3505_v58 = vld [vmem:[%s9301_s12 + $0x20] sm:$0xff]  ;;  %s9326_s12 = sld [smem:[#allocation60_spill]] }
 0x65b   : > { %v3778_v59 = vld [vmem:[%s9302_s1 + $0x20] sm:$0xff] }
 0x65c   : > { %3463 = vmatpush.msrb.mxu0 %v3377_v56  ;;  %3483 = vmatpush.msrb.mxu1 %v3426_v57  ;;  %v4219_v56 = vld [vmem:[%s9303_s7] sm:$0xff] }
 0x65d   : > { %v4340_v57 = vld [vmem:[%s9304_s9] sm:$0xff] }
 0x65e   : > { %3464 = vmatpush.msrb.mxu0 %v3374_v41  ;;  %3484 = vmatpush.msrb.mxu1 %v3423_v42  ;;  %v3775_v41 = vld [vmem:[%s9302_s1 + $0x8] sm:$0xff]  ;;  %v4225_v42 = vld [vmem:[%s9303_s7 + $0x30] sm:$0xff]  ;;  %s9187_s7 = sshll.u32 %s7504_s18, 7  ;;  %s9325_s1 = sld [smem:[#allocation58_spill]] }
 0x65f   : > { %s8001_s9 = scalar_lea.vmem %s9305_s10, %s9187_s7  ;;  %s9306_s10 = sld [smem:[#allocation53_spill]] }
 0x660   : > { %3465 = vmatpush.msrb.mxu0 %v7903_v12  ;;  %3485 = vmatpush.msrb.mxu1 %v7905_v13  ;;  %s9307_s7 = sld [smem:[#allocation54_spill]] }
 0x662   : > { %3466 = vmatpush.msrb.mxu0 %v7883_v50  ;;  %3486 = vmatpush.msrb.mxu1 %v7885_v51 }
 0x663   : > { %6280 = vmatmul.msk.f32.vlgmr.msrb.gmra.mxu0 %vm2785_vm3, %v3441_v6  ;;  %6281 = vmatmul.msk.f32.vlgmr.msrb.gmra.mxu1 %vm2785_vm3, %v3441_v6  ;;  %v4203_v6 = vld [vmem:[%s8001_s9] sm:$0xff] }
 0x697   : > { %v3245_v7 = vpop.f32.mrf.mxu0 }
 0x698   : > { %v3299_v4 = vmul.f32 %v3245_v7, %v7758_v2  ;;  %v3287_v5 = vpop.f32.mrf.mxu1  ;;  %v4204_v7 = vld [vmem:[%s8001_s9 + $0x8] sm:$0xff] }
 0x69a   : > { %v3303_v8 = vmul.f32 %v3299_v4, %v3287_v5  ;;  %v4205_v4 = vld [vmem:[%s8001_s9 + $0x10] sm:$0xff]  ;;  %v4206_v5 = vld [vmem:[%s8001_s9 + $0x18] sm:$0xff] }
 0x69c   : > { %3307 = vst.msk [vmem:[%s7936_s4] sm:$0xff] %vm2785_vm3, %v3303_v8  ;;  %v4207_v8 = vld [vmem:[%s8001_s9 + $0x20] sm:$0xff] }
 0x69f   : > { %v3248_v50 = vpop.f32.mrf.mxu0 }
 0x6a0   : > { %v3300_v51 = vmul.f32 %v3248_v50, %v7765_v14  ;;  %v3446_v14 = vpop.permute.xlu2 %3445  ;;  %v4208_v50 = vld [vmem:[%s8001_s9 + $0x28] sm:$0xff] }
 0x6a2   : > { %v3290_v9 = vpop.f32.mrf.mxu1 }
 0x6a3   : > { %v3304_v10 = vmul.f32 %v3300_v51, %v3290_v9  ;;  %v4209_v51 = vld [vmem:[%s8001_s9 + $0x30] sm:$0xff]  ;;  %v4210_v9 = vld [vmem:[%s8001_s9 + $0x38] sm:$0xff] }
 0x6a5   : > { %3308 = vst.msk [vmem:[%s7936_s4 + $0x8] sm:$0xff] %vm2785_vm3, %v3304_v10  ;;  %v3520_v10 = vpop.permute.xlu0 %3519 }
 0x6a7   : > { %v3251_v11 = vpop.f32.mrf.mxu0 }
 0x6a8   : > { %v3301_v2 = vmul.f32 %v3251_v11, %v7774_v23  ;;  %v3793_v11 = vpop.permute.xlu1 %3792 }
 0x6aa   : > { %v3293_v12 = vpop.f32.mrf.mxu1 }
 0x6ab   : > { %v3305_v13 = vmul.f32 %v3301_v2, %v3293_v12 }
 0x6ad   : > { %3309 = vst.msk [vmem:[%s7936_s4 + $0x10] sm:$0xff] %vm2785_vm3, %v3305_v13  ;;  %v4211_v13 = vld [vmem:[%s8001_s9 + $0x40] sm:$0xff] }
 0x6af   : > { %v3254_v15 = vpop.f32.mrf.mxu0 }
 0x6b0   : > { %v3302_v3 = vmul.f32 %v3254_v15, %v7783_v25 }
 0x6b2   : > { %v3296_v16 = vpop.f32.mrf.mxu1 }
 0x6b3   : > { %v3306_v17 = vmul.f32 %v3302_v3, %v3296_v16 }
 0x6b5   : > { %3310 = vst.msk [vmem:[%s7936_s4 + $0x18] sm:$0xff] %vm2785_vm3, %v3306_v17 }
 0x6e0   : > { %v3468_v18 = vpop.f32.mrf.mxu0  ;;  %v3488_v19 = vpop.f32.mrf.mxu1 }
 0x6e1   : > { %v3469_v20 = vadd.f32 %v3468_v18, %v3446_v14  ;;  %v3489_v21 = vadd.f32 %v3488_v19, %v3446_v14  ;;  %v3525_v14 = vpop.permute.xlu2 %3524  ;;  %v4047_v18 = vld [vmem:[%s9306_s10] sm:$0xff] }
 0x6e2   : > { %v4113_v19 = vld [vmem:[%s9307_s7] sm:$0xff]  ;;  %4087 = vmatpush.msra.mxu2 %v4047_v18  ;;  %s6189_s7 = sshll.u32 %s7682_s3, 6 }
 0x6e3   : > { %v3491_v22 = vadd.f32 3.0, %v3469_v20  ;;  %v3496_v23 = vadd.f32 3.0, %v3489_v21  ;;  %4153 = vmatpush.msra.mxu3 %v4113_v19  ;;  %s8341_s10 = scalar_lea.vmem [#allocation7], %s6189_s7  ;;  %s9324_s7 = sld [smem:[#allocation56_spill]] }
 0x6e5   : > { %v3492_v24 = vmax.f32 %v3491_v22, 0.0  ;;  %v3497_v26 = vmax.f32 %v3496_v23, 0.0  ;;  %v4212_v23 = vld [vmem:[%s8001_s9 + $0x48] sm:$0xff] }
 0x6e7   : > { %v3493_v27 = vmin.f32 %v3492_v24, 6.0  ;;  %v3498_v25 = vmin.f32 %v3497_v26, 6.0 }
 0x6e9   : > { %v3494_v30 = vmul.f32 %v3493_v27, %v3469_v20  ;;  %v3499_v31 = vmul.f32 %v3498_v25, %v3489_v21  ;;  %v3798_v20 = vpop.permute.xlu0 %3797 }
 0x6eb   : > { %v3495_v32 = vmul.f32 0.16666667, %v3494_v30  ;;  %v3500_v33 = vmul.f32 0.16666667, %v3499_v31 }
 0x6ed   : > { %3596 = vmatpush.msra.mxu0 %v3495_v32  ;;  %3869 = vmatpush.msra.mxu1 %v3500_v33  ;;  %v3530_v33 = vpop.permute.xlu1 %3529 }
 0x6ee   : > { %6282 = vmatmul.msk.f32.vlgmr.msra.gmra.mxu0 %vm2014_vm0, %v3501_v34  ;;  %6298 = vmatmul.msk.f32.vlgmr.msra.gmra.mxu1 %vm2014_vm0, %v3774_v35  ;;  %v3803_v35 = vpop.permute.xlu2 %3802 }
 0x6ef   : > { %4283 = vmatpush.msrb.mxu0 %v4226_v36  ;;  %4356 = vmatpush.msrb.mxu1 %v4347_v37 }
 0x6f1   : > { %4284 = vmatpush.msrb.mxu0 %v4225_v42  ;;  %4357 = vmatpush.msrb.mxu1 %v4346_v43 }
 0x6f3   : > { %4285 = vmatpush.msrb.mxu0 %v4224_v46  ;;  %4358 = vmatpush.msrb.mxu1 %v4345_v28 }
 0x6f5   : > { %4286 = vmatpush.msrb.mxu0 %v4223_v29  ;;  %4359 = vmatpush.msrb.mxu1 %v4344_v47 }
 0x6f6   : > { %6283 = vmatmul.msk.f32.gmra.mxu0 %vm2014_vm0, %v3502_v40  ;;  %6299 = vmatmul.msk.f32.gmra.mxu1 %vm2014_vm0, %v3775_v41  ;;  %v4213_v40 = vld [vmem:[%s8001_s9 + $0x50] sm:$0xff] }
 0x6f7   : > { %4287 = vmatpush.msrb.mxu0 %v4222_v52  ;;  %4360 = vmatpush.msrb.mxu1 %v4343_v38 }
 0x6f9   : > { %4288 = vmatpush.msrb.mxu0 %v4221_v39  ;;  %4361 = vmatpush.msrb.mxu1 %v4342_v53 }
 0x6fb   : > { %4289 = vmatpush.msrb.mxu0 %v4220_v54  ;;  %4362 = vmatpush.msrb.mxu1 %v4341_v55  ;;  %v3808_v55 = vpop.permute.xlu1 %3807 }
 0x6fd   : > { %4290 = vmatpush.msrb.mxu0 %v4219_v56  ;;  %4363 = vmatpush.msrb.mxu1 %v4340_v57 }
 0x6fe   : > { %6284 = vmatmul.msk.f32.gmra.mxu0 %vm2014_vm0, %v3503_v44  ;;  %6300 = vmatmul.msk.f32.gmra.mxu1 %vm2014_vm0, %v3776_v45 }
 0x706   : > { %6285 = vmatmul.msk.f32.gmra.mxu0 %vm2014_vm0, %v3504_v48  ;;  %6301 = vmatmul.msk.f32.gmra.mxu1 %vm2014_vm0, %v3777_v49  ;;  %v3535_v49 = vpop.permute.xlu0 %3534 }
 0x70e   : > { %6286 = vmatmul.msk.f32.gmra.mxu0 %vm2014_vm0, %v3505_v58  ;;  %6302 = vmatmul.msk.f32.gmra.mxu1 %vm2014_vm0, %v3778_v59 }
 0x716   : > { %6287 = vmatmul.msk.f32.gmra.mxu0 %vm2014_vm0, %v3506_v60  ;;  %6303 = vmatmul.msk.f32.gmra.mxu1 %vm2014_vm0, %v3779_v61  ;;  %v4214_v61 = vld [vmem:[%s8001_s9 + $0x58] sm:$0xff] }
 0x71e   : > { %6288 = vmatmul.msk.f32.gmra.mxu0 %vm2014_vm0, %v3507_v62  ;;  %6304 = vmatmul.msk.f32.gmra.mxu1 %vm2014_vm0, %v3780_v63 }
 0x726   : > { %6289 = vmatmul.msk.f32.gmra.mxu0 %vm2014_vm0, %v3508_v0  ;;  %6305 = vmatmul.msk.f32.gmra.mxu1 %vm2014_vm0, %v3781_v1 }
 0x72e   : > { %6330 = vmatmul.msk.f32.vlgmr.msrb.gmra.mxu0 %vm2785_vm3, %v4203_v6  ;;  %6346 = vmatmul.msk.f32.vlgmr.msrb.gmra.mxu1 %vm2785_vm3, %v4203_v6 }
 0x736   : > { %6331 = vmatmul.msk.f32.gmra.mxu0 %vm2785_vm3, %v4204_v7  ;;  %6347 = vmatmul.msk.f32.gmra.mxu1 %vm2785_vm3, %v4204_v7 }
 0x73e   : > { %6332 = vmatmul.msk.f32.gmra.mxu0 %vm2785_vm3, %v4205_v4  ;;  %6348 = vmatmul.msk.f32.gmra.mxu1 %vm2785_vm3, %v4205_v4 }
 0x746   : > { %6333 = vmatmul.msk.f32.gmra.mxu0 %vm2785_vm3, %v4206_v5  ;;  %6349 = vmatmul.msk.f32.gmra.mxu1 %vm2785_vm3, %v4206_v5 }
 0x74e   : > { %6334 = vmatmul.msk.f32.gmra.mxu0 %vm2785_vm3, %v4207_v8  ;;  %6350 = vmatmul.msk.f32.gmra.mxu1 %vm2785_vm3, %v4207_v8 }
 0x756   : > { %6335 = vmatmul.msk.f32.gmra.mxu0 %vm2785_vm3, %v4208_v50  ;;  %6351 = vmatmul.msk.f32.gmra.mxu1 %vm2785_vm3, %v4208_v50 }
 0x75e   : > { %6336 = vmatmul.msk.f32.gmra.mxu0 %vm2785_vm3, %v4209_v51  ;;  %6352 = vmatmul.msk.f32.gmra.mxu1 %vm2785_vm3, %v4209_v51 }
 0x766   : > { %6337 = vmatmul.msk.f32.gmra.mxu0 %vm2785_vm3, %v4210_v9  ;;  %6353 = vmatmul.msk.f32.gmra.mxu1 %vm2785_vm3, %v4210_v9 }
 0x76b   : > { %v3598_v2 = vpop.f32.mrf.mxu0  ;;  %v3871_v12 = vpop.f32.mrf.mxu1 }
 0x76c   : > { %v3599_v15 = vadd.f32 %v3598_v2, %v3520_v10  ;;  %v3872_v3 = vadd.f32 %v3871_v12, %v3793_v11 }
 0x76e   : > { %v6290_v16 = vmul.f32 -1.442695, %v3599_v15  ;;  %v6306_v17 = vmul.f32 -1.442695, %v3872_v3  ;;  %6338 = vmatmul.msk.f32.gmra.mxu0 %vm2785_vm3, %v4211_v13  ;;  %6354 = vmatmul.msk.f32.gmra.mxu1 %vm2785_vm3, %v4211_v13  ;;  %v3540_v3 = vpop.permute.xlu2 %3539 }
 0x770   : > { %6659 = vpow2.f32 %v6290_v16 }
 0x771   : > { %6661 = vpow2.f32 %v6306_v17 }
 0x773   : > { %v3601_v21 = vpop.f32.mrf.mxu0  ;;  %v3874_v22 = vpop.f32.mrf.mxu1 }
 0x774   : > { %v3602_v24 = vadd.f32 %v3601_v21, %v3525_v14  ;;  %v3875_v26 = vadd.f32 %v3874_v22, %v3798_v20  ;;  %v3813_v22 = vpop.permute.xlu0 %3812 }
 0x776   : > { %v6660_v27 = vpop.eup %6659  ;;  %v6291_v25 = vmul.f32 -1.442695, %v3602_v24  ;;  %6339 = vmatmul.msk.f32.gmra.mxu0 %vm2785_vm3, %v4212_v23  ;;  %6355 = vmatmul.msk.f32.gmra.mxu1 %vm2785_vm3, %v4212_v23  ;;  %v6307_v32 = vmul.f32 -1.442695, %v3875_v26 }
 0x777   : > { %v6662_v30 = vpop.eup %6661  ;;  %v3646_v31 = vadd.f32 1.0, %v6660_v27 }
 0x778   : > { %v8035_v34 = vadd.f32 1.0, %v6662_v30  ;;  %6663 = vpow2.f32 %v6291_v25  ;;  %v4215_v30 = vld [vmem:[%s8001_s9 + $0x60] sm:$0xff] }
 0x779   : > { %6665 = vrcp.f32 %v3646_v31  ;;  %v3663_v29 = vand.u32 2147483647, %v3646_v31  ;;  %v3665_v47 = vand.u32 2147483648, %v3646_v31  ;;  %vm3659_vm2 = vweird.f32 %v3646_v31 }
 0x77a   : > { %6667 = vrcp.f32 %v8035_v34  ;;  %v3936_v53 = vand.u32 2147483647, %v8035_v34  ;;  %v3938_v54 = vand.u32 2147483648, %v8035_v34  ;;  %vm3932_vm4 = vweird.f32 %v8035_v34 }
 0x77b   : > { %6669 = vpow2.f32 %v6307_v32  ;;  %v3604_v36 = vpop.f32.mrf.mxu0  ;;  %v3877_v37 = vpop.f32.mrf.mxu1  ;;  %vm8051_vm7 = vcmp.eq.f32.partialorder %v3663_v29, 8.507059e+37  ;;  %v3666_v63 = vor.u32 1.1754944e-38, %v3665_v47 }
 0x77c   : > { %v3605_v41 = vadd.f32 %v3604_v36, %v3530_v33  ;;  %v3878_v42 = vadd.f32 %v3877_v37, %v3803_v35  ;;  %vm8056_vm9 = vcmp.eq.f32.partialorder %v3936_v53, 8.507059e+37  ;;  %v3939_v5 = vor.u32 1.1754944e-38, %v3938_v54 }
 0x77e   : > { %v6664_v43 = vpop.eup %6663  ;;  %v6292_v44 = vmul.f32 -1.442695, %v3605_v41  ;;  %v6308_v45 = vmul.f32 -1.442695, %v3878_v42  ;;  %6340 = vmatmul.msk.f32.gmra.mxu0 %vm2785_vm3, %v4213_v40  ;;  %6356 = vmatmul.msk.f32.gmra.mxu1 %vm2785_vm3, %v4213_v40 }
 0x77f   : > { %v6666_v46 = vpop.eup %6665  ;;  %v8041_v28 = vadd.f32 1.0, %v6664_v43 }
 0x780   : > { %v6668_v48 = vpop.eup %6667  ;;  %v3655_v52 = vmul.f32 %v6666_v46, %v3646_v31  ;;  %6671 = vpow2.f32 %v6292_v44  ;;  %vm3660_vm6 = vweird.f32 %v6666_v46 }
 0x781   : > { %v6670_v38 = vpop.eup %6669  ;;  %v3928_v39 = vmul.f32 %v6668_v48, %v8035_v34  ;;  %6673 = vrcp.f32 %v8041_v28  ;;  %vm3933_vm8 = vweird.f32 %v6668_v48  ;;  %vm3674_vm10 = vweird.f32 %v8041_v28  ;;  %vm3661_vm11 = vmor %vm3659_vm2, %vm3660_vm6 }
 0x782   : > { %v3656_v56 = vsub.f32 1.0, %v3655_v52  ;;  %v8047_v57 = vadd.f32 1.0, %v6670_v38  ;;  %6675 = vpow2.f32 %v6308_v45  ;;  %v3678_v12 = vand.u32 2147483647, %v8041_v28  ;;  %vm3934_vm12 = vmor %vm3932_vm4, %vm3933_vm8  ;;  %v3545_v52 = vpop.permute.xlu1 %3544 }
 0x783   : > { %v3929_v58 = vsub.f32 1.0, %v3928_v39  ;;  %v3607_v59 = vpop.f32.mrf.mxu0  ;;  %v3880_v60 = vpop.f32.mrf.mxu1  ;;  %v3680_v13 = vand.u32 2147483648, %v8041_v28 }
 0x784   : > { %6677 = vrcp.f32 %v8047_v57  ;;  %v3608_v0 = vadd.f32 %v3607_v59, %v3535_v49  ;;  %v3881_v1 = vadd.f32 %v3880_v60, %v3808_v55  ;;  %v3657_v6 = vmul.f32 %v6666_v46, %v3656_v56 }
 0x785   : > { %v3930_v7 = vmul.f32 %v6668_v48, %v3929_v58  ;;  %v3951_v14 = vand.u32 2147483647, %v8047_v57  ;;  %v3953_v26 = vand.u32 2147483648, %v8047_v57  ;;  %vm8091_vm5 = vcmp.eq.f32.partialorder %v3678_v12, 8.507059e+37  ;;  %v3818_v58 = vpop.permute.xlu2 %3817 }
 0x786   : > { %v6672_v8 = vpop.eup %6671  ;;  %v6293_v50 = vmul.f32 -1.442695, %v3608_v0  ;;  %v6309_v51 = vmul.f32 -1.442695, %v3881_v1  ;;  %6341 = vmatmul.msk.f32.gmra.mxu0 %vm2785_vm3, %v4214_v61  ;;  %6357 = vmatmul.msk.f32.gmra.mxu1 %vm2785_vm3, %v4214_v61  ;;  %v3658_v9 = vadd.f32 %v6666_v46, %v3657_v6  ;;  %v3681_v32 = vor.u32 1.1754944e-38, %v3680_v13  ;;  %v4216_v1 = vld [vmem:[%s8001_s9 + $0x68] sm:$0xff] }
 0x787   : > { %v8063_v10 = vpop.eup %6673  ;;  %v8065_v11 = vadd.f32 1.0, %v6672_v8  ;;  %v3931_v2 = vadd.f32 %v6668_v48, %v3930_v7  ;;  %vm3947_vm14 = vweird.f32 %v8047_v57  ;;  %vm8101_vm1 = vcmp.eq.f32.partialorder %v3951_v14, 8.507059e+37 }
 0x788   : > { %v6676_v15 = vpop.eup %6675  ;;  %6679 = vpow2.f32 %v6293_v50  ;;  %v3662_v16 = vsel %vm3661_vm11, %v6666_v46, %v3658_v9  ;;  %v3670_v17 = vmul.f32 %v8063_v10, %v8041_v28  ;;  %vm3675_vm13 = vweird.f32 %v8063_v10 }
 0x789   : > { %6681 = vrcp.f32 %v8065_v11  ;;  %v8078_v18 = vadd.f32 1.0, %v6676_v15  ;;  %v3667_v19 = vsel %vm8051_vm7, %v3666_v63, %v3662_v16  ;;  %v3935_v20 = vsel %vm3934_vm12, %v6668_v48, %v3931_v2  ;;  %vm3676_vm2 = vmor %vm3674_vm10, %vm3675_vm13 }
 0x78a   : > { %v8082_v21 = vpop.eup %6677  ;;  %6683 = vpow2.f32 %v6309_v51  ;;  %6314 = vmatmul.msk.f32.vlgmr.msra.gmra.mxu2 %vm2014_vm0, %v3667_v19  ;;  %v3940_v23 = vsel %vm8056_vm9, %v3939_v5, %v3935_v20  ;;  %v3671_v24 = vsub.f32 1.0, %v3670_v17  ;;  %v3954_v45 = vor.u32 1.1754944e-38, %v3953_v26  ;;  %v3550_v20 = vpop.permute.xlu0 %3549 }
 0x78b   : > { %6685 = vrcp.f32 %v8078_v18  ;;  %6322 = vmatmul.msk.f32.vlgmr.msra.gmra.mxu3 %vm2014_vm0, %v3940_v23  ;;  %v3610_v27 = vpop.f32.mrf.mxu0  ;;  %v3883_v25 = vpop.f32.mrf.mxu1  ;;  %v3943_v33 = vmul.f32 %v8082_v21, %v8047_v57  ;;  %vm3948_vm15 = vweird.f32 %v8082_v21  ;;  %vm3689_vm4 = vweird.f32 %v8065_v11 }
 0x78c   : > { %v3611_v34 = vadd.f32 %v3610_v27, %v3540_v3  ;;  %v3884_v35 = vadd.f32 %v3883_v25, %v3813_v22  ;;  %v3672_v36 = vmul.f32 %v8063_v10, %v3671_v24  ;;  %v3693_v48 = vand.u32 2147483647, %v8065_v11  ;;  %vm3949_vm7 = vmor %vm3947_vm14, %vm3948_vm15  ;;  %v3823_v25 = vpop.permute.xlu1 %3822 }
 0x78d   : > { %v3944_v37 = vsub.f32 1.0, %v3943_v33  ;;  %v3695_v53 = vand.u32 2147483648, %v8065_v11  ;;  %vm3962_vm6 = vweird.f32 %v8078_v18  ;;  %v3966_v61 = vand.u32 2147483647, %v8078_v18 }
 0x78e   : > { %v6680_v41 = vpop.eup %6679  ;;  %v6294_v42 = vmul.f32 -1.442695, %v3611_v34  ;;  %v6310_v43 = vmul.f32 -1.442695, %v3884_v35  ;;  %6342 = vmatmul.msk.f32.gmra.mxu0 %vm2785_vm3, %v4215_v30  ;;  %6358 = vmatmul.msk.f32.gmra.mxu1 %vm2785_vm3, %v4215_v30  ;;  %v3673_v44 = vadd.f32 %v8063_v10, %v3672_v36  ;;  %v3968_v6 = vand.u32 2147483648, %v8078_v18  ;;  %v4217_v35 = vld [vmem:[%s8001_s9 + $0x70] sm:$0xff] }
 0x78f   : > { %v8108_v46 = vpop.eup %6681  ;;  %v8110_v29 = vadd.f32 1.0, %v6680_v41  ;;  %v3945_v47 = vmul.f32 %v8082_v21, %v3944_v37  ;;  %vm8147_vm9 = vcmp.eq.f32.partialorder %v3693_v48, 8.507059e+37  ;;  %v3696_v50 = vor.u32 1.1754944e-38, %v3695_v53 }
 0x790   : > { %v6684_v49 = vpop.eup %6683  ;;  %6687 = vpow2.f32 %v6294_v42  ;;  %v3677_v38 = vsel %vm3676_vm2, %v8063_v10, %v3673_v44  ;;  %v3685_v39 = vmul.f32 %v8108_v46, %v8065_v11  ;;  %vm3690_vm8 = vweird.f32 %v8108_v46 }
 0x791   : > { %v8121_v54 = vpop.eup %6685  ;;  %6689 = vrcp.f32 %v8110_v29  ;;  %v8124_v28 = vadd.f32 1.0, %v6684_v49  ;;  %v3682_v55 = vsel %vm8091_vm5, %v3681_v32, %v3677_v38  ;;  %v3946_v56 = vadd.f32 %v8082_v21, %v3945_v47  ;;  %vm3691_vm12 = vmor %vm3689_vm4, %vm3690_vm8 }
 0x792   : > { %6691 = vpow2.f32 %v6310_v43  ;;  %6315 = vmatmul.msk.f32.gmra.mxu2 %vm2014_vm0, %v3682_v55  ;;  %v3686_v59 = vsub.f32 1.0, %v3685_v39  ;;  %v3958_v60 = vmul.f32 %v8121_v54, %v8078_v18  ;;  %vm3963_vm10 = vweird.f32 %v8121_v54 }
 0x793   : > { %6693 = vrcp.f32 %v8124_v28  ;;  %v3950_v62 = vsel %vm3949_vm7, %v8082_v21, %v3946_v56  ;;  %v3613_v63 = vpop.f32.mrf.mxu0  ;;  %v3886_v0 = vpop.f32.mrf.mxu1  ;;  %vm8155_vm11 = vcmp.eq.f32.partialorder %v3966_v61, 8.507059e+37  ;;  %v3969_v17 = vor.u32 1.1754944e-38, %v3968_v6  ;;  %vm3964_vm5 = vmor %vm3962_vm6, %vm3963_vm10 }
 0x794   : > { %v3955_v57 = vsel %vm8101_vm1, %v3954_v45, %v3950_v62  ;;  %v3614_v7 = vadd.f32 %v3613_v63, %v3545_v52  ;;  %v3887_v4 = vadd.f32 %v3886_v0, %v3818_v58  ;;  %v3687_v5 = vmul.f32 %v8108_v46, %v3686_v59  ;;  %v3828_v62 = vpop.permute.xlu0 %3827  ;;  %v3555_v63 = vpop.permute.xlu2 %3554 }
 0x795   : > { %6323 = vmatmul.msk.f32.gmra.mxu3 %vm2014_vm0, %v3955_v57  ;;  %v3959_v51 = vsub.f32 1.0, %v3958_v60  ;;  %v3708_v14 = vand.u32 2147483647, %v8110_v29  ;;  %v3710_v23 = vand.u32 2147483648, %v8110_v29  ;;  %vm3704_vm13 = vweird.f32 %v8110_v29 }
 0x796   : > { %v6688_v9 = vpop.eup %6687  ;;  %v6295_v10 = vmul.f32 -1.442695, %v3614_v7  ;;  %v6311_v2 = vmul.f32 -1.442695, %v3887_v4  ;;  %6343 = vmatmul.msk.f32.gmra.mxu0 %vm2785_vm3, %v4216_v1  ;;  %6359 = vmatmul.msk.f32.gmra.mxu1 %vm2785_vm3, %v4216_v1  ;;  %v3688_v12 = vadd.f32 %v8108_v46, %v3687_v5  ;;  %vm3977_vm1 = vweird.f32 %v8124_v28  ;;  %v4218_v4 = vld [vmem:[%s8001_s9 + $0x78] sm:$0xff] }
 0x797   : > { %v8159_v15 = vpop.eup %6689  ;;  %v8161_v3 = vadd.f32 1.0, %v6688_v9  ;;  %v3960_v16 = vmul.f32 %v8121_v54, %v3959_v51  ;;  %vm8193_vm15 = vcmp.eq.f32.partialorder %v3708_v14, 8.507059e+37  ;;  %v3711_v42 = vor.u32 1.1754944e-38, %v3710_v23 }
 0x798   : > { %v6692_v19 = vpop.eup %6691  ;;  %6695 = vpow2.f32 %v6295_v10  ;;  %v3692_v21 = vsel %vm3691_vm12, %v8108_v46, %v3688_v12  ;;  %v3700_v22 = vmul.f32 %v8159_v15, %v8110_v29  ;;  %vm3705_vm14 = vweird.f32 %v8159_v15 }
 0x799   : > { %v8173_v24 = vpop.eup %6693  ;;  %6697 = vrcp.f32 %v8161_v3  ;;  %v8176_v11 = vadd.f32 1.0, %v6692_v19  ;;  %v3697_v26 = vsel %vm8147_vm9, %v3696_v50, %v3692_v21  ;;  %v3961_v27 = vadd.f32 %v8121_v54, %v3960_v16  ;;  %vm3706_vm2 = vmor %vm3704_vm13, %vm3705_vm14 }
 0x79a   : > { %6699 = vpow2.f32 %v6311_v2  ;;  %6316 = vmatmul.msk.f32.gmra.mxu2 %vm2014_vm0, %v3697_v26  ;;  %v3701_v30 = vsub.f32 1.0, %v3700_v22  ;;  %v3973_v31 = vmul.f32 %v8173_v24, %v8124_v28  ;;  %v3981_v44 = vand.u32 2147483647, %v8124_v28 }
 0x79b   : > { %6701 = vrcp.f32 %v8176_v11  ;;  %v3965_v32 = vsel %vm3964_vm5, %v8121_v54, %v3961_v27  ;;  %v3616_v33 = vpop.f32.mrf.mxu0  ;;  %v3889_v34 = vpop.f32.mrf.mxu1  ;;  %v3983_v49 = vand.u32 2147483648, %v8124_v28  ;;  %vm3978_vm4 = vweird.f32 %v8173_v24 }
 0x79c   : > { %v3970_v18 = vsel %vm8155_vm11, %v3969_v17, %v3965_v32  ;;  %v3617_v37 = vadd.f32 %v3616_v33, %v3550_v20  ;;  %v3890_v40 = vadd.f32 %v3889_v34, %v3823_v25  ;;  %v3702_v41 = vmul.f32 %v8159_v15, %v3701_v30  ;;  %vm3979_vm6 = vmor %vm3977_vm1, %vm3978_vm4 }
 0x79d   : > { %6324 = vmatmul.msk.f32.gmra.mxu3 %vm2014_vm0, %v3970_v18  ;;  %v3974_v43 = vsub.f32 1.0, %v3973_v31  ;;  %v3723_v53 = vand.u32 2147483647, %v8161_v3  ;;  %v3725_v58 = vand.u32 2147483648, %v8161_v3  ;;  %vm3982_vm7 = vcmp.eq.f32.partialorder %v3981_v44, 8.507059e+37 }
 0x79e   : > { %v6696_v45 = vpop.eup %6695  ;;  %v6296_v46 = vmul.f32 -1.442695, %v3617_v37  ;;  %v6312_v47 = vmul.f32 -1.442695, %v3890_v40  ;;  %6344 = vmatmul.msk.f32.gmra.mxu0 %vm2785_vm3, %v4217_v35  ;;  %6360 = vmatmul.msk.f32.gmra.mxu1 %vm2785_vm3, %v4217_v35  ;;  %v3703_v48 = vadd.f32 %v8159_v15, %v3702_v41  ;;  %v3984_v0 = vor.u32 1.1754944e-38, %v3983_v49 }
 0x79f   : > { %v8207_v52 = vpop.eup %6697  ;;  %v8209_v38 = vadd.f32 1.0, %v6696_v45  ;;  %v3975_v39 = vmul.f32 %v8173_v24, %v3974_v43  ;;  %vm3719_vm9 = vweird.f32 %v8161_v3  ;;  %vm8244_vm10 = vcmp.eq.f32.partialorder %v3723_v53, 8.507059e+37 }
 0x7a0   : > { %v6700_v54 = vpop.eup %6699  ;;  %6703 = vpow2.f32 %v6296_v46  ;;  %v3707_v55 = vsel %vm3706_vm2, %v8159_v15, %v3703_v48  ;;  %v3715_v56 = vmul.f32 %v8207_v52, %v8161_v3  ;;  %vm3720_vm8 = vweird.f32 %v8207_v52 }
 0x7a1   : > { %v8222_v59 = vpop.eup %6701  ;;  %6705 = vrcp.f32 %v8209_v38  ;;  %v8225_v29 = vadd.f32 1.0, %v6700_v54  ;;  %v3712_v60 = vsel %vm8193_vm15, %v3711_v42, %v3707_v55  ;;  %v3976_v61 = vadd.f32 %v8173_v24, %v3975_v39  ;;  %vm3721_vm11 = vmor %vm3719_vm9, %vm3720_vm8 }
 0x7a2   : > { %6707 = vpow2.f32 %v6312_v47  ;;  %6317 = vmatmul.msk.f32.gmra.mxu2 %vm2014_vm0, %v3712_v60  ;;  %v3716_v1 = vsub.f32 1.0, %v3715_v56  ;;  %v3988_v5 = vmul.f32 %v8222_v59, %v8176_v11  ;;  %v3726_v10 = vor.u32 1.1754944e-38, %v3725_v58 }
 0x7a3   : > { %6709 = vrcp.f32 %v8225_v29  ;;  %v3980_v6 = vsel %vm3979_vm6, %v8173_v24, %v3976_v61  ;;  %v3619_v57 = vpop.f32.mrf.mxu0  ;;  %v3892_v7 = vpop.f32.mrf.mxu1  ;;  %v3998_v17 = vand.u32 2147483648, %v8176_v11  ;;  %vm3993_vm12 = vweird.f32 %v8222_v59 }
 0x7a4   : > { %v3985_v8 = vsel %vm3982_vm7, %v3984_v0, %v3980_v6  ;;  %v3620_v50 = vadd.f32 %v3619_v57, %v3555_v63  ;;  %v3893_v51 = vadd.f32 %v3892_v7, %v3828_v62  ;;  %v3717_v28 = vmul.f32 %v8207_v52, %v3716_v1 }
 0x7a5   : > { %6325 = vmatmul.msk.f32.gmra.mxu3 %vm2014_vm0, %v3985_v8  ;;  %v3989_v2 = vsub.f32 1.0, %v3988_v5  ;;  %v3996_v20 = vand.u32 2147483647, %v8176_v11  ;;  %vm3992_vm5 = vweird.f32 %v8176_v11  ;;  %v3999_v30 = vor.u32 1.1754944e-38, %v3998_v17 }
 0x7a6   : > { %v6704_v12 = vpop.eup %6703  ;;  %v6297_v13 = vmul.f32 -1.442695, %v3620_v50  ;;  %v6313_v15 = vmul.f32 -1.442695, %v3893_v51  ;;  %6345 = vmatmul.msk.f32.gmra.mxu0 %vm2785_vm3, %v4218_v4  ;;  %6361 = vmatmul.msk.f32.gmra.mxu1 %vm2785_vm3, %v4218_v4  ;;  %v3718_v16 = vadd.f32 %v8207_v52, %v3717_v28  ;;  %vm3994_vm13 = vmor %vm3992_vm5, %vm3993_vm12  ;;  %v3740_v11 = vand.u32 2147483648, %v8209_v38 }
 0x7a7   : > { %v6706_v14 = vpop.eup %6705  ;;  %v8252_v19 = vadd.f32 1.0, %v6704_v12  ;;  %v3990_v3 = vmul.f32 %v8222_v59, %v3989_v2  ;;  %vm3997_vm14 = vcmp.eq.f32.partialorder %v3996_v20, 8.507059e+37  ;;  %v3738_v37 = vand.u32 2147483647, %v8209_v38 }
 0x7a8   : > { %v6708_v21 = vpop.eup %6707  ;;  %6711 = vpow2.f32 %v6297_v13  ;;  %v3722_v22 = vsel %vm3721_vm11, %v8207_v52, %v3718_v16  ;;  %v3730_v23 = vmul.f32 %v6706_v14, %v8209_v38  ;;  %vm3735_vm15 = vweird.f32 %v6706_v14 }
 0x7a9   : > { %v6710_v24 = vpop.eup %6709  ;;  %6713 = vrcp.f32 %v8252_v19  ;;  %v8263_v26 = vadd.f32 1.0, %v6708_v21  ;;  %v3727_v27 = vsel %vm8244_vm10, %v3726_v10, %v3722_v22  ;;  %v3991_v25 = vadd.f32 %v8222_v59, %v3990_v3 }
 0x7aa   : > { %6715 = vpow2.f32 %v6313_v15  ;;  %6318 = vmatmul.msk.f32.gmra.mxu2 %vm2014_vm0, %v3727_v27  ;;  %v3731_v31 = vsub.f32 1.0, %v3730_v23  ;;  %v4003_v35 = vmul.f32 %v6710_v24, %v8225_v29  ;;  %vm3734_vm1 = vweird.f32 %v8209_v38 }
 0x7ab   : > { %6717 = vrcp.f32 %v8263_v26  ;;  %v3995_v32 = vsel %vm3994_vm13, %v8222_v59, %v3991_v25  ;;  %v8272_v33 = vpop.f32.mrf.mxu0  ;;  %v8274_v34 = vpop.f32.mrf.mxu1  ;;  %v3741_v43 = vor.u32 1.1754944e-38, %v3740_v11  ;;  %v4013_v44 = vand.u32 2147483648, %v8225_v29  ;;  %vm3736_vm2 = vmor %vm3734_vm1, %vm3735_vm15 }
 0x7ac   : > { %v4000_v36 = vsel %vm3997_vm14, %v3999_v30, %v3995_v32  ;;  %v3732_v18 = vmul.f32 %v6706_v14, %v3731_v31  ;;  %v4004_v40 = vsub.f32 1.0, %v4003_v35  ;;  %vm4008_vm4 = vweird.f32 %v6710_v24 }
 0x7ad   : > { %6326 = vmatmul.msk.f32.gmra.mxu3 %vm2014_vm0, %v4000_v36  ;;  %v4011_v48 = vand.u32 2147483647, %v8225_v29  ;;  %vm3739_vm6 = vcmp.eq.f32.partialorder %v3738_v37, 8.507059e+37  ;;  %vm4007_vm7 = vweird.f32 %v8225_v29  ;;  %v4014_v56 = vor.u32 1.1754944e-38, %v4013_v44 }
 0x7ae   : > { %v6712_v41 = vpop.eup %6711  ;;  %v3733_v42 = vadd.f32 %v6706_v14, %v3732_v18  ;;  %v4005_v47 = vmul.f32 %v6710_v24, %v4004_v40  ;;  %vm4009_vm8 = vmor %vm4007_vm7, %vm4008_vm4  ;;  %v3753_v59 = vand.u32 2147483647, %v8252_v19  ;;  %v3755_v63 = vand.u32 2147483648, %v8252_v19 }
 0x7af   : > { %v6714_v45 = vpop.eup %6713  ;;  %v8281_v46 = vadd.f32 1.0, %v6712_v41  ;;  %vm4012_vm9 = vcmp.eq.f32.partialorder %v4011_v48, 8.507059e+37  ;;  %vm3749_vm11 = vweird.f32 %v8252_v19  ;;  %v4028_v57 = vand.u32 2147483648, %v8263_v26 }
 0x7b0   : > { %v6716_v49 = vpop.eup %6715  ;;  %v3737_v52 = vsel %vm3736_vm2, %v6706_v14, %v3733_v42  ;;  %v3745_v39 = vmul.f32 %v6714_v45, %v8252_v19  ;;  %v4006_v55 = vadd.f32 %v6710_v24, %v4005_v47  ;;  %vm3750_vm10 = vweird.f32 %v6714_v45 }
 0x7b1   : > { %v6718_v53 = vpop.eup %6717  ;;  %6719 = vrcp.f32 %v8281_v46  ;;  %v8287_v38 = vadd.f32 1.0, %v6716_v49  ;;  %v3742_v54 = vsel %vm3739_vm6, %v3741_v43, %v3737_v52  ;;  %v4026_v5 = vand.u32 2147483647, %v8263_v26  ;;  %vm3751_vm5 = vmor %vm3749_vm11, %vm3750_vm10 }
 0x7b2   : > { %6319 = vmatmul.msk.f32.gmra.mxu2 %vm2014_vm0, %v3742_v54  ;;  %v3746_v58 = vsub.f32 1.0, %v3745_v39  ;;  %v4018_v60 = vmul.f32 %v6718_v53, %v8263_v26  ;;  %v4010_v29 = vsel %vm4009_vm8, %v6710_v24, %v4006_v55  ;;  %vm4023_vm12 = vweird.f32 %v6718_v53 }
 0x7b3   : > { %6721 = vrcp.f32 %v8287_v38  ;;  %v8293_v61 = vpop.f32.mrf.mxu0  ;;  %v8295_v62 = vpop.f32.mrf.mxu1  ;;  %v4015_v0 = vsel %vm4012_vm9, %v4014_v56, %v4010_v29  ;;  %vm3754_vm13 = vcmp.eq.f32.partialorder %v3753_v59, 8.507059e+37  ;;  %v3756_v50 = vor.u32 1.1754944e-38, %v3755_v63 }
 0x7b4   : > { %v3747_v1 = vmul.f32 %v6714_v45, %v3746_v58  ;;  %v4019_v6 = vsub.f32 1.0, %v4018_v60  ;;  %vm4022_vm14 = vweird.f32 %v8263_v26  ;;  %v4029_v12 = vor.u32 1.1754944e-38, %v4028_v57  ;;  %v6851_v60 = vld [vmem:[%s7837_s13] sm:$0xff] }
 0x7b5   : > { %6327 = vmatmul.msk.f32.gmra.mxu3 %vm2014_vm0, %v4015_v0  ;;  %vm4024_vm15 = vmor %vm4022_vm14, %vm4023_vm12  ;;  %vm4027_vm1 = vcmp.eq.f32.partialorder %v4026_v5, 8.507059e+37  ;;  %v3770_v3 = vand.u32 2147483648, %v8281_v46  ;;  %v3768_v21 = vand.u32 2147483647, %v8281_v46  ;;  %vm3764_vm4 = vweird.f32 %v8281_v46 }
 0x7b6   : > { %v3748_v7 = vadd.f32 %v6714_v45, %v3747_v1  ;;  %v4020_v4 = vmul.f32 %v6718_v53, %v4019_v6  ;;  %v4043_v23 = vand.u32 2147483648, %v8287_v38  ;;  %v4041_v27 = vand.u32 2147483647, %v8287_v38 }
 0x7b7   : > { %v6720_v8 = vpop.eup %6719  ;;  %v3771_v25 = vor.u32 1.1754944e-38, %v3770_v3  ;;  %vm3769_vm8 = vcmp.eq.f32.partialorder %v3768_v21, 8.507059e+37  ;;  %vm4037_vm9 = vweird.f32 %v8287_v38 }
 0x7b8   : > { %v3752_v51 = vsel %vm3751_vm5, %v6714_v45, %v3748_v7  ;;  %v4021_v28 = vadd.f32 %v6718_v53, %v4020_v4  ;;  %v3760_v9 = vmul.f32 %v6720_v8, %v8281_v46  ;;  %vm3765_vm2 = vweird.f32 %v6720_v8  ;;  %v6852_v7 = vld [vmem:[%s7837_s13 + $0x8] sm:$0xff] }
 0x7b9   : > { %v6722_v10 = vpop.eup %6721  ;;  %v3757_v2 = vsel %vm3754_vm13, %v3756_v50, %v3752_v51  ;;  %vm3766_vm7 = vmor %vm3764_vm4, %vm3765_vm2  ;;  %v4044_v32 = vor.u32 1.1754944e-38, %v4043_v23  ;;  %vm4042_vm11 = vcmp.eq.f32.partialorder %v4041_v27, 8.507059e+37  ;;  %v6855_v23 = vld [vmem:[%s7837_s13 + $0x20] sm:$0xff] }
 0x7ba   : > { %6320 = vmatmul.msk.f32.gmra.mxu2 %vm2014_vm0, %v3757_v2  ;;  %v4025_v13 = vsel %vm4024_vm15, %v6718_v53, %v4021_v28  ;;  %v3761_v15 = vsub.f32 1.0, %v3760_v9  ;;  %v4033_v16 = vmul.f32 %v6722_v10, %v8287_v38  ;;  %vm4038_vm6 = vweird.f32 %v6722_v10  ;;  %v6853_v9 = vld [vmem:[%s7837_s13 + $0x10] sm:$0xff] }
 0x7bb   : > { %v4030_v17 = vsel %vm4027_vm1, %v4029_v12, %v4025_v13  ;;  %v8306_v14 = vpop.f32.mrf.mxu0  ;;  %v8308_v19 = vpop.f32.mrf.mxu1  ;;  %vm4039_vm10 = vmor %vm4037_vm9, %vm4038_vm6 }
 0x7bc   : > { %v3762_v20 = vmul.f32 %v6720_v8, %v3761_v15  ;;  %v4034_v22 = vsub.f32 1.0, %v4033_v16 }
 0x7bd   : > { %6328 = vmatmul.msk.f32.gmra.mxu3 %vm2014_vm0, %v4030_v17  ;;  %v6854_v17 = vld [vmem:[%s7837_s13 + $0x18] sm:$0xff] }
 0x7be   : > { %v3763_v24 = vadd.f32 %v6720_v8, %v3762_v20  ;;  %v4035_v26 = vmul.f32 %v6722_v10, %v4034_v22 }
 0x7c0   : > { %v3767_v30 = vsel %vm3766_vm7, %v6720_v8, %v3763_v24  ;;  %v4036_v31 = vadd.f32 %v6722_v10, %v4035_v26 }
 0x7c1   : > { %v3772_v11 = vsel %vm3769_vm8, %v3771_v25, %v3767_v30  ;;  %v6856_v30 = vld [vmem:[%s7837_s13 + $0x28] sm:$0xff] }
 0x7c2   : > { %6321 = vmatmul.msk.f32.gmra.mxu2 %vm2014_vm0, %v3772_v11  ;;  %v4040_v35 = vsel %vm4039_vm10, %v6722_v10, %v4036_v31 }
 0x7c3   : > { %v4045_v36 = vsel %vm4042_vm11, %v4044_v32, %v4040_v35  ;;  %v8318_v18 = vpop.f32.mrf.mxu0  ;;  %v8320_v37 = vpop.f32.mrf.mxu1 }
 0x7c5   : > { %6329 = vmatmul.msk.f32.gmra.mxu3 %vm2014_vm0, %v4045_v36  ;;  %v6857_v36 = vld [vmem:[%s7837_s13 + $0x30] sm:$0xff] }
 0x7cb   : > { %v8323_v40 = vpop.f32.mrf.mxu0  ;;  %v8325_v41 = vpop.f32.mrf.mxu1 }
 0x7d3   : > { %v8327_v42 = vpop.f32.mrf.mxu0  ;;  %v8329_v43 = vpop.f32.mrf.mxu1 }
 0x7db   : > { %v8331_v44 = vpop.f32.mrf.mxu0  ;;  %v8333_v45 = vpop.f32.mrf.mxu1 }
 0x7e3   : > { %v8335_v46 = vpop.f32.mrf.mxu0  ;;  %v8337_v47 = vpop.f32.mrf.mxu1 }
 0x7eb   : > { %v4316_v48 = vpop.f32.mrf.mxu0  ;;  %v4389_v49 = vpop.f32.mrf.mxu1 }
 0x7f3   : > { %v4319_v52 = vpop.f32.mrf.mxu0  ;;  %v4392_v39 = vpop.f32.mrf.mxu1 }
 0x7fb   : > { %v4322_v53 = vpop.f32.mrf.mxu0  ;;  %v4395_v38 = vpop.f32.mrf.mxu1 }
 0x803   : > { %v4325_v54 = vpop.f32.mrf.mxu0  ;;  %v4398_v55 = vpop.f32.mrf.mxu1 }
 0x80b   : > { %v4328_v56 = vpop.f32.mrf.mxu0  ;;  %v4401_v58 = vpop.f32.mrf.mxu1 }
 0x80d   : > { %v4089_v59 = vpop.f32.mrf.mxu2 }
 0x80e   : > { %v4179_v29 = vmul.f32 %v6851_v60, %v4089_v59  ;;  %v4155_v63 = vpop.f32.mrf.mxu3  ;;  %v4471_v59 = vld [vmem:[%s9325_s1 + $0x8] sm:$0xff] }
 0x80f   : > { %v5000_v60 = vld [vmem:[%s9326_s12 + $0x8] sm:$0xff] }
 0x810   : > { %v4187_v0 = vmul.f32 %v4179_v29, %v4155_v63  ;;  %v4472_v29 = vld [vmem:[%s9325_s1 + $0x10] sm:$0xff] }
 0x811   : > { %v5001_v63 = vld [vmem:[%s9326_s12 + $0x10] sm:$0xff] }
 0x812   : > { %4195 = vst.msk [vmem:[%s8341_s10] sm:$0xff] %vm2785_vm3, %v4187_v0  ;;  %v4473_v0 = vld [vmem:[%s9325_s1 + $0x18] sm:$0xff] }
 0x813   : > { %v4331_v1 = vpop.f32.mrf.mxu0  ;;  %v4404_v6 = vpop.f32.mrf.mxu1 }
 0x815   : > { %v4092_v57 = vpop.f32.mrf.mxu2 }
 0x816   : > { %v4180_v4 = vmul.f32 %v6852_v7, %v4092_v57  ;;  %v5003_v57 = vld [vmem:[%s9326_s12 + $0x20] sm:$0xff] }
 0x818   : > { %v4158_v5 = vpop.f32.mrf.mxu3 }
 0x819   : > { %v4188_v8 = vmul.f32 %v4180_v4, %v4158_v5  ;;  %v4475_v5 = vld [vmem:[%s9325_s1 + $0x28] sm:$0xff] }
 0x81b   : > { %4196 = vst.msk [vmem:[%s8341_s10 + $0x8] sm:$0xff] %vm2785_vm3, %v4188_v8  ;;  %v4334_v50 = vpop.f32.mrf.mxu0  ;;  %v4407_v51 = vpop.f32.mrf.mxu1  ;;  %v5004_v8 = vld [vmem:[%s9326_s12 + $0x28] sm:$0xff] }
 0x81d   : > { %v4095_v28 = vpop.f32.mrf.mxu2 }
 0x81e   : > { %v4181_v10 = vmul.f32 %v6853_v9, %v4095_v28  ;;  %v4477_v28 = vld [vmem:[%s9325_s1 + $0x38] sm:$0xff] }
 0x81f   : > { %v5006_v9 = vld [vmem:[%s9326_s12 + $0x38] sm:$0xff] }
 0x820   : > { %v4161_v2 = vpop.f32.mrf.mxu3 }
 0x821   : > { %v4189_v12 = vmul.f32 %v4181_v10, %v4161_v2  ;;  %v4478_v10 = vld [vmem:[%s9325_s1 + $0x40] sm:$0xff] }
 0x822   : > { %v5007_v2 = vld [vmem:[%s9326_s12 + $0x40] sm:$0xff] }
 0x823   : > { %4197 = vst.msk [vmem:[%s8341_s10 + $0x10] sm:$0xff] %vm2785_vm3, %v4189_v12  ;;  %v4337_v13 = vpop.f32.mrf.mxu0  ;;  %v4410_v15 = vpop.f32.mrf.mxu1  ;;  %v4479_v12 = vld [vmem:[%s9325_s1 + $0x48] sm:$0xff] }
 0x824   : > { %4420 = vmatpush.msrb.mxu2 %v4337_v13  ;;  %4440 = vmatpush.msrb.mxu3 %v4410_v15  ;;  %v5008_v13 = vld [vmem:[%s9326_s12 + $0x48] sm:$0xff]  ;;  %v4480_v15 = vld [vmem:[%s9325_s1 + $0x50] sm:$0xff] }
 0x825   : > { %v4098_v16 = vpop.f32.mrf.mxu2 }
 0x826   : > { %v4182_v3 = vmul.f32 %v6854_v17, %v4098_v16  ;;  %4421 = vmatpush.msrb.mxu2 %v4334_v50  ;;  %4441 = vmatpush.msrb.mxu3 %v4407_v51  ;;  %v4476_v50 = vld [vmem:[%s9325_s1 + $0x30] sm:$0xff]  ;;  %v4481_v17 = vld [vmem:[%s9325_s1 + $0x58] sm:$0xff] }
 0x827   : > { %v5005_v51 = vld [vmem:[%s9326_s12 + $0x30] sm:$0xff] }
 0x828   : > { %v4164_v20 = vpop.f32.mrf.mxu3  ;;  %4422 = vmatpush.msrb.mxu2 %v4331_v1  ;;  %4442 = vmatpush.msrb.mxu3 %v4404_v6  ;;  %v5002_v1 = vld [vmem:[%s9326_s12 + $0x18] sm:$0xff]  ;;  %v4474_v6 = vld [vmem:[%s9325_s1 + $0x20] sm:$0xff]  ;;  %v5009_v16 = vld [vmem:[%s9326_s12 + $0x50] sm:$0xff] }
 0x829   : > { %v4190_v21 = vmul.f32 %v4182_v3, %v4164_v20  ;;  %v5010_v3 = vld [vmem:[%s9326_s12 + $0x58] sm:$0xff]  ;;  %v4482_v20 = vld [vmem:[%s9325_s1 + $0x60] sm:$0xff] }
 0x82a   : > { %4423 = vmatpush.msrb.mxu2 %v4328_v56  ;;  %4443 = vmatpush.msrb.mxu3 %v4401_v58  ;;  %v4470_v56 = vld [vmem:[%s9325_s1] sm:$0xff] }
 0x82b   : > { %4198 = vst.msk [vmem:[%s8341_s10 + $0x18] sm:$0xff] %vm2785_vm3, %v4190_v21  ;;  %v4999_v58 = vld [vmem:[%s9326_s12] sm:$0xff] }
 0x82c   : > { %4424 = vmatpush.msrb.mxu2 %v4325_v54  ;;  %4444 = vmatpush.msrb.mxu3 %v4398_v55  ;;  %v5011_v21 = vld [vmem:[%s9326_s12 + $0x60] sm:$0xff] }
 0x82d   : > { %v4101_v22 = vpop.f32.mrf.mxu2 }
 0x82e   : > { %v4183_v24 = vmul.f32 %v6855_v23, %v4101_v22  ;;  %4425 = vmatpush.msrb.mxu2 %v4322_v53  ;;  %4445 = vmatpush.msrb.mxu3 %v4395_v38  ;;  %v4483_v22 = vld [vmem:[%s9325_s1 + $0x68] sm:$0xff] }
 0x82f   : > { %v5012_v23 = vld [vmem:[%s9326_s12 + $0x68] sm:$0xff] }
 0x830   : > { %v4167_v26 = vpop.f32.mrf.mxu3  ;;  %4426 = vmatpush.msrb.mxu2 %v4319_v52  ;;  %4446 = vmatpush.msrb.mxu3 %v4392_v39 }
 0x831   : > { %v4191_v27 = vmul.f32 %v4183_v24, %v4167_v26  ;;  %v4484_v24 = vld [vmem:[%s9325_s1 + $0x70] sm:$0xff] }
 0x832   : > { %4427 = vmatpush.msrb.mxu2 %v4316_v48  ;;  %4447 = vmatpush.msrb.mxu3 %v4389_v49  ;;  %v5013_v26 = vld [vmem:[%s9326_s12 + $0x70] sm:$0xff] }
 0x833   : > { %4199 = vst.msk [vmem:[%s8341_s10 + $0x20] sm:$0xff] %vm2785_vm3, %v4191_v27  ;;  %v4485_v27 = vld [vmem:[%s9325_s1 + $0x78] sm:$0xff]  ;;  %s9366_s1 = sshll.u32 %s7504_s18, 7 }
 0x834   : > { %4428 = vmatpush.msrb.mxu2 %v8335_v46  ;;  %4448 = vmatpush.msrb.mxu3 %v8337_v47 }
 0x835   : > { %v4104_v25 = vpop.f32.mrf.mxu2 }
 0x836   : > { %v4184_v31 = vmul.f32 %v6856_v30, %v4104_v25  ;;  %4429 = vmatpush.msrb.mxu2 %v8331_v44  ;;  %4449 = vmatpush.msrb.mxu3 %v8333_v45  ;;  %v5014_v25 = vld [vmem:[%s9326_s12 + $0x78] sm:$0xff]  ;;  %v4505_v30 = vpop.permute.xlu2 %4504  ;;  %s9019_s12 = scalar_lea.vmem %s9365_s25, %s9366_s1 }
 0x838   : > { %v4170_v11 = vpop.f32.mrf.mxu3  ;;  %4430 = vmatpush.msrb.mxu2 %v8327_v42  ;;  %4450 = vmatpush.msrb.mxu3 %v8329_v43 }
 0x839   : > { %v4192_v32 = vmul.f32 %v4184_v31, %v4170_v11  ;;  %v5034_v31 = vpop.permute.xlu0 %5033 }
 0x83a   : > { %4431 = vmatpush.msrb.mxu2 %v8323_v40  ;;  %4451 = vmatpush.msrb.mxu3 %v8325_v41  ;;  %v4413_v40 = vld [vmem:[%s9324_s7] sm:$0xff]  ;;  %s9328_s7 = sld [smem:[#allocation65_spill]] }
 0x83b   : > { %4200 = vst.msk [vmem:[%s8341_s10 + $0x28] sm:$0xff] %vm2785_vm3, %v4192_v32 }
 0x83c   : > { %4432 = vmatpush.msrb.mxu2 %v8318_v18  ;;  %4452 = vmatpush.msrb.mxu3 %v8320_v37 }
 0x83d   : > { %v4107_v35 = vpop.f32.mrf.mxu2 }
 0x83e   : > { %v4185_v44 = vmul.f32 %v6857_v36, %v4107_v35  ;;  %4433 = vmatpush.msrb.mxu2 %v8306_v14  ;;  %4453 = vmatpush.msrb.mxu3 %v8308_v19  ;;  %v6858_v14 = vld [vmem:[%s7837_s13 + $0x38] sm:$0xff]  ;;  %s9327_s13 = sld [smem:[#allocation64_spill]] }
 0x840   : > { %v4173_v42 = vpop.f32.mrf.mxu3  ;;  %4434 = vmatpush.msrb.mxu2 %v8293_v61  ;;  %4454 = vmatpush.msrb.mxu3 %v8295_v62  ;;  %v4418_v61 = vpop.permute.xlu1 %4417  ;;  %v5642_v4 = vld [vmem:[%s9328_s7] sm:$0xff]  ;;  %s5869_s7 = sshll.u32 %s7936_s4, 4  ;;  %s5809_s4 = sand.u32 1, %s7421_s0   ;;  %s9024_s7 = int_to_ptr.vmem [resolvable:$true] %s5869_s7 }
 0x841   : > { %v4193_v41 = vmul.f32 %v4185_v44, %v4173_v42  ;;  %5706 = vmatpush.msra.mxu1 %v5642_v4  ;;  %s9032_s1 = scalar_lea.sflag [#allocation5], %s5809_s4 }
 0x842   : > { %4435 = vmatpush.msrb.mxu2 %v8272_v33  ;;  %4455 = vmatpush.msrb.mxu3 %v8274_v34 }
 0x843   : > { %4201 = vst.msk [vmem:[%s8341_s10 + $0x30] sm:$0xff] %vm2785_vm3, %v4193_v41  ;;  %4436 = vmatmul.f32.vlgmr.msrb.gmra.mxu2 %v4413_v40  ;;  %4456 = vmatmul.f32.vlgmr.msrb.gmra.mxu3 %v4413_v40  ;;  %v5039_v41 = vpop.permute.xlu2 %5038 }
 0x844   : > { %v5528_v7 = vld [vmem:[%s9327_s13] sm:$0xff]  ;;  %s5852_s13 = sshll.u32 %s7794_s5, 4  ;;  %s6479_s5 = sshll.u32 %s7421_s0, 5  ;;  %s9022_s13 = int_to_ptr.vmem [resolvable:$true] %s5852_s13 }
 0x845   : > { %v4110_v18 = vpop.f32.mrf.mxu2  ;;  %5592 = vmatpush.msra.mxu0 %v5528_v7  ;;  %s5851_s20 = scalar_lea.hbm %s9255_s17, %s6479_s5 }
 0x846   : > { %v4186_v37 = vmul.f32 %v6858_v14, %v4110_v18  ;;  %s5854_s18 = sshll.u32 %s5851_s20, 4  ;;  %s5855_s18 = int_to_ptr.hbm [resolvable:$true] %s5854_s18 }
 0x847   : > { %s6889_s14 = sshra.s32 %s5855_s18, 4  ;;  %s6890_s14 = int_to_ptr.hbm [resolvable:$true] %s6889_s14 }
 0x848   : > { %v4176_v19 = vpop.f32.mrf.mxu3  ;;  %v4510_v40 = vpop.permute.xlu1 %4509  ;;  %s6891_s21 = scalar_lea.hbm %s6890_s14, 32  ;;  %p6896_p0 = scmp.lt.s32.totalorder %s6890_s14, %s9255_s17 }
 0x849   : > { %v4194_v43 = vmul.f32 %v4186_v37, %v4176_v19  ;;  %p6892_p11 = scmp.ne.s32.totalorder %s6890_s14, %s6891_s21  ;;  %p6897_p1 = scmp.lt.s32.totalorder %s6895_s24, %s6891_s21 }
 0x84b   : > { %4202 = vst.msk [vmem:[%s8341_s10 + $0x38] sm:$0xff] %vm2785_vm3, %v4194_v43  ;;  %p6893_p12 = pnand %p6892_p11, %p7440_p5  ;;  %p6898_p2 = por %p6897_p1, %p6896_p0 }
 0x84d   : > { %p6894_p13 = pneg %p6893_p12 }
 0x84f   : > { %p6899_p3 = pnand %p6898_p2, %p6894_p13 }
 0x8c6   : > { %v4437_v62 = vpop.f32.mrf.mxu2  ;;  %v4457_v45 = vpop.f32.mrf.mxu3 }
 0x8c7   : > { %v4438_v46 = vadd.f32 %v4437_v62, %v4418_v61  ;;  %v4458_v33 = vadd.f32 %v4457_v45, %v4418_v61 }
 0x8c9   : > { %v4460_v47 = vadd.f32 3.0, %v4438_v46  ;;  %v4465_v34 = vadd.f32 3.0, %v4458_v33 }
 0x8cb   : > { %v4461_v48 = vmax.f32 %v4460_v47, 0.0  ;;  %v4466_v49 = vmax.f32 %v4465_v34, 0.0  ;;  %v5044_v34 = vpop.permute.xlu1 %5043 }
 0x8cd   : > { %v4462_v52 = vmin.f32 %v4461_v48, 6.0  ;;  %v4467_v39 = vmin.f32 %v4466_v49, 6.0 }
 0x8cf   : > { %v4463_v53 = vmul.f32 %v4462_v52, %v4438_v46  ;;  %v4468_v38 = vmul.f32 %v4467_v39, %v4458_v33  ;;  %v4515_v33 = vpop.permute.xlu0 %4514 }
 0x8d1   : > { %v4464_v54 = vmul.f32 0.16666667, %v4463_v53  ;;  %v4469_v55 = vmul.f32 0.16666667, %v4468_v38 }
 0x8d3   : > { %4645 = vmatpush.msra.mxu2 %v4464_v54  ;;  %5174 = vmatpush.msra.mxu3 %v4469_v55 }
 0x8d4   : > { %6362 = vmatmul.msk.f32.vlgmr.msra.gmra.mxu2 %vm2014_vm0, %v4470_v56  ;;  %6394 = vmatmul.msk.f32.vlgmr.msra.gmra.mxu3 %vm2014_vm0, %v4999_v58 }
 0x8d7   : > { %v5049_v7 = vpop.permute.xlu0 %5048 }
 0x8dc   : > { %6363 = vmatmul.msk.f32.gmra.mxu2 %vm2014_vm0, %v4471_v59  ;;  %6395 = vmatmul.msk.f32.gmra.mxu3 %vm2014_vm0, %v5000_v60 }
 0x8e4   : > { %6364 = vmatmul.msk.f32.gmra.mxu2 %vm2014_vm0, %v4472_v29  ;;  %6396 = vmatmul.msk.f32.gmra.mxu3 %vm2014_vm0, %v5001_v63  ;;  %v4520_v29 = vpop.permute.xlu2 %4519 }
 0x8ec   : > { %6365 = vmatmul.msk.f32.gmra.mxu2 %vm2014_vm0, %v4473_v0  ;;  %6397 = vmatmul.msk.f32.gmra.mxu3 %vm2014_vm0, %v5002_v1 }
 0x8f4   : > { %6366 = vmatmul.msk.f32.gmra.mxu2 %vm2014_vm0, %v4474_v6  ;;  %6398 = vmatmul.msk.f32.gmra.mxu3 %vm2014_vm0, %v5003_v57 }
 0x8fc   : > { %6367 = vmatmul.msk.f32.gmra.mxu2 %vm2014_vm0, %v4475_v5  ;;  %6399 = vmatmul.msk.f32.gmra.mxu3 %vm2014_vm0, %v5004_v8 }
 0x904   : > { %6368 = vmatmul.msk.f32.gmra.mxu2 %vm2014_vm0, %v4476_v50  ;;  %6400 = vmatmul.msk.f32.gmra.mxu3 %vm2014_vm0, %v5005_v51 }
 0x90c   : > { %6369 = vmatmul.msk.f32.gmra.mxu2 %vm2014_vm0, %v4477_v28  ;;  %6401 = vmatmul.msk.f32.gmra.mxu3 %vm2014_vm0, %v5006_v9 }
 0x914   : > { %6370 = vmatmul.msk.f32.gmra.mxu2 %vm2014_vm0, %v4478_v10  ;;  %6402 = vmatmul.msk.f32.gmra.mxu3 %vm2014_vm0, %v5007_v2 }
 0x91c   : > { %6371 = vmatmul.msk.f32.gmra.mxu2 %vm2014_vm0, %v4479_v12  ;;  %6403 = vmatmul.msk.f32.gmra.mxu3 %vm2014_vm0, %v5008_v13 }
 0x924   : > { %6372 = vmatmul.msk.f32.gmra.mxu2 %vm2014_vm0, %v4480_v15  ;;  %6404 = vmatmul.msk.f32.gmra.mxu3 %vm2014_vm0, %v5009_v16 }
 0x92c   : > { %6373 = vmatmul.msk.f32.gmra.mxu2 %vm2014_vm0, %v4481_v17  ;;  %6405 = vmatmul.msk.f32.gmra.mxu3 %vm2014_vm0, %v5010_v3 }
 0x934   : > { %6374 = vmatmul.msk.f32.gmra.mxu2 %vm2014_vm0, %v4482_v20  ;;  %6406 = vmatmul.msk.f32.gmra.mxu3 %vm2014_vm0, %v5011_v21 }
 0x93c   : > { %6375 = vmatmul.msk.f32.gmra.mxu2 %vm2014_vm0, %v4483_v22  ;;  %6407 = vmatmul.msk.f32.gmra.mxu3 %vm2014_vm0, %v5012_v23 }
 0x944   : > { %6376 = vmatmul.msk.f32.gmra.mxu2 %vm2014_vm0, %v4484_v24  ;;  %6408 = vmatmul.msk.f32.gmra.mxu3 %vm2014_vm0, %v5013_v26 }
 0x94c   : > { %6377 = vmatmul.msk.f32.gmra.mxu2 %vm2014_vm0, %v4485_v27  ;;  %6409 = vmatmul.msk.f32.gmra.mxu3 %vm2014_vm0, %v5014_v25 }
 0x957   : > { %v4647_v11 = vpop.f32.mrf.mxu2  ;;  %v5176_v32 = vpop.f32.mrf.mxu3 }
 0x958   : > { %v4648_v35 = vadd.f32 %v4647_v11, %v4505_v30  ;;  %v5177_v36 = vadd.f32 %v5176_v32, %v5034_v31  ;;  %v4525_v31 = vpop.permute.xlu1 %4524 }
 0x95a   : > { %v6378_v44 = vmul.f32 -1.442695, %v4648_v35  ;;  %v6410_v42 = vmul.f32 -1.442695, %v5177_v36 }
 0x95c   : > { %6723 = vpow2.f32 %v6378_v44 }
 0x95d   : > { %6725 = vpow2.f32 %v6410_v42 }
 0x95f   : > { %v4650_v18 = vpop.f32.mrf.mxu2  ;;  %v5179_v14 = vpop.f32.mrf.mxu3 }
 0x960   : > { %v4651_v37 = vadd.f32 %v4650_v18, %v4510_v40  ;;  %v5180_v19 = vadd.f32 %v5179_v14, %v5039_v41  ;;  %v5054_v18 = vpop.permute.xlu2 %5053  ;;  %v5059_v8 = vpop.permute.xlu1 %5058 }
 0x962   : > { %v6724_v43 = vpop.eup %6723  ;;  %v6379_v61 = vmul.f32 -1.442695, %v4651_v37  ;;  %v6411_v46 = vmul.f32 -1.442695, %v5180_v19 }
 0x963   : > { %v6726_v62 = vpop.eup %6725  ;;  %v4743_v45 = vadd.f32 1.0, %v6724_v43 }
 0x964   : > { %v8449_v47 = vadd.f32 1.0, %v6726_v62  ;;  %6727 = vpow2.f32 %v6379_v61 }
 0x965   : > { %6729 = vrcp.f32 %v4743_v45  ;;  %v4768_v55 = vand.u32 2147483647, %v4743_v45  ;;  %v4770_v59 = vand.u32 2147483648, %v4743_v45  ;;  %vm4764_vm12 = vweird.f32 %v4743_v45 }
 0x966   : > { %6731 = vrcp.f32 %v8449_v47  ;;  %vm5293_vm5 = vweird.f32 %v8449_v47  ;;  %v5297_v6 = vand.u32 2147483647, %v8449_v47  ;;  %v5299_v57 = vand.u32 2147483648, %v8449_v47 }
 0x967   : > { %6733 = vpow2.f32 %v6411_v46  ;;  %v4653_v48 = vpop.f32.mrf.mxu2  ;;  %v5182_v49 = vpop.f32.mrf.mxu3  ;;  %vm8461_vm13 = vcmp.eq.f32.partialorder %v4768_v55, 8.507059e+37  ;;  %v4771_v9 = vor.u32 1.1754944e-38, %v4770_v59 }
 0x968   : > { %v4654_v52 = vadd.f32 %v4653_v48, %v4515_v33  ;;  %v5183_v39 = vadd.f32 %v5182_v49, %v5044_v34  ;;  %vm8467_vm1 = vcmp.eq.f32.partialorder %v5297_v6, 8.507059e+37  ;;  %v5300_v17 = vor.u32 1.1754944e-38, %v5299_v57  ;;  %v4535_v35 = vpop.permute.xlu2 %4534  ;;  %v4540_v6 = vpop.permute.xlu1 %4539 }
 0x96a   : > { %v6728_v53 = vpop.eup %6727  ;;  %v6380_v38 = vmul.f32 -1.442695, %v4654_v52  ;;  %v6412_v54 = vmul.f32 -1.442695, %v5183_v39 }
 0x96b   : > { %v6730_v56 = vpop.eup %6729  ;;  %v8452_v58 = vadd.f32 1.0, %v6728_v53 }
 0x96c   : > { %v6732_v60 = vpop.eup %6731  ;;  %v4760_v63 = vmul.f32 %v6730_v56, %v4743_v45  ;;  %6735 = vpow2.f32 %v6380_v38  ;;  %vm4765_vm14 = vweird.f32 %v6730_v56 }
 0x96d   : > { %v6734_v0 = vpop.eup %6733  ;;  %v5289_v1 = vmul.f32 %v6732_v60, %v8449_v47  ;;  %6737 = vrcp.f32 %v8452_v58  ;;  %v4783_v10 = vand.u32 2147483647, %v8452_v58  ;;  %vm5294_vm15 = vweird.f32 %v6732_v60  ;;  %vm4766_vm2 = vmor %vm4764_vm12, %vm4765_vm14 }
 0x96e   : > { %v4761_v4 = vsub.f32 1.0, %v4760_v63  ;;  %v8459_v5 = vadd.f32 1.0, %v6734_v0  ;;  %6739 = vpow2.f32 %v6412_v54  ;;  %v4785_v23 = vand.u32 2147483648, %v8452_v58  ;;  %vm5295_vm6 = vmor %vm5293_vm5, %vm5294_vm15  ;;  %v4530_v63 = vpop.permute.xlu0 %4529 }
 0x96f   : > { %v5290_v50 = vsub.f32 1.0, %v5289_v1  ;;  %v4656_v51 = vpop.f32.mrf.mxu2  ;;  %v5185_v28 = vpop.f32.mrf.mxu3  ;;  %vm4779_vm4 = vweird.f32 %v8452_v58  ;;  %vm8482_vm7 = vcmp.eq.f32.partialorder %v4783_v10, 8.507059e+37 }
 0x970   : > { %6741 = vrcp.f32 %v8459_v5  ;;  %v4657_v2 = vadd.f32 %v4656_v51, %v4520_v29  ;;  %v5186_v12 = vadd.f32 %v5185_v28, %v5049_v7  ;;  %v4762_v13 = vmul.f32 %v6730_v56, %v4761_v4 }
 0x971   : > { %v5291_v15 = vmul.f32 %v6732_v60, %v5290_v50  ;;  %v5312_v25 = vand.u32 2147483647, %v8459_v5  ;;  %v5314_v36 = vand.u32 2147483648, %v8459_v5  ;;  %v4786_v19 = vor.u32 1.1754944e-38, %v4785_v23 }
 0x972   : > { %v6736_v3 = vpop.eup %6735  ;;  %v6381_v20 = vmul.f32 -1.442695, %v4657_v2  ;;  %v6413_v21 = vmul.f32 -1.442695, %v5186_v12  ;;  %v4763_v22 = vadd.f32 %v6730_v56, %v4762_v13  ;;  %vm5308_vm9 = vweird.f32 %v8459_v5 }
 0x973   : > { %v6738_v24 = vpop.eup %6737  ;;  %v8472_v26 = vadd.f32 1.0, %v6736_v3  ;;  %v5292_v27 = vadd.f32 %v6732_v60, %v5291_v15  ;;  %vm8499_vm10 = vcmp.eq.f32.partialorder %v5312_v25, 8.507059e+37  ;;  %v5315_v48 = vor.u32 1.1754944e-38, %v5314_v36 }
 0x974   : > { %v6740_v30 = vpop.eup %6739  ;;  %6743 = vpow2.f32 %v6381_v20  ;;  %v4767_v11 = vsel %vm4766_vm2, %v6730_v56, %v4763_v22  ;;  %v4775_v32 = vmul.f32 %v6738_v24, %v8452_v58  ;;  %vm4780_vm8 = vweird.f32 %v6738_v24 }
 0x975   : > { %6745 = vrcp.f32 %v8472_v26  ;;  %v8488_v44 = vadd.f32 1.0, %v6740_v30  ;;  %v4772_v42 = vsel %vm8461_vm13, %v4771_v9, %v4767_v11  ;;  %v5296_v40 = vsel %vm5295_vm6, %v6732_v60, %v5292_v27  ;;  %vm4781_vm12 = vmor %vm4779_vm4, %vm4780_vm8 }
 0x976   : > { %v6742_v41 = vpop.eup %6741  ;;  %6747 = vpow2.f32 %v6413_v21  ;;  %6426 = vmatmul.msk.f32.vlgmr.msra.gmra.mxu0 %vm2014_vm0, %v4772_v42  ;;  %v5301_v14 = vsel %vm8467_vm1, %v5300_v17, %v5296_v40  ;;  %v4776_v37 = vsub.f32 1.0, %v4775_v32  ;;  %v4798_v49 = vand.u32 2147483647, %v8472_v26 }
 0x977   : > { %6749 = vrcp.f32 %v8488_v44  ;;  %6442 = vmatmul.msk.f32.vlgmr.msra.gmra.mxu1 %vm2014_vm0, %v5301_v14  ;;  %v4659_v43 = vpop.f32.mrf.mxu2  ;;  %v5188_v61 = vpop.f32.mrf.mxu3  ;;  %v5304_v62 = vmul.f32 %v6742_v41, %v8459_v5  ;;  %vm5309_vm11 = vweird.f32 %v6742_v41  ;;  %v4800_v54 = vand.u32 2147483648, %v8472_v26 }
 0x978   : > { %v4660_v45 = vadd.f32 %v4659_v43, %v4525_v31  ;;  %v5189_v46 = vadd.f32 %v5188_v61, %v5054_v18  ;;  %v4777_v33 = vmul.f32 %v6738_v24, %v4776_v37  ;;  %vm4794_vm5 = vweird.f32 %v8472_v26  ;;  %vm5310_vm15 = vmor %vm5308_vm9, %vm5309_vm11  ;;  %v5064_v37 = vpop.permute.xlu0 %5063 }
 0x979   : > { %v5305_v34 = vsub.f32 1.0, %v5304_v62  ;;  %v5327_v60 = vand.u32 2147483647, %v8488_v44  ;;  %vm8513_vm13 = vcmp.eq.f32.partialorder %v4798_v49, 8.507059e+37  ;;  %vm5323_vm14 = vweird.f32 %v8488_v44 }
 0x97a   : > { %v6744_v52 = vpop.eup %6743  ;;  %v6382_v39 = vmul.f32 -1.442695, %v4660_v45  ;;  %v6414_v53 = vmul.f32 -1.442695, %v5189_v46  ;;  %v4778_v38 = vadd.f32 %v6738_v24, %v4777_v33  ;;  %v4801_v51 = vor.u32 1.1754944e-38, %v4800_v54 }
 0x97b   : > { %v6746_v55 = vpop.eup %6745  ;;  %v8505_v56 = vadd.f32 1.0, %v6744_v52  ;;  %v5306_v59 = vmul.f32 %v6742_v41, %v5305_v34  ;;  %v5329_v12 = vand.u32 2147483648, %v8488_v44  ;;  %vm8537_vm4 = vcmp.eq.f32.partialorder %v5327_v60, 8.507059e+37 }
 0x97c   : > { %v6748_v29 = vpop.eup %6747  ;;  %6751 = vpow2.f32 %v6382_v39  ;;  %v4782_v0 = vsel %vm4781_vm12, %v6738_v24, %v4778_v38  ;;  %v4790_v1 = vmul.f32 %v6746_v55, %v8472_v26  ;;  %vm4795_vm1 = vweird.f32 %v6746_v55 }
 0x97d   : > { %v8517_v57 = vpop.eup %6749  ;;  %6753 = vrcp.f32 %v8505_v56  ;;  %v8520_v58 = vadd.f32 1.0, %v6748_v29  ;;  %v4787_v7 = vsel %vm8482_vm7, %v4786_v19, %v4782_v0  ;;  %v5307_v4 = vadd.f32 %v6742_v41, %v5306_v59  ;;  %vm4796_vm6 = vmor %vm4794_vm5, %vm4795_vm1 }
 0x97e   : > { %6755 = vpow2.f32 %v6414_v53  ;;  %6427 = vmatmul.msk.f32.gmra.mxu0 %vm2014_vm0, %v4787_v7  ;;  %v4791_v50 = vsub.f32 1.0, %v4790_v1  ;;  %v5319_v28 = vmul.f32 %v8517_v57, %v8488_v44  ;;  %vm5324_vm2 = vweird.f32 %v8517_v57 }
 0x97f   : > { %6757 = vrcp.f32 %v8520_v58  ;;  %v5311_v9 = vsel %vm5310_vm15, %v6742_v41, %v5307_v4  ;;  %v4662_v10 = vpop.f32.mrf.mxu2  ;;  %v5191_v2 = vpop.f32.mrf.mxu3  ;;  %v4813_v20 = vand.u32 2147483647, %v8505_v56  ;;  %v5330_v27 = vor.u32 1.1754944e-38, %v5329_v12 }
 0x980   : > { %v5316_v13 = vsel %vm8499_vm10, %v5315_v48, %v5311_v9  ;;  %v4663_v15 = vadd.f32 %v4662_v10, %v4530_v63  ;;  %v5192_v16 = vadd.f32 %v5191_v2, %v5059_v8  ;;  %v4792_v5 = vmul.f32 %v6746_v55, %v4791_v50  ;;  %vm5325_vm10 = vmor %vm5323_vm14, %vm5324_vm2 }
 0x981   : > { %6443 = vmatmul.msk.f32.gmra.mxu1 %vm2014_vm0, %v5316_v13  ;;  %v5320_v17 = vsub.f32 1.0, %v5319_v28  ;;  %vm4809_vm7 = vweird.f32 %v8505_v56  ;;  %v4815_v11 = vand.u32 2147483648, %v8505_v56  ;;  %vm8551_vm8 = vcmp.eq.f32.partialorder %v4813_v20, 8.507059e+37  ;;  %v5069_v28 = vpop.permute.xlu2 %5068 }
 0x982   : > { %v6752_v21 = vpop.eup %6751  ;;  %v6383_v22 = vmul.f32 -1.442695, %v4663_v15  ;;  %v6415_v23 = vmul.f32 -1.442695, %v5192_v16  ;;  %v4793_v24 = vadd.f32 %v6746_v55, %v4792_v5  ;;  %vm5338_vm9 = vweird.f32 %v8520_v58 }
 0x983   : > { %v6754_v25 = vpop.eup %6753  ;;  %v8542_v30 = vadd.f32 1.0, %v6752_v21  ;;  %v5321_v31 = vmul.f32 %v8517_v57, %v5320_v17  ;;  %v4816_v46 = vor.u32 1.1754944e-38, %v4815_v11  ;;  %v5342_v33 = vand.u32 2147483647, %v8520_v58 }
 0x984   : > { %v6756_v32 = vpop.eup %6755  ;;  %6759 = vpow2.f32 %v6383_v22  ;;  %v4797_v36 = vsel %vm4796_vm6, %v6746_v55, %v4793_v24  ;;  %v4805_v42 = vmul.f32 %v6754_v25, %v8505_v56  ;;  %vm4810_vm11 = vweird.f32 %v6754_v25 }
 0x985   : > { %v8555_v41 = vpop.eup %6757  ;;  %6761 = vrcp.f32 %v8542_v30  ;;  %v8558_v26 = vadd.f32 1.0, %v6756_v32  ;;  %v4802_v18 = vsel %vm8513_vm13, %v4801_v51, %v4797_v36  ;;  %v5322_v14 = vadd.f32 %v8517_v57, %v5321_v31  ;;  %vm4811_vm13 = vmor %vm4809_vm7, %vm4810_vm11 }
 0x986   : > { %6763 = vpow2.f32 %v6415_v23  ;;  %6428 = vmatmul.msk.f32.gmra.mxu0 %vm2014_vm0, %v4802_v18  ;;  %v4806_v19 = vsub.f32 1.0, %v4805_v42  ;;  %v5334_v43 = vmul.f32 %v8555_v41, %v8520_v58  ;;  %vm5339_vm12 = vweird.f32 %v8555_v41  ;;  %v4545_v42 = vpop.permute.xlu0 %4544 }
 0x987   : > { %6765 = vrcp.f32 %v8558_v26  ;;  %v5326_v61 = vsel %vm5325_vm10, %v8517_v57, %v5322_v14  ;;  %v4665_v62 = vpop.f32.mrf.mxu2  ;;  %v5194_v45 = vpop.f32.mrf.mxu3  ;;  %vm8578_vm5 = vcmp.eq.f32.partialorder %v5342_v33, 8.507059e+37  ;;  %v5344_v39 = vand.u32 2147483648, %v8520_v58  ;;  %vm5340_vm15 = vmor %vm5338_vm9, %vm5339_vm12 }
 0x988   : > { %v5331_v47 = vsel %vm8537_vm4, %v5330_v27, %v5326_v61  ;;  %v4666_v34 = vadd.f32 %v4665_v62, %v4535_v35  ;;  %v5195_v44 = vadd.f32 %v5194_v45, %v5064_v37  ;;  %v4807_v48 = vmul.f32 %v6754_v25, %v4806_v19 }
 0x989   : > { %6444 = vmatmul.msk.f32.gmra.mxu1 %vm2014_vm0, %v5331_v47  ;;  %v5335_v49 = vsub.f32 1.0, %v5334_v43  ;;  %v4828_v59 = vand.u32 2147483647, %v8542_v30  ;;  %vm4824_vm14 = vweird.f32 %v8542_v30  ;;  %v4830_v0 = vand.u32 2147483648, %v8542_v30  ;;  %v5074_v43 = vpop.permute.xlu1 %5073 }
 0x98a   : > { %v6760_v53 = vpop.eup %6759  ;;  %v6384_v38 = vmul.f32 -1.442695, %v4666_v34  ;;  %v6416_v54 = vmul.f32 -1.442695, %v5195_v44  ;;  %v4808_v55 = vadd.f32 %v6754_v25, %v4807_v48  ;;  %v5345_v7 = vor.u32 1.1754944e-38, %v5344_v39 }
 0x98b   : > { %v6762_v60 = vpop.eup %6761  ;;  %v8584_v29 = vadd.f32 1.0, %v6760_v53  ;;  %v5336_v63 = vmul.f32 %v8555_v41, %v5335_v49  ;;  %vm8606_vm2 = vcmp.eq.f32.partialorder %v4828_v59, 8.507059e+37  ;;  %v4831_v15 = vor.u32 1.1754944e-38, %v4830_v0 }
 0x98c   : > { %v6764_v1 = vpop.eup %6763  ;;  %6767 = vpow2.f32 %v6384_v38  ;;  %v4812_v57 = vsel %vm4811_vm13, %v6754_v25, %v4808_v55  ;;  %v4820_v4 = vmul.f32 %v6762_v60, %v8542_v30  ;;  %vm4825_vm1 = vweird.f32 %v6762_v60 }
 0x98d   : > { %v8593_v8 = vpop.eup %6765  ;;  %6769 = vrcp.f32 %v8584_v29  ;;  %v8596_v50 = vadd.f32 1.0, %v6764_v1  ;;  %v4817_v56 = vsel %vm8551_vm8, %v4816_v46, %v4812_v57  ;;  %v5337_v51 = vadd.f32 %v8555_v41, %v5336_v63  ;;  %vm4826_vm7 = vmor %vm4824_vm14, %vm4825_vm1 }
 0x98e   : > { %6771 = vpow2.f32 %v6416_v54  ;;  %6429 = vmatmul.msk.f32.gmra.mxu0 %vm2014_vm0, %v4817_v56  ;;  %v4821_v9 = vsub.f32 1.0, %v4820_v4  ;;  %v5349_v16 = vmul.f32 %v8593_v8, %v8558_v26  ;;  %vm5353_vm4 = vweird.f32 %v8558_v26  ;;  %v5079_v10 = vpop.permute.xlu0 %5078 }
 0x98f   : > { %6773 = vrcp.f32 %v8596_v50  ;;  %v5341_v2 = vsel %vm5340_vm15, %v8555_v41, %v5337_v51  ;;  %v4668_v12 = vpop.f32.mrf.mxu2  ;;  %v5197_v13 = vpop.f32.mrf.mxu3  ;;  %v5357_v21 = vand.u32 2147483647, %v8558_v26  ;;  %v5359_v22 = vand.u32 2147483648, %v8558_v26 }
 0x990   : > { %v5346_v58 = vsel %vm8578_vm5, %v5345_v7, %v5341_v2  ;;  %v4669_v5 = vadd.f32 %v4668_v12, %v4540_v6  ;;  %v5198_v17 = vadd.f32 %v5197_v13, %v5069_v28  ;;  %v4822_v3 = vmul.f32 %v6762_v60, %v4821_v9  ;;  %v4550_v7 = vpop.permute.xlu2 %4549 }
 0x991   : > { %6445 = vmatmul.msk.f32.gmra.mxu1 %vm2014_vm0, %v5346_v58  ;;  %v5350_v20 = vsub.f32 1.0, %v5349_v16  ;;  %vm5354_vm6 = vweird.f32 %v8593_v8  ;;  %vm8627_vm8 = vcmp.eq.f32.partialorder %v5357_v21, 8.507059e+37  ;;  %vm4839_vm9 = vweird.f32 %v8584_v29 }
 0x992   : > { %v6768_v23 = vpop.eup %6767  ;;  %v6385_v24 = vmul.f32 -1.442695, %v4669_v5  ;;  %v6417_v27 = vmul.f32 -1.442695, %v5198_v17  ;;  %v4823_v25 = vadd.f32 %v6762_v60, %v4822_v3  ;;  %v5360_v41 = vor.u32 1.1754944e-38, %v5359_v22  ;;  %vm5355_vm10 = vmor %vm5353_vm4, %vm5354_vm6 }
 0x993   : > { %v6770_v31 = vpop.eup %6769  ;;  %v8621_v11 = vadd.f32 1.0, %v6768_v23  ;;  %v5351_v32 = vmul.f32 %v8593_v8, %v5350_v20  ;;  %v4843_v62 = vand.u32 2147483647, %v8584_v29  ;;  %v4845_v45 = vand.u32 2147483648, %v8584_v29 }
 0x994   : > { %v6772_v36 = vpop.eup %6771  ;;  %6775 = vpow2.f32 %v6385_v24  ;;  %v4827_v40 = vsel %vm4826_vm7, %v6762_v60, %v4823_v25  ;;  %v4835_v18 = vmul.f32 %v6770_v31, %v8584_v29  ;;  %vm4840_vm11 = vweird.f32 %v6770_v31 }
 0x995   : > { %v8633_v14 = vpop.eup %6773  ;;  %6777 = vrcp.f32 %v8621_v11  ;;  %v8636_v30 = vadd.f32 1.0, %v6772_v36  ;;  %v4832_v37 = vsel %vm8606_vm2, %v4831_v15, %v4827_v40  ;;  %v5352_v19 = vadd.f32 %v8593_v8, %v5351_v32  ;;  %vm4841_vm13 = vmor %vm4839_vm9, %vm4840_vm11  ;;  %v4555_v40 = vpop.permute.xlu1 %4554 }
 0x996   : > { %6779 = vpow2.f32 %v6417_v27  ;;  %6430 = vmatmul.msk.f32.gmra.mxu0 %vm2014_vm0, %v4832_v37  ;;  %v4836_v61 = vsub.f32 1.0, %v4835_v18  ;;  %v5364_v34 = vmul.f32 %v8633_v14, %v8596_v50  ;;  %vm8655_vm12 = vcmp.eq.f32.partialorder %v4843_v62, 8.507059e+37 }
 0x997   : > { %6781 = vrcp.f32 %v8636_v30  ;;  %v5356_v46 = vsel %vm5355_vm10, %v8593_v8, %v5352_v19  ;;  %v4671_v33 = vpop.f32.mrf.mxu2  ;;  %v5200_v47 = vpop.f32.mrf.mxu3  ;;  %v4846_v39 = vor.u32 1.1754944e-38, %v4845_v45  ;;  %vm5368_vm5 = vweird.f32 %v8596_v50 }
 0x998   : > { %v5361_v44 = vsel %vm8627_vm8, %v5360_v41, %v5356_v46  ;;  %v4672_v26 = vadd.f32 %v4671_v33, %v4545_v42  ;;  %v5201_v48 = vadd.f32 %v5200_v47, %v5074_v43  ;;  %v4837_v49 = vmul.f32 %v6770_v31, %v4836_v61  ;;  %v5084_v62 = vpop.permute.xlu2 %5083 }
 0x999   : > { %6446 = vmatmul.msk.f32.gmra.mxu1 %vm2014_vm0, %v5361_v44  ;;  %v5365_v53 = vsub.f32 1.0, %v5364_v34  ;;  %v5372_v60 = vand.u32 2147483647, %v8596_v50  ;;  %vm5369_vm14 = vweird.f32 %v8633_v14  ;;  %v5374_v6 = vand.u32 2147483648, %v8596_v50 }
 0x99a   : > { %v6776_v38 = vpop.eup %6775  ;;  %v6386_v54 = vmul.f32 -1.442695, %v4672_v26  ;;  %v6418_v55 = vmul.f32 -1.442695, %v5201_v48  ;;  %v4838_v59 = vadd.f32 %v6770_v31, %v4837_v49  ;;  %vm5370_vm1 = vmor %vm5368_vm5, %vm5369_vm14  ;;  %v4858_v58 = vand.u32 2147483647, %v8621_v11 }
 0x99b   : > { %v6778_v63 = vpop.eup %6777  ;;  %v8661_v0 = vadd.f32 1.0, %v6776_v38  ;;  %v5366_v1 = vmul.f32 %v8633_v14, %v5365_v53  ;;  %vm8669_vm15 = vcmp.eq.f32.partialorder %v5372_v60, 8.507059e+37  ;;  %v5375_v2 = vor.u32 1.1754944e-38, %v5374_v6 }
 0x99c   : > { %v6780_v57 = vpop.eup %6779  ;;  %6783 = vpow2.f32 %v6386_v54  ;;  %v4842_v4 = vsel %vm4841_vm13, %v6770_v31, %v4838_v59  ;;  %v4850_v56 = vmul.f32 %v6778_v63, %v8621_v11  ;;  %vm4855_vm2 = vweird.f32 %v6778_v63 }
 0x99d   : > { %v8674_v51 = vpop.eup %6781  ;;  %6785 = vrcp.f32 %v8661_v0  ;;  %v8677_v29 = vadd.f32 1.0, %v6780_v57  ;;  %v4847_v28 = vsel %vm8655_vm12, %v4846_v39, %v4842_v4  ;;  %v5367_v9 = vadd.f32 %v8633_v14, %v5366_v1  ;;  %v4560_v4 = vpop.permute.xlu0 %4559 }
 0x99e   : > { %6787 = vpow2.f32 %v6418_v55  ;;  %6431 = vmatmul.msk.f32.gmra.mxu0 %vm2014_vm0, %v4847_v28  ;;  %v4851_v12 = vsub.f32 1.0, %v4850_v56  ;;  %v4860_v5 = vand.u32 2147483648, %v8621_v11  ;;  %vm4854_vm4 = vweird.f32 %v8621_v11 }
 0x99f   : > { %6789 = vrcp.f32 %v8677_v29  ;;  %v5371_v13 = vsel %vm5370_vm1, %v8633_v14, %v5367_v9  ;;  %v4674_v15 = vpop.f32.mrf.mxu2  ;;  %v5203_v16 = vpop.f32.mrf.mxu3  ;;  %vm8695_vm6 = vcmp.eq.f32.partialorder %v4858_v58, 8.507059e+37  ;;  %v5379_v23 = vmul.f32 %v8674_v51, %v8636_v30  ;;  %vm4856_vm8 = vmor %vm4854_vm4, %vm4855_vm2 }
 0x9a0   : > { %v5376_v17 = vsel %vm8669_vm15, %v5375_v2, %v5371_v13  ;;  %v4675_v3 = vadd.f32 %v4674_v15, %v4550_v7  ;;  %v5204_v20 = vadd.f32 %v5203_v16, %v5079_v10  ;;  %v4852_v50 = vmul.f32 %v6778_v63, %v4851_v12  ;;  %v5089_v2 = vpop.permute.xlu1 %5088 }
 0x9a1   : > { %6447 = vmatmul.msk.f32.gmra.mxu1 %vm2014_vm0, %v5376_v17  ;;  %v4861_v22 = vor.u32 1.1754944e-38, %v4860_v5  ;;  %vm5383_vm7 = vweird.f32 %v8636_v30  ;;  %v5380_v11 = vsub.f32 1.0, %v5379_v23  ;;  %vm5384_vm9 = vweird.f32 %v8674_v51 }
 0x9a2   : > { %v6784_v24 = vpop.eup %6783  ;;  %v6387_v27 = vmul.f32 -1.442695, %v4675_v3  ;;  %v6419_v25 = vmul.f32 -1.442695, %v5204_v20  ;;  %v4853_v31 = vadd.f32 %v6778_v63, %v4852_v50  ;;  %v5389_v36 = vand.u32 2147483648, %v8636_v30  ;;  %vm5385_vm12 = vmor %vm5383_vm7, %vm5384_vm9 }
 0x9a3   : > { %v6786_v32 = vpop.eup %6785  ;;  %v8702_v35 = vadd.f32 1.0, %v6784_v24  ;;  %v5387_v18 = vand.u32 2147483647, %v8636_v30  ;;  %v5381_v61 = vmul.f32 %v8674_v51, %v5380_v11  ;;  %vm4869_vm10 = vweird.f32 %v8661_v0 }
 0x9a4   : > { %v6788_v42 = vpop.eup %6787  ;;  %6791 = vpow2.f32 %v6387_v27  ;;  %v4857_v41 = vsel %vm4856_vm8, %v6778_v63, %v4853_v31  ;;  %v4865_v14 = vmul.f32 %v6786_v32, %v8661_v0  ;;  %v5390_v45 = vor.u32 1.1754944e-38, %v5389_v36 }
 0x9a5   : > { %v8709_v37 = vpop.eup %6789  ;;  %6793 = vrcp.f32 %v8702_v35  ;;  %v8712_v19 = vadd.f32 1.0, %v6788_v42  ;;  %v4862_v43 = vsel %vm8695_vm6, %v4861_v22, %v4857_v41  ;;  %v5382_v33 = vadd.f32 %v8674_v51, %v5381_v61  ;;  %v4565_v41 = vpop.permute.xlu2 %4564 }
 0x9a6   : > { %6795 = vpow2.f32 %v6419_v25  ;;  %6432 = vmatmul.msk.f32.gmra.mxu0 %vm2014_vm0, %v4862_v43  ;;  %v4866_v46 = vsub.f32 1.0, %v4865_v14  ;;  %vm4870_vm11 = vweird.f32 %v6786_v32  ;;  %v4873_v44 = vand.u32 2147483647, %v8661_v0 }
 0x9a7   : > { %6797 = vrcp.f32 %v8712_v19  ;;  %v4677_v47 = vpop.f32.mrf.mxu2  ;;  %v5206_v34 = vpop.f32.mrf.mxu3  ;;  %v4875_v52 = vand.u32 2147483648, %v8661_v0  ;;  %v5386_v39 = vsel %vm5385_vm12, %v8674_v51, %v5382_v33  ;;  %vm5388_vm5 = vcmp.eq.f32.partialorder %v5387_v18, 8.507059e+37  ;;  %vm4871_vm14 = vmor %vm4869_vm10, %vm4870_vm11 }
 0x9a8   : > { %v4678_v26 = vadd.f32 %v4677_v47, %v4555_v40  ;;  %v5207_v48 = vadd.f32 %v5206_v34, %v5084_v62  ;;  %v4867_v49 = vmul.f32 %v6786_v32, %v4866_v46  ;;  %vm8728_vm13 = vcmp.eq.f32.partialorder %v4873_v44, 8.507059e+37 }
 0x9a9   : > { %v5394_v38 = vmul.f32 %v8709_v37, %v8677_v29  ;;  %v5391_v55 = vsel %vm5388_vm5, %v5390_v45, %v5386_v39  ;;  %v4876_v6 = vor.u32 1.1754944e-38, %v4875_v52  ;;  %vm5399_vm15 = vweird.f32 %v8709_v37  ;;  %v5094_v45 = vpop.permute.xlu0 %5093 }
 0x9aa   : > { %v6792_v54 = vpop.eup %6791  ;;  %v6388_v59 = vmul.f32 -1.442695, %v4678_v26  ;;  %v6420_v30 = vmul.f32 -1.442695, %v5207_v48  ;;  %v4868_v60 = vadd.f32 %v6786_v32, %v4867_v49  ;;  %6448 = vmatmul.msk.f32.gmra.mxu1 %vm2014_vm0, %v5391_v55  ;;  %v5402_v56 = vand.u32 2147483647, %v8677_v29 }
 0x9ab   : > { %v8734_v63 = vpop.eup %6793  ;;  %v8736_v1 = vadd.f32 1.0, %v6792_v54  ;;  %v5395_v57 = vsub.f32 1.0, %v5394_v38  ;;  %v5404_v51 = vand.u32 2147483648, %v8677_v29  ;;  %vm5398_vm1 = vweird.f32 %v8677_v29 }
 0x9ac   : > { %v6796_v7 = vpop.eup %6795  ;;  %6799 = vpow2.f32 %v6388_v59  ;;  %v4872_v8 = vsel %vm4871_vm14, %v6786_v32, %v4868_v60  ;;  %vm8755_vm2 = vcmp.eq.f32.partialorder %v5402_v56, 8.507059e+37  ;;  %v4880_v13 = vmul.f32 %v8734_v63, %v8702_v35  ;;  %vm5400_vm6 = vmor %vm5398_vm1, %vm5399_vm15 }
 0x9ad   : > { %v8745_v28 = vpop.eup %6797  ;;  %6801 = vrcp.f32 %v8736_v1  ;;  %v8748_v9 = vadd.f32 1.0, %v6796_v7  ;;  %v4877_v0 = vsel %vm8728_vm13, %v4876_v6, %v4872_v8  ;;  %v5396_v10 = vmul.f32 %v8709_v37, %v5395_v57 }
 0x9ae   : > { %6803 = vpow2.f32 %v6420_v30  ;;  %6433 = vmatmul.msk.f32.gmra.mxu0 %vm2014_vm0, %v4877_v0  ;;  %v5405_v16 = vor.u32 1.1754944e-38, %v5404_v51  ;;  %vm4884_vm4 = vweird.f32 %v8702_v35  ;;  %v4881_v3 = vsub.f32 1.0, %v4880_v13 }
 0x9af   : > { %6805 = vrcp.f32 %v8748_v9  ;;  %v5397_v15 = vadd.f32 %v8709_v37, %v5396_v10  ;;  %v4680_v58 = vpop.f32.mrf.mxu2  ;;  %v5209_v5 = vpop.f32.mrf.mxu3  ;;  %vm4885_vm7 = vweird.f32 %v8734_v63  ;;  %v4888_v50 = vand.u32 2147483647, %v8702_v35 }
 0x9b0   : > { %v4681_v29 = vadd.f32 %v4680_v58, %v4560_v4  ;;  %v5210_v17 = vadd.f32 %v5209_v5, %v5089_v2  ;;  %v4890_v21 = vand.u32 2147483648, %v8702_v35  ;;  %v5409_v22 = vmul.f32 %v8745_v28, %v8712_v19  ;;  %vm4886_vm10 = vmor %vm4884_vm4, %vm4885_vm7  ;;  %v4570_v4 = vpop.permute.xlu1 %4569  ;;  %v5099_v10 = vpop.permute.xlu2 %5098 }
 0x9b1   : > { %v5401_v20 = vsel %vm5400_vm6, %v8709_v37, %v5397_v15  ;;  %v4882_v31 = vmul.f32 %v8734_v63, %v4881_v3  ;;  %vm5413_vm8 = vweird.f32 %v8712_v19  ;;  %vm5414_vm9 = vweird.f32 %v8745_v28 }
 0x9b2   : > { %v6800_v23 = vpop.eup %6799  ;;  %v5406_v24 = vsel %vm8755_vm2, %v5405_v16, %v5401_v20  ;;  %v6389_v27 = vmul.f32 -1.442695, %v4681_v29  ;;  %v6421_v25 = vmul.f32 -1.442695, %v5210_v17  ;;  %v4891_v36 = vor.u32 1.1754944e-38, %v4890_v21  ;;  %vm5415_vm5 = vmor %vm5413_vm8, %vm5414_vm9 }
 0x9b3   : > { %v8775_v32 = vpop.eup %6801  ;;  %v8777_v11 = vadd.f32 1.0, %v6800_v23  ;;  %6449 = vmatmul.msk.f32.gmra.mxu1 %vm2014_vm0, %v5406_v24  ;;  %v5410_v42 = vsub.f32 1.0, %v5409_v22  ;;  %v4883_v18 = vadd.f32 %v8734_v63, %v4882_v31  ;;  %v5417_v14 = vand.u32 2147483647, %v8712_v19 }
 0x9b4   : > { %v6804_v40 = vpop.eup %6803  ;;  %6807 = vpow2.f32 %v6389_v27  ;;  %v5419_v62 = vand.u32 2147483648, %v8712_v19  ;;  %vm4889_vm11 = vcmp.eq.f32.partialorder %v4888_v50, 8.507059e+37  ;;  %v4895_v33 = vmul.f32 %v8775_v32, %v8736_v1 }
 0x9b5   : > { %v8784_v37 = vpop.eup %6805  ;;  %6809 = vrcp.f32 %v8777_v11  ;;  %v8787_v43 = vadd.f32 1.0, %v6804_v40  ;;  %v5411_v61 = vmul.f32 %v8745_v28, %v5410_v42  ;;  %v4887_v46 = vsel %vm4886_vm10, %v8734_v63, %v4883_v18 }
 0x9b6   : > { %6811 = vpow2.f32 %v6421_v25  ;;  %v4892_v47 = vsel %vm4889_vm11, %v4891_v36, %v4887_v46  ;;  %vm5418_vm12 = vcmp.eq.f32.partialorder %v5417_v14, 8.507059e+37  ;;  %v5420_v26 = vor.u32 1.1754944e-38, %v5419_v62 }
 0x9b7   : > { %6813 = vrcp.f32 %v8787_v43  ;;  %v5412_v34 = vadd.f32 %v8745_v28, %v5411_v61  ;;  %v4683_v35 = vpop.f32.mrf.mxu2  ;;  %v5212_v44 = vpop.f32.mrf.mxu3  ;;  %6434 = vmatmul.msk.f32.gmra.mxu0 %vm2014_vm0, %v4892_v47  ;;  %v4896_v52 = vsub.f32 1.0, %v4895_v33  ;;  %vm4900_vm13 = vweird.f32 %v8775_v32 }
 0x9b8   : > { %v4684_v48 = vadd.f32 %v4683_v35, %v4565_v41  ;;  %v5213_v49 = vadd.f32 %v5212_v44, %v5094_v45  ;;  %v4903_v53 = vand.u32 2147483647, %v8736_v1  ;;  %v4905_v38 = vand.u32 2147483648, %v8736_v1  ;;  %v5104_v45 = vpop.permute.xlu1 %5103 }
 0x9b9   : > { %v5416_v39 = vsel %vm5415_vm5, %v8745_v28, %v5412_v34  ;;  %v4897_v60 = vmul.f32 %v8775_v32, %v4896_v52  ;;  %vm4899_vm14 = vweird.f32 %v8736_v1  ;;  %v5424_v57 = vmul.f32 %v8784_v37, %v8748_v9 }
 0x9ba   : > { %v6808_v54 = vpop.eup %6807  ;;  %v5421_v55 = vsel %vm5418_vm12, %v5420_v26, %v5416_v39  ;;  %v6390_v59 = vmul.f32 -1.442695, %v4684_v48  ;;  %v6422_v30 = vmul.f32 -1.442695, %v5213_v49  ;;  %vm8816_vm15 = vcmp.eq.f32.partialorder %v4903_v53, 8.507059e+37  ;;  %vm4901_vm2 = vmor %vm4899_vm14, %vm4900_vm13 }
 0x9bb   : > { %v8810_v19 = vpop.eup %6809  ;;  %v8812_v63 = vadd.f32 1.0, %v6808_v54  ;;  %6450 = vmatmul.msk.f32.gmra.mxu1 %vm2014_vm0, %v5421_v55  ;;  %v4898_v8 = vadd.f32 %v8775_v32, %v4897_v60  ;;  %v4906_v56 = vor.u32 1.1754944e-38, %v4905_v38  ;;  %vm5428_vm1 = vweird.f32 %v8748_v9 }
 0x9bc   : > { %v6812_v7 = vpop.eup %6811  ;;  %6815 = vpow2.f32 %v6390_v59  ;;  %v5425_v28 = vsub.f32 1.0, %v5424_v57  ;;  %v5432_v0 = vand.u32 2147483647, %v8748_v9  ;;  %v5434_v12 = vand.u32 2147483648, %v8748_v9  ;;  %v4575_v9 = vpop.permute.xlu0 %4574 }
 0x9bd   : > { %v8824_v51 = vpop.eup %6813  ;;  %6817 = vrcp.f32 %v8812_v63  ;;  %v8827_v1 = vadd.f32 1.0, %v6812_v7  ;;  %v4902_v2 = vsel %vm4901_vm2, %v8775_v32, %v4898_v8  ;;  %v4910_v13 = vmul.f32 %v8810_v19, %v8777_v11 }
 0x9be   : > { %6819 = vpow2.f32 %v6422_v30  ;;  %v4907_v15 = vsel %vm8816_vm15, %v4906_v56, %v4902_v2  ;;  %v5426_v16 = vmul.f32 %v8784_v37, %v5425_v28  ;;  %vm5429_vm4 = vweird.f32 %v8784_v37  ;;  %v4580_v2 = vpop.permute.xlu2 %4579 }
 0x9bf   : > { %6821 = vrcp.f32 %v8827_v1  ;;  %v4686_v58 = vpop.f32.mrf.mxu2  ;;  %v5215_v5 = vpop.f32.mrf.mxu3  ;;  %6435 = vmatmul.msk.f32.gmra.mxu0 %vm2014_vm0, %v4907_v15  ;;  %vm8842_vm6 = vcmp.eq.f32.partialorder %v5432_v0, 8.507059e+37  ;;  %v4911_v20 = vsub.f32 1.0, %v4910_v13  ;;  %v5435_v21 = vor.u32 1.1754944e-38, %v5434_v12  ;;  %vm5430_vm8 = vmor %vm5428_vm1, %vm5429_vm4 }
 0x9c0   : > { %v4687_v17 = vadd.f32 %v4686_v58, %v4570_v4  ;;  %v5216_v3 = vadd.f32 %v5215_v5, %v5099_v10  ;;  %v5427_v50 = vadd.f32 %v8784_v37, %v5426_v16  ;;  %vm4915_vm7 = vweird.f32 %v8810_v19 }
 0x9c1   : > { %v4918_v22 = vand.u32 2147483647, %v8777_v11  ;;  %v4912_v25 = vmul.f32 %v8810_v19, %v4911_v20  ;;  %v4920_v31 = vand.u32 2147483648, %v8777_v11  ;;  %vm4914_vm9 = vweird.f32 %v8777_v11 }
 0x9c2   : > { %v6816_v23 = vpop.eup %6815  ;;  %v6391_v24 = vmul.f32 -1.442695, %v4687_v17  ;;  %v6423_v27 = vmul.f32 -1.442695, %v5216_v3  ;;  %v5431_v42 = vsel %vm5430_vm8, %v8784_v37, %v5427_v50  ;;  %v5439_v40 = vmul.f32 %v8824_v51, %v8787_v43  ;;  %vm4916_vm11 = vmor %vm4914_vm9, %vm4915_vm7 }
 0x9c3   : > { %v8853_v32 = vpop.eup %6817  ;;  %v8855_v36 = vadd.f32 1.0, %v6816_v23  ;;  %v5436_v18 = vsel %vm8842_vm6, %v5435_v21, %v5431_v42  ;;  %v4913_v14 = vadd.f32 %v8810_v19, %v4912_v25  ;;  %vm4919_vm10 = vcmp.eq.f32.partialorder %v4918_v22, 8.507059e+37 }
 0x9c4   : > { %v6820_v41 = vpop.eup %6819  ;;  %6823 = vpow2.f32 %v6391_v24  ;;  %6451 = vmatmul.msk.f32.gmra.mxu1 %vm2014_vm0, %v5436_v18  ;;  %v4921_v11 = vor.u32 1.1754944e-38, %v4920_v31  ;;  %v5440_v37 = vsub.f32 1.0, %v5439_v40  ;;  %vm5443_vm12 = vweird.f32 %v8787_v43  ;;  %v5109_v10 = vpop.permute.xlu0 %5108 }
 0x9c5   : > { %v8864_v61 = vpop.eup %6821  ;;  %6825 = vrcp.f32 %v8855_v36  ;;  %v8867_v62 = vadd.f32 1.0, %v6820_v41  ;;  %v4917_v46 = vsel %vm4916_vm11, %v8810_v19, %v4913_v14  ;;  %v5447_v33 = vand.u32 2147483647, %v8787_v43 }
 0x9c6   : > { %6827 = vpow2.f32 %v6423_v27  ;;  %v4922_v47 = vsel %vm4919_vm10, %v4921_v11, %v4917_v46  ;;  %v5441_v34 = vmul.f32 %v8824_v51, %v5440_v37  ;;  %vm5444_vm5 = vweird.f32 %v8824_v51 }
 0x9c7   : > { %v5449_v35 = vand.u32 2147483648, %v8787_v43  ;;  %v4689_v44 = vpop.f32.mrf.mxu2  ;;  %v5218_v26 = vpop.f32.mrf.mxu3  ;;  %6829 = vrcp.f32 %v8867_v62  ;;  %6436 = vmatmul.msk.f32.gmra.mxu0 %vm2014_vm0, %v4922_v47  ;;  %v4925_v52 = vmul.f32 %v8853_v32, %v8812_v63  ;;  %vm5448_vm13 = vcmp.eq.f32.partialorder %v5447_v33, 8.507059e+37  ;;  %vm5445_vm15 = vmor %vm5443_vm12, %vm5444_vm5 }
 0x9c8   : > { %v4690_v48 = vadd.f32 %v4689_v44, %v4575_v9  ;;  %v5219_v49 = vadd.f32 %v5218_v26, %v5104_v45  ;;  %v5442_v39 = vadd.f32 %v8824_v51, %v5441_v34  ;;  %vm4929_vm14 = vweird.f32 %v8812_v63 }
 0x9c9   : > { %v5450_v53 = vor.u32 1.1754944e-38, %v5449_v35  ;;  %v4926_v59 = vsub.f32 1.0, %v4925_v52  ;;  %v4935_v30 = vand.u32 2147483648, %v8812_v63  ;;  %v4933_v57 = vand.u32 2147483647, %v8812_v63 }
 0x9ca   : > { %v6824_v38 = vpop.eup %6823  ;;  %v6392_v54 = vmul.f32 -1.442695, %v4690_v48  ;;  %v6424_v55 = vmul.f32 -1.442695, %v5219_v49  ;;  %v5446_v6 = vsel %vm5445_vm15, %v8824_v51, %v5442_v39  ;;  %v5454_v7 = vmul.f32 %v8864_v61, %v8827_v1 }
 0x9cb   : > { %v8887_v60 = vpop.eup %6825  ;;  %v8889_v19 = vadd.f32 1.0, %v6824_v38  ;;  %v5451_v8 = vsel %vm5448_vm13, %v5450_v53, %v5446_v6  ;;  %v4927_v43 = vmul.f32 %v8853_v32, %v4926_v59  ;;  %vm4930_vm1 = vweird.f32 %v8853_v32 }
 0x9cc   : > { %v6828_v4 = vpop.eup %6827  ;;  %6831 = vpow2.f32 %v6392_v54  ;;  %6452 = vmatmul.msk.f32.gmra.mxu1 %vm2014_vm0, %v5451_v8  ;;  %v4936_v28 = vor.u32 1.1754944e-38, %v4935_v30  ;;  %v5455_v51 = vsub.f32 1.0, %v5454_v7  ;;  %vm4934_vm2 = vcmp.eq.f32.partialorder %v4933_v57, 8.507059e+37  ;;  %vm4931_vm6 = vmor %vm4929_vm14, %vm4930_vm1 }
 0x9cd   : > { %6833 = vrcp.f32 %v8889_v19  ;;  %v8898_v56 = vadd.f32 1.0, %v6828_v4  ;;  %v8901_v0 = vpop.eup %6829  ;;  %v4928_v12 = vadd.f32 %v8853_v32, %v4927_v43  ;;  %vm5458_vm4 = vweird.f32 %v8827_v1 }
 0x9ce   : > { %6835 = vpow2.f32 %v6424_v55  ;;  %v5456_v13 = vmul.f32 %v8864_v61, %v5455_v51  ;;  %vm5459_vm7 = vweird.f32 %v8864_v61  ;;  %v5462_v15 = vand.u32 2147483647, %v8827_v1 }
 0x9cf   : > { %v5464_v16 = vand.u32 2147483648, %v8827_v1  ;;  %v4692_v58 = vpop.f32.mrf.mxu2  ;;  %v5221_v5 = vpop.f32.mrf.mxu3  ;;  %v4932_v29 = vsel %vm4931_vm6, %v8853_v32, %v4928_v12  ;;  %v4940_v20 = vmul.f32 %v8887_v60, %v8855_v36  ;;  %6837 = vrcp.f32 %v8898_v56  ;;  %vm5460_vm9 = vmor %vm5458_vm4, %vm5459_vm7 }
 0x9d0   : > { %v4693_v17 = vadd.f32 %v4692_v58, %v4580_v2  ;;  %v5222_v3 = vadd.f32 %v5221_v5, %v5109_v10  ;;  %v4937_v63 = vsel %vm4934_vm2, %v4936_v28, %v4932_v29  ;;  %v5457_v50 = vadd.f32 %v8864_v61, %v5456_v13 }
 0x9d1   : > { %vm5463_vm8 = vcmp.eq.f32.partialorder %v5462_v15, 8.507059e+37  ;;  %6437 = vmatmul.msk.f32.gmra.mxu0 %vm2014_vm0, %v4937_v63  ;;  %v5465_v22 = vor.u32 1.1754944e-38, %v5464_v16  ;;  %v4941_v27 = vsub.f32 1.0, %v4940_v20  ;;  %vm4945_vm10 = vweird.f32 %v8887_v60 }
 0x9d2   : > { %v6832_v21 = vpop.eup %6831  ;;  %v6393_v23 = vmul.f32 -1.442695, %v4693_v17  ;;  %v6425_v24 = vmul.f32 -1.442695, %v5222_v3  ;;  %v5461_v32 = vsel %vm5460_vm9, %v8864_v61, %v5457_v50  ;;  %v4948_v42 = vand.u32 2147483647, %v8855_v36 }
 0x9d3   : > { %v8921_v25 = vpop.eup %6833  ;;  %v8923_v31 = vadd.f32 1.0, %v6832_v21  ;;  %v5466_v41 = vsel %vm5463_vm8, %v5465_v22, %v5461_v32  ;;  %v4942_v1 = vmul.f32 %v8887_v60, %v4941_v27  ;;  %v4950_v9 = vand.u32 2147483648, %v8855_v36 }
 0x9d4   : > { %v6836_v40 = vpop.eup %6835  ;;  %6839 = vpow2.f32 %v6393_v23  ;;  %6453 = vmatmul.msk.f32.gmra.mxu1 %vm2014_vm0, %v5466_v41  ;;  %v5469_v14 = vmul.f32 %v8901_v0, %v8867_v62  ;;  %vm4944_vm11 = vweird.f32 %v8855_v36  ;;  %vm4949_vm5 = vcmp.eq.f32.partialorder %v4948_v42, 8.507059e+37 }
 0x9d5   : > { %6841 = vrcp.f32 %v8923_v31  ;;  %v8931_v18 = vadd.f32 1.0, %v6836_v40  ;;  %v4943_v61 = vadd.f32 %v8887_v60, %v4942_v1  ;;  %v8938_v11 = vpop.eup %6837  ;;  %vm4946_vm12 = vmor %vm4944_vm11, %vm4945_vm10  ;;  %v4951_v37 = vor.u32 1.1754944e-38, %v4950_v9 }
 0x9d6   : > { %6843 = vpow2.f32 %v6425_v24  ;;  %v5470_v45 = vsub.f32 1.0, %v5469_v14  ;;  %v5477_v46 = vand.u32 2147483647, %v8867_v62  ;;  %vm5473_vm13 = vweird.f32 %v8867_v62 }
 0x9d7   : > { %v4947_v33 = vsel %vm4946_vm12, %v8887_v60, %v4943_v61  ;;  %v5479_v47 = vand.u32 2147483648, %v8867_v62  ;;  %v4955_v34 = vmul.f32 %v8921_v25, %v8889_v19  ;;  %6845 = vrcp.f32 %v8931_v18 }
 0x9d8   : > { %v4952_v36 = vsel %vm4949_vm5, %v4951_v37, %v4947_v33  ;;  %v5471_v35 = vmul.f32 %v8901_v0, %v5470_v45  ;;  %vm5474_vm14 = vweird.f32 %v8901_v0  ;;  %vm8952_vm15 = vcmp.eq.f32.partialorder %v5477_v46, 8.507059e+37 }
 0x9d9   : > { %6438 = vmatmul.msk.f32.gmra.mxu0 %vm2014_vm0, %v4952_v36  ;;  %v4956_v48 = vsub.f32 1.0, %v4955_v34  ;;  %vm4959_vm1 = vweird.f32 %v8889_v19  ;;  %v4965_v49 = vand.u32 2147483648, %v8889_v19  ;;  %vm4960_vm2 = vweird.f32 %v8921_v25  ;;  %vm5475_vm4 = vmor %vm5473_vm13, %vm5474_vm14 }
 0x9da   : > { %v6840_v44 = vpop.eup %6839  ;;  %v5472_v53 = vadd.f32 %v8901_v0, %v5471_v35  ;;  %v5484_v38 = vmul.f32 %v8938_v11, %v8898_v56  ;;  %v5480_v55 = vor.u32 1.1754944e-38, %v5479_v47  ;;  %v4963_v30 = vand.u32 2147483647, %v8889_v19  ;;  %vm4961_vm7 = vmor %vm4959_vm1, %vm4960_vm2 }
 0x9db   : > { %v6842_v52 = vpop.eup %6841  ;;  %v8958_v39 = vadd.f32 1.0, %v6840_v44  ;;  %v4957_v59 = vmul.f32 %v8921_v25, %v4956_v48  ;;  %v4966_v60 = vor.u32 1.1754944e-38, %v4965_v49  ;;  %vm5489_vm6 = vweird.f32 %v8938_v11  ;;  %v6859_v49 = vld [vmem:[%s8001_s9] sm:$0xff] }
 0x9dc   : > { %v6844_v54 = vpop.eup %6843  ;;  %v5476_v57 = vsel %vm5475_vm4, %v8901_v0, %v5472_v53  ;;  %v5485_v7 = vsub.f32 1.0, %v5484_v38  ;;  %v5494_v62 = vand.u32 2147483648, %v8898_v56  ;;  %v5492_v51 = vand.u32 2147483647, %v8898_v56 }
 0x9dd   : > { %6847 = vrcp.f32 %v8958_v39  ;;  %v8969_v6 = vadd.f32 1.0, %v6844_v54  ;;  %v5481_v4 = vsel %vm8952_vm15, %v5480_v55, %v5476_v57  ;;  %v4958_v8 = vadd.f32 %v8921_v25, %v4957_v59  ;;  %v6846_v43 = vpop.eup %6845 }
 0x9de   : > { %6454 = vmatmul.msk.f32.gmra.mxu1 %vm2014_vm0, %v5481_v4  ;;  %v5486_v28 = vmul.f32 %v8938_v11, %v5485_v7  ;;  %v4970_v0 = vmul.f32 %v6842_v52, %v8923_v31  ;;  %vm4964_vm8 = vcmp.eq.f32.partialorder %v4963_v30, 8.507059e+37  ;;  %vm5488_vm9 = vweird.f32 %v8898_v56 }
 0x9df   : > { %6849 = vrcp.f32 %v8969_v6  ;;  %v4962_v10 = vsel %vm4961_vm7, %v8921_v25, %v4958_v8  ;;  %vm5490_vm10 = vmor %vm5488_vm9, %vm5489_vm6  ;;  %v5495_v19 = vor.u32 1.1754944e-38, %v5494_v62  ;;  %v4978_v15 = vand.u32 2147483647, %v8923_v31 }
 0x9e0   : > { %v4967_v2 = vsel %vm4964_vm8, %v4966_v60, %v4962_v10  ;;  %v5487_v12 = vadd.f32 %v8938_v11, %v5486_v28  ;;  %v4971_v13 = vsub.f32 1.0, %v4970_v0  ;;  %v4980_v16 = vand.u32 2147483648, %v8923_v31 }
 0x9e1   : > { %6439 = vmatmul.msk.f32.gmra.mxu0 %vm2014_vm0, %v4967_v2  ;;  %v5499_v58 = vmul.f32 %v6846_v43, %v8931_v18  ;;  %vm5493_vm11 = vcmp.eq.f32.partialorder %v5492_v51, 8.507059e+37  ;;  %vm4975_vm12 = vweird.f32 %v6842_v52  ;;  %vm4974_vm5 = vweird.f32 %v8923_v31 }
 0x9e2   : > { %v5491_v29 = vsel %vm5490_vm10, %v8938_v11, %v5487_v12  ;;  %v4972_v17 = vmul.f32 %v6842_v52, %v4971_v13  ;;  %vm5504_vm13 = vweird.f32 %v6846_v43  ;;  %vm4976_vm14 = vmor %vm4974_vm5, %vm4975_vm12  ;;  %vm4979_vm15 = vcmp.eq.f32.partialorder %v4978_v15, 8.507059e+37 }
 0x9e3   : > { %v6848_v5 = vpop.eup %6847  ;;  %v5496_v56 = vsel %vm5493_vm11, %v5495_v19, %v5491_v29  ;;  %v5500_v3 = vsub.f32 1.0, %v5499_v58  ;;  %v4981_v21 = vor.u32 1.1754944e-38, %v4980_v16  ;;  %v5509_v23 = vand.u32 2147483648, %v8931_v18 }
 0x9e4   : > { %v4973_v63 = vadd.f32 %v6842_v52, %v4972_v17  ;;  %v4985_v50 = vmul.f32 %v6848_v5, %v8958_v39  ;;  %v5507_v27 = vand.u32 2147483647, %v8931_v18  ;;  %vm5503_vm1 = vweird.f32 %v8931_v18 }
 0x9e5   : > { %v6850_v20 = vpop.eup %6849  ;;  %v5501_v22 = vmul.f32 %v6846_v43, %v5500_v3  ;;  %vm5505_vm2 = vmor %vm5503_vm1, %vm5504_vm13  ;;  %vm4990_vm4 = vweird.f32 %v6848_v5  ;;  %v4995_v41 = vand.u32 2147483648, %v8958_v39  ;;  %v5510_v14 = vor.u32 1.1754944e-38, %v5509_v23 }
 0x9e6   : > { %6455 = vmatmul.msk.f32.gmra.mxu1 %vm2014_vm0, %v5496_v56  ;;  %v4977_v24 = vsel %vm4976_vm14, %v6842_v52, %v4973_v63  ;;  %v4986_v25 = vsub.f32 1.0, %v4985_v50  ;;  %v5514_v32 = vmul.f32 %v6850_v20, %v8969_v6  ;;  %v4993_v61 = vand.u32 2147483647, %v8958_v39 }
 0x9e7   : > { %v4982_v42 = vsel %vm4979_vm15, %v4981_v21, %v4977_v24  ;;  %v5502_v40 = vadd.f32 %v6846_v43, %v5501_v22  ;;  %vm5508_vm6 = vcmp.eq.f32.partialorder %v5507_v27, 8.507059e+37  ;;  %vm4989_vm7 = vweird.f32 %v8958_v39 }
 0x9e8   : > { %v4987_v31 = vmul.f32 %v6848_v5, %v4986_v25  ;;  %v5515_v1 = vsub.f32 1.0, %v5514_v32  ;;  %vm4991_vm8 = vmor %vm4989_vm7, %vm4990_vm4  ;;  %v4996_v46 = vor.u32 1.1754944e-38, %v4995_v41  ;;  %vm5519_vm9 = vweird.f32 %v6850_v20 }
 0x9e9   : > { %6440 = vmatmul.msk.f32.gmra.mxu0 %vm2014_vm0, %v4982_v42  ;;  %v5506_v9 = vsel %vm5505_vm2, %v6846_v43, %v5502_v40  ;;  %vm4994_vm10 = vcmp.eq.f32.partialorder %v4993_v61, 8.507059e+37  ;;  %v5524_v47 = vand.u32 2147483648, %v8969_v6  ;;  %vm5518_vm11 = vweird.f32 %v8969_v6 }
 0x9ea   : > { %v4988_v11 = vadd.f32 %v6848_v5, %v4987_v31  ;;  %v5516_v37 = vmul.f32 %v6850_v20, %v5515_v1  ;;  %v5511_v45 = vsel %vm5508_vm6, %v5510_v14, %v5506_v9  ;;  %v5522_v36 = vand.u32 2147483647, %v8969_v6  ;;  %vm5520_vm12 = vmor %vm5518_vm11, %vm5519_vm9 }
 0x9eb   : > { %v5525_v44 = vor.u32 1.1754944e-38, %v5524_v47 }
 0x9ec   : > { %v4992_v18 = vsel %vm4991_vm8, %v6848_v5, %v4988_v11  ;;  %v5517_v33 = vadd.f32 %v6850_v20, %v5516_v37  ;;  %vm5523_vm5 = vcmp.eq.f32.partialorder %v5522_v36, 8.507059e+37 }
 0x9ed   : > { %v4997_v34 = vsel %vm4994_vm10, %v4996_v46, %v4992_v18 }
 0x9ee   : > { %6456 = vmatmul.msk.f32.gmra.mxu1 %vm2014_vm0, %v5511_v45  ;;  %v5521_v35 = vsel %vm5520_vm12, %v6850_v20, %v5517_v33 }
 0x9ef   : > { %v5526_v48 = vsel %vm5523_vm5, %v5525_v44, %v5521_v35 }
 0x9f1   : > { %6441 = vmatmul.msk.f32.gmra.mxu0 %vm2014_vm0, %v4997_v34 }
 0x9f3   : > { %v5594_v26 = vpop.f32.mrf.mxu0 }
 0x9f4   : > { %v5756_v52 = vmul.f32 %v6859_v49, %v5594_v26  ;;  %v5708_v39 = vpop.f32.mrf.mxu1 }
 0x9f6   : > { %v5772_v53 = vmul.f32 %v5756_v52, %v5708_v39  ;;  %6457 = vmatmul.msk.f32.gmra.mxu1 %vm2014_vm0, %v5526_v48 }
 0x9f8   : > { %5788 = vst.msk [vmem:[%s9019_s12] sm:$0xff] %vm2785_vm3, %v5772_v53 }
 0x9fb   : > { %v5597_v38 = vpop.f32.mrf.mxu0 }
 0x9fc   : > { %6902 = shalt.err (!%p6899_p3)
}
 0x9fd   : > { %s7091_s25 = smov 256   ;;  %s9367_s20 = sld [smem:[#allocation66_spill]]  ;;  %v6860_v54 = vld [vmem:[%s8001_s9 + $0x8] sm:$0xff] }
 0x9fe   : > { %s7092_s4 = smov 16   ;;  %v5757_v55 = vmul.f32 %v6860_v54, %v5597_v38  ;;  %s5868_s21 = scalar_lea.hbm %s7388_s19, %s6479_s5  ;;  %v5711_v59 = vpop.f32.mrf.mxu1 }
 0x9ff   : > { %6483 = dma.vmem_to_hbm [thread:$0]  (%p7440_p5), %s9022_s13, 512, %s5855_s18, %s9032_s1, %s7091_s25, %s7091_s25, %s7092_s4  }
 0xa00   : > { %s5871_s14 = sshll.u32 %s5868_s21, 4  ;;  %s6478_s24 = sshll.u32 %s7421_s0, 4  ;;  %v5773_v30 = vmul.f32 %v5757_v55, %v5711_v59  ;;  %s9045_s14 = int_to_ptr.hbm [resolvable:$true] %s5871_s14 }
 0xa01   : > { %s5838_s27 = sshll.u32 %s7688_s8, 4  ;;  %s5805_s25 = scalar_lea.sflag [#allocation3], %s7682_s3  ;;  %s5839_s27 = int_to_ptr.vmem [resolvable:$true] %s5838_s27 }
 0xa02   : > { %5789 = vst.msk [vmem:[%s9019_s12 + $0x8] sm:$0xff] %vm2785_vm3, %v5773_v30 }
 0xa03   : > { %s5836_s17 = scalar_lea.hbm %s9367_s20, %s6478_s24  ;;  %s6923_s18 = scalar_lea.hbm %s9367_s20, 32 }
 0xa04   : > { %s5840_s29 = sshll.u32 %s5836_s17, 4  ;;  %s5841_s29 = int_to_ptr.hbm [resolvable:$true] %s5840_s29 }
 0xa05   : > { %s6917_s13 = sshra.s32 %s5841_s29, 4  ;;  %s6918_s13 = int_to_ptr.hbm [resolvable:$true] %s6917_s13 }
 0xa06   : > { %s6919_s5 = scalar_lea.hbm %s6918_s13, 16  ;;  %p6924_p9 = scmp.lt.s32.totalorder %s6918_s13, %s9367_s20 }
 0xa07   : > { %p6920_p4 = scmp.ne.s32.totalorder %s6918_s13, %s6919_s5  ;;  %p6925_p10 = scmp.lt.s32.totalorder %s6923_s18, %s6919_s5 }
 0xa09   : > { %p6921_p7 = pnand %p6920_p4, %p7440_p5  ;;  %p6926_p11 = por %p6925_p10, %p6924_p9 }
 0xa0b   : > { %p6922_p8 = pneg %p6921_p7 }
 0xa0d   : > { %p6927_p12 = pnand %p6926_p11, %p6922_p8 }
 0xa0f   : > { %6930 = shalt.err (!%p6927_p12)
}
 0xa10   : > { %6482 = dma.vmem_to_hbm [thread:$0]  (%p7440_p5), %s5839_s27, 256, %s5841_s29, %s5805_s25   ;;  %v5600_v60 = vpop.f32.mrf.mxu0 }
 0xa11   : > { %s6945_s17 = sshra.s32 %s9045_s14, 4  ;;  %s6951_s4 = scalar_lea.hbm %s7388_s19, 64  ;;  %s6946_s17 = int_to_ptr.hbm [resolvable:$true] %s6945_s17 }
 0xa12   : > { %s6947_s8 = scalar_lea.hbm %s6946_s17, 32  ;;  %p6952_p2 = scmp.lt.s32.totalorder %s6946_s17, %s7388_s19 }
 0xa13   : > { %p6948_p13 = scmp.ne.s32.totalorder %s6946_s17, %s6947_s8  ;;  %p6953_p3 = scmp.lt.s32.totalorder %s6951_s4, %s6947_s8 }
 0xa15   : > { %p6949_p0 = pnand %p6948_p13, %p7440_p5  ;;  %p6954_p4 = por %p6953_p3, %p6952_p2 }
 0xa17   : > { %p6950_p1 = pneg %p6949_p0 }
 0xa19   : > { %p6955_p7 = pnand %p6954_p4, %p6950_p1 }
 0xa1b   : > { %6958 = shalt.err (!%p6955_p7)
}
 0xa1c   : > { %s7093_s21 = smov 128   ;;  %s7094_s29 = smov 8   ;;  %v6861_v6 = vld [vmem:[%s8001_s9 + $0x10] sm:$0xff]  ;;  %v5714_v7 = vpop.f32.mrf.mxu1 }
 0xa1d   : > { %6484 = dma.vmem_to_hbm [thread:$0]  (%p7440_p5), %s9024_s7, 512, %s9045_s14, %s9032_s1, %s7093_s21, %s7093_s21, %s7094_s29   ;;  %v5758_v57 = vmul.f32 %v6861_v6, %v5600_v60 }
 0xa1e   : > { %s6481_s27 = sshll.u32 %s7421_s0, 6  ;;  %s9368_s24 = sshll.u32 %s8341_s10, 4  ;;  %s5887_s24 = int_to_ptr.vmem [resolvable:$true] %s9368_s24 }
 0xa1f   : > { %s5885_s25 = scalar_lea.hbm %s7393_s6, %s6481_s27  ;;  %v5774_v4 = vmul.f32 %v5758_v57, %v5714_v7  ;;  %s5820_s5 = scalar_lea.sflag [#allocation8], %s7682_s3 }
 0xa20   : > { %s5888_s13 = sshll.u32 %s5885_s25, 4  ;;  %s6979_s7 = scalar_lea.hbm %s7393_s6, 128  ;;  %s5889_s13 = int_to_ptr.hbm [resolvable:$true] %s5888_s13 }
 0xa21   : > { %s6973_s18 = sshra.s32 %s5889_s13, 4  ;;  %s6974_s18 = int_to_ptr.hbm [resolvable:$true] %s6973_s18 }
 0xa22   : > { %s6975_s17 = scalar_lea.hbm %s6974_s18, 64  ;;  %p6980_p11 = scmp.lt.s32.totalorder %s6974_s18, %s7393_s6 }
 0xa23   : > { %p6976_p8 = scmp.ne.s32.totalorder %s6974_s18, %s6975_s17  ;;  %p6981_p12 = scmp.lt.s32.totalorder %s6979_s7, %s6975_s17 }
 0xa25   : > { %p6977_p9 = pnand %p6976_p8, %p7440_p5  ;;  %p6982_p13 = por %p6981_p12, %p6980_p11 }
 0xa27   : > { %p6978_p10 = pneg %p6977_p9 }
 0xa29   : > { %p6983_p0 = pnand %p6982_p13, %p6978_p10 }
 0xa2b   : > { %6986 = shalt.err (!%p6983_p0)
}
 0xa2c   : > { %6485 = dma.vmem_to_hbm [thread:$0]  (%p7440_p5), %s5887_s24, 1024, %s5889_s13, %s5820_s5, %s7093_s21, %s7093_s21, %s7094_s29   ;;  %v5603_v8 = vpop.f32.mrf.mxu0  ;;  %v5717_v28 = vpop.f32.mrf.mxu1 }
 0xa2d   : > { %5790 = vst.msk [vmem:[%s9019_s12 + $0x10] sm:$0xff] %vm2785_vm3, %v5774_v4  ;;  %v6862_v62 = vld [vmem:[%s8001_s9 + $0x18] sm:$0xff]  ;;  %v6863_v10 = vld [vmem:[%s8001_s9 + $0x20] sm:$0xff]  ;;  %v6864_v15 = vld [vmem:[%s8001_s9 + $0x28] sm:$0xff] }
 0xa2e   : > { %v5759_v43 = vmul.f32 %v6862_v62, %v5603_v8  ;;  %v6865_v17 = vld [vmem:[%s8001_s9 + $0x30] sm:$0xff]  ;;  %v6866_v50 = vld [vmem:[%s8001_s9 + $0x38] sm:$0xff]  ;;  %v6867_v27 = vld [vmem:[%s8001_s9 + $0x40] sm:$0xff] }
 0xa2f   : > { %v6868_v31 = vld [vmem:[%s8001_s9 + $0x48] sm:$0xff]  ;;  %v6869_v61 = vld [vmem:[%s8001_s9 + $0x50] sm:$0xff]  ;;  %v6870_v46 = vld [vmem:[%s8001_s9 + $0x58] sm:$0xff] }
 0xa30   : > { %v5775_v51 = vmul.f32 %v5759_v43, %v5717_v28  ;;  %v6871_v35 = vld [vmem:[%s8001_s9 + $0x60] sm:$0xff]  ;;  %v6872_v52 = vld [vmem:[%s8001_s9 + $0x68] sm:$0xff]  ;;  %v6873_v55 = vld [vmem:[%s8001_s9 + $0x70] sm:$0xff] }
 0xa31   : > { %v6874_v57 = vld [vmem:[%s8001_s9 + $0x78] sm:$0xff] }
 0xa32   : > { %5791 = vst.msk [vmem:[%s9019_s12 + $0x18] sm:$0xff] %vm2785_vm3, %v5775_v51 }
 0xa34   : > { %v5606_v0 = vpop.f32.mrf.mxu0  ;;  %v5720_v12 = vpop.f32.mrf.mxu1 }
 0xa35   : > { %v5760_v2 = vmul.f32 %v6863_v10, %v5606_v0 }
 0xa37   : > { %v5776_v13 = vmul.f32 %v5760_v2, %v5720_v12 }
 0xa39   : > { %5792 = vst.msk [vmem:[%s9019_s12 + $0x20] sm:$0xff] %vm2785_vm3, %v5776_v13 }
 0xa3c   : > { %v5609_v19 = vpop.f32.mrf.mxu0  ;;  %v5723_v58 = vpop.f32.mrf.mxu1 }
 0xa3d   : > { %v5761_v16 = vmul.f32 %v6864_v15, %v5609_v19 }
 0xa3f   : > { %v5777_v5 = vmul.f32 %v5761_v16, %v5723_v58 }
 0xa41   : > { %5793 = vst.msk [vmem:[%s9019_s12 + $0x28] sm:$0xff] %vm2785_vm3, %v5777_v5 }
 0xa44   : > { %v5612_v29 = vpop.f32.mrf.mxu0  ;;  %v5726_v3 = vpop.f32.mrf.mxu1 }
 0xa45   : > { %v5762_v56 = vmul.f32 %v6865_v17, %v5612_v29 }
 0xa47   : > { %v5778_v20 = vmul.f32 %v5762_v56, %v5726_v3 }
 0xa49   : > { %5794 = vst.msk [vmem:[%s9019_s12 + $0x30] sm:$0xff] %vm2785_vm3, %v5778_v20 }
 0xa4c   : > { %v5615_v63 = vpop.f32.mrf.mxu0  ;;  %v5729_v22 = vpop.f32.mrf.mxu1 }
 0xa4d   : > { %v5763_v21 = vmul.f32 %v6866_v50, %v5615_v63 }
 0xa4f   : > { %v5779_v23 = vmul.f32 %v5763_v21, %v5729_v22 }
 0xa51   : > { %5795 = vst.msk [vmem:[%s9019_s12 + $0x38] sm:$0xff] %vm2785_vm3, %v5779_v23 }
 0xa54   : > { %v5618_v24 = vpop.f32.mrf.mxu0  ;;  %v5732_v32 = vpop.f32.mrf.mxu1 }
 0xa55   : > { %v5764_v25 = vmul.f32 %v6867_v27, %v5618_v24 }
 0xa57   : > { %v5780_v42 = vmul.f32 %v5764_v25, %v5732_v32 }
 0xa59   : > { %5796 = vst.msk [vmem:[%s9019_s12 + $0x40] sm:$0xff] %vm2785_vm3, %v5780_v42 }
 0xa5c   : > { %v5621_v40 = vpop.f32.mrf.mxu0  ;;  %v5735_v1 = vpop.f32.mrf.mxu1 }
 0xa5d   : > { %v5765_v41 = vmul.f32 %v6868_v31, %v5621_v40 }
 0xa5f   : > { %v5781_v9 = vmul.f32 %v5765_v41, %v5735_v1 }
 0xa61   : > { %5797 = vst.msk [vmem:[%s9019_s12 + $0x48] sm:$0xff] %vm2785_vm3, %v5781_v9 }
 0xa64   : > { %v5624_v14 = vpop.f32.mrf.mxu0  ;;  %v5738_v37 = vpop.f32.mrf.mxu1 }
 0xa65   : > { %v5766_v11 = vmul.f32 %v6869_v61, %v5624_v14 }
 0xa67   : > { %v5782_v45 = vmul.f32 %v5766_v11, %v5738_v37 }
 0xa69   : > { %5798 = vst.msk [vmem:[%s9019_s12 + $0x50] sm:$0xff] %vm2785_vm3, %v5782_v45 }
 0xa6c   : > { %v5627_v18 = vpop.f32.mrf.mxu0  ;;  %v5741_v47 = vpop.f32.mrf.mxu1 }
 0xa6d   : > { %v5767_v33 = vmul.f32 %v6870_v46, %v5627_v18 }
 0xa6f   : > { %v5783_v34 = vmul.f32 %v5767_v33, %v5741_v47 }
 0xa71   : > { %5799 = vst.msk [vmem:[%s9019_s12 + $0x58] sm:$0xff] %vm2785_vm3, %v5783_v34 }
 0xa74   : > { %v5630_v36 = vpop.f32.mrf.mxu0  ;;  %v5744_v26 = vpop.f32.mrf.mxu1 }
 0xa75   : > { %v5768_v44 = vmul.f32 %v6871_v35, %v5630_v36 }
 0xa77   : > { %v5784_v48 = vmul.f32 %v5768_v44, %v5744_v26 }
 0xa79   : > { %5800 = vst.msk [vmem:[%s9019_s12 + $0x60] sm:$0xff] %vm2785_vm3, %v5784_v48 }
 0xa7c   : > { %v5633_v49 = vpop.f32.mrf.mxu0  ;;  %v5747_v53 = vpop.f32.mrf.mxu1 }
 0xa7d   : > { %v5769_v39 = vmul.f32 %v6872_v52, %v5633_v49 }
 0xa7f   : > { %v5785_v38 = vmul.f32 %v5769_v39, %v5747_v53 }
 0xa81   : > { %5801 = vst.msk [vmem:[%s9019_s12 + $0x68] sm:$0xff] %vm2785_vm3, %v5785_v38 }
 0xa84   : > { %v5636_v54 = vpop.f32.mrf.mxu0  ;;  %v5750_v30 = vpop.f32.mrf.mxu1 }
 0xa85   : > { %v5770_v59 = vmul.f32 %v6873_v55, %v5636_v54 }
 0xa87   : > { %v5786_v60 = vmul.f32 %v5770_v59, %v5750_v30 }
 0xa89   : > { %5802 = vst.msk [vmem:[%s9019_s12 + $0x70] sm:$0xff] %vm2785_vm3, %v5786_v60 }
 0xa8c   : > { %v5639_v6 = vpop.f32.mrf.mxu0  ;;  %v5753_v4 = vpop.f32.mrf.mxu1 }
 0xa8d   : > { %v5771_v7 = vmul.f32 %v6874_v57, %v5639_v6 }
 0xa8f   : > { %v5787_v8 = vmul.f32 %v5771_v7, %v5753_v4 }
 0xa91   : > { %5803 = vst.msk [vmem:[%s9019_s12 + $0x78] sm:$0xff] %vm2785_vm3, %v5787_v8 }
 0xa92 PF: > { %p6503_p5 = scmp.ge.s32.totalorder %s7029_s28, 2  ;;  %s5906_s0 = sand.u32 1, %s7017_s22  }
 0xa93   : > { %s5907_s15 = scalar_lea.sflag [#allocation3], %s5906_s0 }
 0xa94   : > { %p6491_p1 = pnand %p6503_p5, %p7444_p6 }
 0xa96   : > { %p6492_p2 = pneg %p6491_p1 }
 0xa98   : > { %7004 = dma.done.wait (%p6492_p2), %s5907_s15, 256  }
 0xa99   : > { %7006 = vsyncadd (%p6492_p2), %s5907_s15, 4294967040  ;;  %s9369_s3 = sadd.s32 4294967294, %s7029_s28  }
 0xa9a   : > { %s5916_s9 = sand.u32 1, %s9369_s3  }
 0xa9b   : > { %s5917_s10 = scalar_lea.sflag [#allocation5], %s5916_s9 }
 0xa9c   : > { %7008 = dma.done.wait (%p6492_p2), %s5917_s10, 1024  }
 0xa9d   : > { %7010 = vsyncadd (%p6492_p2), %s5917_s10, 4294966272  ;;  %s5937_s1 = scalar_lea.sflag [#allocation8], %s5906_s0 }
 0xa9e   : > { %7012 = dma.done.wait (%p6492_p2), %s5937_s1, 1024  }
 0xa9f   : > { %7014 = vsyncadd (%p6492_p2), %s5937_s1, 4294966272  ;;  %p136_p3 = scmp.ge.s32.totalorder %s7425_s2, 4   ;;  %s9370_s22 = smov %s7021_s23 }
 0xaa0   : > { %s9371_s23 = smov %s7025_s26  ;;  %s9372_s26 = smov %s7438_s11 }
 0xaa1   : > { %s9373_s28 = smov %s7425_s2  ;;  %138 = sbr.rel (!%p136_p3) target bundleno = 133 (0x85), region = 407 }
 0xaa6   :  { %5951 = vsyncpa [#allocation3], 1 }
 0xaa7   :  { %5953 = vsyncpa [#allocation3 + $0x1], 1 }
 0xaa8   :  { %5954 = vsyncpa [#allocation5], 1 }
 0xaa9   :  { %5956 = vsyncpa [#allocation5 + $0x1], 1 }
 0xaaa   :  { %5957 = vsyncpa [#allocation8], 1 }
 0xaab   :  { %5959 = vsyncpa [#allocation8 + $0x1], 1 }

</bundles_post_ra>
